<compile_context>
chip_gen: v5e
topology: v5e:2x2
jax: 0.10.0
libtpu: 0.0.40
codegen_flags: <defaults>
</compile_context>

<pallas_src>
import math

import jax
import jax.numpy as jnp
from jax.experimental import pallas as pl
from jax.experimental.pallas import tpu as pltpu


# -----------------------------------------------------------------------------
# Kernel
# -----------------------------------------------------------------------------
def _pclstm_seq_kernel(px_ref, h0_ref, c0_ref, wr_ref, co_ref,
                       h_out_ref, c_out_ref, hc_scr, c_scr):
    """Tb pcLSTM steps per grid point; grid = (batch_tiles, T // Tb), time last.

    px_ref          : (Tb, bb, 4H) f32   pre_x_t = x_t @ Wx + b, gates [f, i, g, o]
    h0_ref, c0_ref  : (bb, H)            initial state for this batch tile
    wr_ref          : (2H, 4H)           packed [Wh ; Wc(zero cols for g,o)], mxu dtype
    co_ref          : (H, H)             output-gate peephole on c_t, mxu dtype
    h_out_ref       : (Tb, bb, H)        per-step hidden outputs
    c_out_ref       : (Tb, bb, H)        per-step cell outputs
    hc_scr          : (bb, 2H) mxu dtype persistent packed [h | c] (matmul operand)
    c_scr           : (bb, H)  f32       persistent cell state (elementwise math)
    """
    H = c_scr.shape[-1]
    Tb = px_ref.shape[0]
    mxu_dtype = wr_ref.dtype

    @pl.when(pl.program_id(1) == 0)
    def _():
        hc_scr[:, 0:H] = h0_ref[...].astype(mxu_dtype)
        hc_scr[:, H:2 * H] = c0_ref[...].astype(mxu_dtype)
        c_scr[...] = c0_ref[...].astype(jnp.float32)

    def step(s, carry):
        # Serial per-step MXU work: K = 2H contraction, N = 4H gate lanes.
        pre = px_ref[s] + jnp.dot(hc_scr[...], wr_ref[...],
                                  preferred_element_type=jnp.float32)    # (bb, 4H)

        f_t = jax.nn.sigmoid(pre[:, 0:H])
        i_t = jax.nn.sigmoid(pre[:, H:2 * H])
        g_t = jnp.tanh(pre[:, 2 * H:3 * H])
        c_t = f_t * c_scr[...] + i_t * g_t

        c_mxu = c_t.astype(mxu_dtype)                 # needed for both dots below
        o_pre = pre[:, 3 * H:4 * H] + jnp.dot(c_mxu, co_ref[...],
                                              preferred_element_type=jnp.float32)
        h_t = jax.nn.sigmoid(o_pre) * jnp.tanh(c_t)

        # Carry state: packed [h | c] in MXU dtype, c in f32.
        c_scr[...] = c_t
        hc_scr[:, 0:H] = h_t.astype(mxu_dtype)
        hc_scr[:, H:2 * H] = c_mxu

        h_out_ref[s] = h_t.astype(h_out_ref.dtype)
        c_out_ref[s] = c_t.astype(c_out_ref.dtype)
        return carry

    jax.lax.fori_loop(0, Tb, step, 0, unroll=True)


# -----------------------------------------------------------------------------
# Helpers
# -----------------------------------------------------------------------------
def _pick_time_block(T, requested):
    """Largest divisor of T that is <= requested (default cap 16)."""
    cap = 16 if requested is None else requested
    cap = max(1, min(int(cap), T))
    for d in range(cap, 0, -1):
        if T % d == 0:
            return d
    return 1


def _vmem_limit_bytes(bb, Tb, H, mxu_dtype, out_dtype):
    """Footprint-derived scoped-VMEM limit (no artificial 32 MiB floor)."""
    mb = jnp.dtype(mxu_dtype).itemsize
    ob = jnp.dtype(out_dtype).itemsize
    resident = (2 * H * 4 * H + H * H) * mb                  # wr + co
    streamed = Tb * bb * 4 * H * 4                            # pre_x block (f32)
    streamed += 2 * Tb * bb * H * ob                          # h_out + c_out blocks
    streamed += 2 * bb * H * 4                                # h0 + c0 (<= f32)
    scratch = bb * 2 * H * mb + bb * H * 4                    # hc_scr + c_scr
    est = 2 * (resident + streamed) + scratch                 # double-buffered pipeline
    try:
        phys = pltpu.get_tpu_info().vmem_capacity_bytes       # 64 MiB/TC on v7x
    except Exception:
        phys = 64 * 1024 * 1024
    if est > phys - (8 << 20):
        raise ValueError(
            f"pcLSTM tile config needs ~{est >> 20} MiB VMEM but chip has "
            f"{phys >> 20} MiB; reduce batch_block / time_block.")
    limit = max(est + (4 << 20), 8 << 20)                     # small safety floor
    return int(min(limit, phys - (4 << 20)))


# -----------------------------------------------------------------------------
# Wrappers
# -----------------------------------------------------------------------------
def pack_params(params, mxu_dtype=jnp.bfloat16):
    """One-time gate packing (keep OUT of the hot path).

    Gate order along the 4H lane axis: [f, i, g(c), o].
      wx : (H, 4H)   input projection (hoisted out of the recurrence)
      wr : (2H, 4H)  rows [Wh ; Wc], Wc block has zero columns for the g/o gates
      co : (H, H)    output-gate peephole on c_t
      b  : (4H,)     packed biases, folded into pre_x outside the kernel
    """
    H = params["w_xf"].shape[0]
    wx = jnp.concatenate(
        [params["w_xf"], params["w_xi"], params["w_xc"], params["w_xo"]],
        axis=1).astype(mxu_dtype)
    wh = jnp.concatenate(
        [params["w_hf"], params["w_hi"], params["w_hc"], params["w_ho"]], axis=1)
    zeros_go = jnp.zeros((H, 2 * H), params["c_f"].dtype)
    wc = jnp.concatenate([params["c_f"], params["c_i"], zeros_go], axis=1)
    wr = jnp.concatenate([wh, wc], axis=0).astype(mxu_dtype)
    co = params["c_o"].astype(mxu_dtype)
    b = jnp.concatenate(
        [params["b_f"], params["b_i"], params["b_c"], params["b_o"]]
    ).astype(jnp.float32)
    return {"wx": wx, "wr": wr, "co": co, "b": b}


def pclstm_sequence(xs, h0, c0, packed, *, batch_block=None, time_block=None,
                    out_dtype=None):
    """Run T pcLSTM steps in a single pallas_call (weights stay VMEM-resident).

    xs : (T, B, H), h0/c0 : (B, H).  Returns (hs, cs), each (T, B, H).
    batch_block : defaults to B (nb=1).  On v7x pass B//2 to use both TensorCores.
    time_block  : timesteps per grid step; defaults to the largest divisor of T <= 16.
    out_dtype   : output dtype (pass jnp.bfloat16 to halve HBM writeback).
    """
    T, B, H = xs.shape
    assert h0.shape == (B, H) and c0.shape == (B, H)
    assert H % 128 == 0, "H must be a multiple of 128 (lane-aligned gate slices)"
    assert packed["wr"].shape == (2 * H, 4 * H)

    bb = B if batch_block is None else int(batch_block)
    assert B % bb == 0 and bb % 8 == 0, "batch_block must divide B and be a multiple of 8"
    nb = B // bb
    Tb = _pick_time_block(T, time_block)
    ntb = T // Tb
    out_dtype = xs.dtype if out_dtype is None else jnp.dtype(out_dtype)
    mxu_dtype = packed["wr"].dtype

    # --- Hoisted input projection: one big parallel matmul over all T*B rows. ---
    prec = jax.lax.Precision.HIGHEST if mxu_dtype == jnp.float32 else None
    pre_x = jnp.dot(xs.reshape(T * B, H).astype(mxu_dtype), packed["wx"],
                    preferred_element_type=jnp.float32, precision=prec)
    pre_x = (pre_x + packed["b"][None, :]).reshape(T, B, 4 * H)

    hs, cs = pl.pallas_call(
        _pclstm_seq_kernel,
        out_shape=(
            jax.ShapeDtypeStruct((T, B, H), out_dtype),
            jax.ShapeDtypeStruct((T, B, H), out_dtype),
        ),
        grid=(nb, ntb),
        in_specs=[
            pl.BlockSpec((Tb, bb, 4 * H), lambda i, tb: (tb, i, 0)),   # pre_x block
            pl.BlockSpec((bb, H), lambda i, tb: (i, 0)),               # h0
            pl.BlockSpec((bb, H), lambda i, tb: (i, 0)),               # c0
            pl.BlockSpec((2 * H, 4 * H), lambda i, tb: (0, 0)),        # Wr (resident)
            pl.BlockSpec((H, H), lambda i, tb: (0, 0)),                # c_o (resident)
        ],
        out_specs=(
            pl.BlockSpec((Tb, bb, H), lambda i, tb: (tb, i, 0)),
            pl.BlockSpec((Tb, bb, H), lambda i, tb: (tb, i, 0)),
        ),
        scratch_shapes=[
            pltpu.VMEM((bb, 2 * H), mxu_dtype),     # packed [h | c] matmul operand
            pltpu.VMEM((bb, H), jnp.float32),       # f32 cell state
        ],
        compiler_params=pltpu.CompilerParams(
            dimension_semantics=("parallel", "arbitrary"),
            vmem_limit_bytes=_vmem_limit_bytes(bb, Tb, H, mxu_dtype, out_dtype)),
    )(pre_x, h0, c0, packed["wr"], packed["co"])
    return hs, cs


def pclstm_cell(x, hx, packed, *, batch_block=None, time_block=None):
    """Single-step forward matching pcLSTMCell.forward(x, (h, c)) -> (h_t, c_t)."""
    h, c = hx
    B = x.shape[0]
    H = packed["co"].shape[0]
    if h is None:
        h = jnp.zeros((B, H), x.dtype)
        c = jnp.zeros((B, H), x.dtype)
    hs, cs = pclstm_sequence(x[None], h, c, packed,
                             batch_block=batch_block, time_block=time_block)
    return hs[0], cs[0]
    # TODO(synk): training-mode dropout on h_t is omitted (eval / dropout=0.0 path).


# -----------------------------------------------------------------------------
# Pure-JAX reference (mirrors the PyTorch forward exactly)
# -----------------------------------------------------------------------------
def pclstm_cell_ref(x, h, c, p):
    hp = jax.lax.Precision.HIGHEST
    mm = lambda a, b: jnp.dot(a, b, precision=hp)
    f_t = jax.nn.sigmoid(mm(x, p["w_xf"]) + mm(h, p["w_hf"]) + mm(c, p["c_f"]) + p["b_f"])
    i_t = jax.nn.sigmoid(mm(x, p["w_xi"]) + mm(h, p["w_hi"]) + mm(c, p["c_i"]) + p["b_i"])
    g_t = jnp.tanh(mm(x, p["w_xc"]) + mm(h, p["w_hc"]) + p["b_c"])
    c_t = c * f_t + i_t * g_t
    o_t = jax.nn.sigmoid(mm(x, p["w_xo"]) + mm(h, p["w_ho"]) + mm(c_t, p["c_o"]) + p["b_o"])
    h_t = o_t * jnp.tanh(c_t)
    return h_t, c_t


def pclstm_sequence_ref(xs, h0, c0, p):
    def step(carry, x):
        h, c = pclstm_cell_ref(x, carry[0], carry[1], p)
        return (h, c), (h, c)
    _, (hs, cs) = jax.lax.scan(step, (h0, c0), xs)
    return hs, cs


def init_params(key, hidden_size):
    """Mirror reset_parameters(): U(-std, std), std = 1/sqrt(H)."""
    std = 1.0 / math.sqrt(hidden_size)
    names_2d = ["w_xi", "w_xf", "w_xo", "w_xc",
                "w_hi", "w_hf", "w_ho", "w_hc",
                "c_i", "c_f", "c_o"]
    names_1d = ["b_i", "b_f", "b_o", "b_c"]
    keys = jax.random.split(key, len(names_2d) + len(names_1d))
    params = {}
    for i, n in enumerate(names_2d):
        params[n] = jax.random.uniform(
            keys[i], (hidden_size, hidden_size), jnp.float32, -std, std)
    for j, n in enumerate(names_1d):
        params[n] = jax.random.uniform(
            keys[len(names_2d) + j], (hidden_size,), jnp.float32, -std, std)
    return params


if __name__ == "__main__":
    # Small but lane-friendly demo sizes: H multiple of 128, B multiple of 8.
    # (Production: batch_block >= 128/256 to fill the MXU M dimension; on v7x use
    #  batch_block = B // 2 so both TensorCores are used.)
    T, B, H = 8, 16, 128

    key = jax.random.PRNGKey(0)
    k_p, k_x, k_h, k_c = jax.random.split(key, 4)
    params = init_params(k_p, H)

    xs = jax.random.normal(k_x, (T, B, H), jnp.float32)
    h0 = jax.random.normal(k_h, (B, H), jnp.float32)
    c0 = jax.random.normal(k_c, (B, H), jnp.float32)

    hs_ref, cs_ref = pclstm_sequence_ref(xs, h0, c0, params)

    seq_fn = jax.jit(pclstm_sequence,
                     static_argnames=("batch_block", "time_block", "out_dtype"))

    # 1) bf16-MXU fused-sequence path (single batch tile, blocked time axis).
    packed_bf16 = pack_params(params, mxu_dtype=jnp.bfloat16)
    hs, cs = seq_fn(xs, h0, c0, packed_bf16, time_block=4)
    jax.block_until_ready((hs, cs))
    assert jnp.allclose(hs, hs_ref, atol=1e-1, rtol=1e-1), "bf16 h mismatch"
    assert jnp.allclose(cs, cs_ref, atol=1e-1, rtol=1e-1), "bf16 c mismatch"

    # 2) Same path with batch tiling (nb=2) — exercises state re-init per tile
    #    (the configuration one would use on a 2-TensorCore v7x).
    hs2, cs2 = seq_fn(xs, h0, c0, packed_bf16, batch_block=8, time_block=2)
    jax.block_until_ready((hs2, cs2))
    assert jnp.allclose(hs2, hs_ref, atol=1e-1, rtol=1e-1), "tiled bf16 h mismatch"
    assert jnp.allclose(cs2, cs_ref, atol=1e-1, rtol=1e-1), "tiled bf16 c mismatch"

    # 3) f32-MXU full-sequence path (tight tolerance; for long-T drift-sensitive use).
    packed_f32 = pack_params(params, mxu_dtype=jnp.float32)
    hs3, cs3 = seq_fn(xs, h0, c0, packed_f32, time_block=4)
    jax.block_until_ready((hs3, cs3))
    assert jnp.allclose(hs3, hs_ref, atol=1e-3, rtol=1e-3), "f32 seq h mismatch"
    assert jnp.allclose(cs3, cs_ref, atol=1e-3, rtol=1e-3), "f32 seq c mismatch"

    # 4) f32 single-step path (exactly the module's forward).
    h1, c1 = jax.jit(pclstm_cell)(xs[0], (h0, c0), packed_f32)
    jax.block_until_ready((h1, c1))
    h1_ref, c1_ref = pclstm_cell_ref(xs[0], h0, c0, params)
    assert jnp.allclose(h1, h1_ref, atol=1e-4, rtol=1e-4), "f32 h mismatch"
    assert jnp.allclose(c1, c1_ref, atol=1e-4, rtol=1e-4), "f32 c mismatch"

    print("KERNEL_OK")
</pallas_src>

<mosaic_0001>
module attributes {stable_mosaic.version = 11 : i64} {
  func.func @_pclstm_seq_kernel(%arg0: i32, %arg1: i32, %arg2: memref<4x16x512xf32, #tpu.memory_space<vmem>>, %arg3: memref<16x128xf32, #tpu.memory_space<vmem>>, %arg4: memref<16x128xf32, #tpu.memory_space<vmem>>, %arg5: memref<256x512xbf16, #tpu.memory_space<vmem>>, %arg6: memref<128x128xbf16, #tpu.memory_space<vmem>>, %arg7: memref<4x16x128xf32, #tpu.memory_space<vmem>>, %arg8: memref<4x16x128xf32, #tpu.memory_space<vmem>>, %arg9: memref<16x256xbf16, #tpu.memory_space<vmem>>, %arg10: memref<16x128xf32, #tpu.memory_space<vmem>>) attributes {dimension_semantics = [#tpu.dimension_semantics<parallel>, #tpu.dimension_semantics<arbitrary>], iteration_bounds = array<i64: 1, 2>, scalar_prefetch = 0 : i64, scratch_operands = 2 : i64, tpu.core_type = #tpu.core_type<tc>, window_params = [{transform_indices = @transform_0, window_bounds = array<i64: 4, 16, 512>}, {transform_indices = @transform_1, window_bounds = array<i64: 16, 128>}, {transform_indices = @transform_2, window_bounds = array<i64: 16, 128>}, {pipeline_mode = #tpu.pipeline_mode<synchronous>, transform_indices = @transform_3, window_bounds = array<i64: 256, 512>}, {pipeline_mode = #tpu.pipeline_mode<synchronous>, transform_indices = @transform_4, window_bounds = array<i64: 128, 128>}, {transform_indices = @transform_5, window_bounds = array<i64: 4, 16, 128>}, {transform_indices = @transform_6, window_bounds = array<i64: 4, 16, 128>}]} {
    %c0_i32 = arith.constant 0 : i32
    %0 = arith.cmpi eq, %arg1, %c0_i32 : i32
    %1 = arith.extui %0 : i1 to i32
    %c0_i32_0 = arith.constant 0 : i32
    %2 = arith.cmpi ne, %1, %c0_i32_0 : i32
    scf.if %2 {
      %c0_99 = arith.constant 0 : index
      %c0_100 = arith.constant 0 : index
      %199 = vector.load %arg3[%c0_99, %c0_100] : memref<16x128xf32, #tpu.memory_space<vmem>>, vector<16x128xf32>
      %200 = arith.truncf %199 : vector<16x128xf32> to vector<16x128xbf16>
      %c0_101 = arith.constant 0 : index
      %c0_102 = arith.constant 0 : index
      %201 = vector.load %arg9[%c0_101, %c0_102] : memref<16x256xbf16, #tpu.memory_space<vmem>>, vector<16x128xbf16>
      tpu.vector_store %arg9[%c0_101, %c0_102], %200 {strides = array<i32>} : memref<16x256xbf16, #tpu.memory_space<vmem>>, vector<16x128xbf16>,
      %c0_103 = arith.constant 0 : index
      %c0_104 = arith.constant 0 : index
      %202 = vector.load %arg4[%c0_103, %c0_104] : memref<16x128xf32, #tpu.memory_space<vmem>>, vector<16x128xf32>
      %203 = arith.truncf %202 : vector<16x128xf32> to vector<16x128xbf16>
      %c0_105 = arith.constant 0 : index
      %c128_106 = arith.constant 128 : index
      %204 = vector.load %arg9[%c0_105, %c128_106] : memref<16x256xbf16, #tpu.memory_space<vmem>>, vector<16x128xbf16>
      tpu.vector_store %arg9[%c0_105, %c128_106], %203 {strides = array<i32>} : memref<16x256xbf16, #tpu.memory_space<vmem>>, vector<16x128xbf16>,
      %c0_107 = arith.constant 0 : index
      %c0_108 = arith.constant 0 : index
      %205 = vector.load %arg4[%c0_107, %c0_108] : memref<16x128xf32, #tpu.memory_space<vmem>>, vector<16x128xf32>
      %c0_109 = arith.constant 0 : index
      %c0_110 = arith.constant 0 : index
      %206 = vector.load %arg10[%c0_109, %c0_110] : memref<16x128xf32, #tpu.memory_space<vmem>>, vector<16x128xf32>
      tpu.vector_store %arg10[%c0_109, %c0_110], %205 {strides = array<i32>} : memref<16x128xf32, #tpu.memory_space<vmem>>, vector<16x128xf32>,
    } else {
    }
    %c0_i32_1 = arith.constant 0 : i32
    %3 = arith.index_cast %c0_i32_1 : i32 to index
    %c0 = arith.constant 0 : index
    %c0_2 = arith.constant 0 : index
    %4 = vector.load %arg2[%3, %c0, %c0_2] : memref<4x16x512xf32, #tpu.memory_space<vmem>>, vector<1x16x512xf32>
    %5 = vector.shape_cast %4 : vector<1x16x512xf32> to vector<16x512xf32>
    %c0_3 = arith.constant 0 : index
    %c0_4 = arith.constant 0 : index
    %6 = vector.load %arg9[%c0_3, %c0_4] : memref<16x256xbf16, #tpu.memory_space<vmem>>, vector<16x256xbf16>
    %c0_5 = arith.constant 0 : index
    %c0_6 = arith.constant 0 : index
    %7 = vector.load %arg5[%c0_5, %c0_6] : memref<256x512xbf16, #tpu.memory_space<vmem>>, vector<256x512xbf16>
    %cst = arith.constant dense<0.000000e+00> : vector<16x512xf32>
    %8 = tpu.matmul %6, %7, %cst {dimension_numbers = #tpu.dot_dimension_numbers<[1], [0], [0], [1], [0, 0, 1, 1], [], []>} : vector<16x256xbf16>, vector<256x512xbf16>, vector<16x512xf32> -> vector<16x512xf32>
    %9 = arith.addf %5, %8 : vector<16x512xf32>
    %10 = vector.extract_strided_slice %9 {offsets = [0, 0], sizes = [16, 128], strides = [1, 1]} : vector<16x512xf32> to vector<16x128xf32>
    %11 = arith.negf %10 : vector<16x128xf32>
    %12 = math.exp %11 : vector<16x128xf32>
    %cst_7 = arith.constant 1.000000e+00 : f32
    %13 = vector.broadcast %cst_7 : f32 to vector<16x128xf32>
    %14 = arith.addf %13, %12 : vector<16x128xf32>
    %15 = arith.divf %13, %14 : vector<16x128xf32>
    %16 = vector.extract_strided_slice %9 {offsets = [0, 128], sizes = [16, 128], strides = [1, 1]} : vector<16x512xf32> to vector<16x128xf32>
    %17 = arith.negf %16 : vector<16x128xf32>
    %18 = math.exp %17 : vector<16x128xf32>
    %cst_8 = arith.constant 1.000000e+00 : f32
    %19 = vector.broadcast %cst_8 : f32 to vector<16x128xf32>
    %20 = arith.addf %19, %18 : vector<16x128xf32>
    %21 = arith.divf %19, %20 : vector<16x128xf32>
    %22 = vector.extract_strided_slice %9 {offsets = [0, 256], sizes = [16, 128], strides = [1, 1]} : vector<16x512xf32> to vector<16x128xf32>
    %23 = math.tanh %22 : vector<16x128xf32>
    %c0_9 = arith.constant 0 : index
    %c0_10 = arith.constant 0 : index
    %24 = vector.load %arg10[%c0_9, %c0_10] : memref<16x128xf32, #tpu.memory_space<vmem>>, vector<16x128xf32>
    %25 = arith.mulf %15, %24 : vector<16x128xf32>
    %26 = arith.mulf %21, %23 : vector<16x128xf32>
    %27 = arith.addf %25, %26 : vector<16x128xf32>
    %28 = arith.truncf %27 : vector<16x128xf32> to vector<16x128xbf16>
    %29 = vector.extract_strided_slice %9 {offsets = [0, 384], sizes = [16, 128], strides = [1, 1]} : vector<16x512xf32> to vector<16x128xf32>
    %c0_11 = arith.constant 0 : index
    %c0_12 = arith.constant 0 : index
    %30 = vector.load %arg6[%c0_11, %c0_12] : memref<128x128xbf16, #tpu.memory_space<vmem>>, vector<128x128xbf16>
    %cst_13 = arith.constant dense<0.000000e+00> : vector<16x128xf32>
    %31 = tpu.matmul %28, %30, %cst_13 {dimension_numbers = #tpu.dot_dimension_numbers<[1], [0], [0], [1], [0, 0, 1, 1], [], []>} : vector<16x128xbf16>, vector<128x128xbf16>, vector<16x128xf32> -> vector<16x128xf32>
    %32 = arith.addf %29, %31 : vector<16x128xf32>
    %33 = arith.negf %32 : vector<16x128xf32>
    %34 = math.exp %33 : vector<16x128xf32>
    %cst_14 = arith.constant 1.000000e+00 : f32
    %35 = vector.broadcast %cst_14 : f32 to vector<16x128xf32>
    %36 = arith.addf %35, %34 : vector<16x128xf32>
    %37 = arith.divf %35, %36 : vector<16x128xf32>
    %38 = math.tanh %27 : vector<16x128xf32>
    %39 = arith.mulf %37, %38 : vector<16x128xf32>
    %c0_15 = arith.constant 0 : index
    %c0_16 = arith.constant 0 : index
    %40 = vector.load %arg10[%c0_15, %c0_16] : memref<16x128xf32, #tpu.memory_space<vmem>>, vector<16x128xf32>
    tpu.vector_store %arg10[%c0_15, %c0_16], %27 {strides = array<i32>} : memref<16x128xf32, #tpu.memory_space<vmem>>, vector<16x128xf32>,
    %41 = arith.truncf %39 : vector<16x128xf32> to vector<16x128xbf16>
    %c0_17 = arith.constant 0 : index
    %c0_18 = arith.constant 0 : index
    %42 = vector.load %arg9[%c0_17, %c0_18] : memref<16x256xbf16, #tpu.memory_space<vmem>>, vector<16x128xbf16>
    tpu.vector_store %arg9[%c0_17, %c0_18], %41 {strides = array<i32>} : memref<16x256xbf16, #tpu.memory_space<vmem>>, vector<16x128xbf16>,
    %c0_19 = arith.constant 0 : index
    %c128 = arith.constant 128 : index
    %43 = vector.load %arg9[%c0_19, %c128] : memref<16x256xbf16, #tpu.memory_space<vmem>>, vector<16x128xbf16>
    tpu.vector_store %arg9[%c0_19, %c128], %28 {strides = array<i32>} : memref<16x256xbf16, #tpu.memory_space<vmem>>, vector<16x128xbf16>,
    %44 = arith.index_cast %c0_i32_1 : i32 to index
    %c0_20 = arith.constant 0 : index
    %c0_21 = arith.constant 0 : index
    %45 = vector.load %arg7[%44, %c0_20, %c0_21] : memref<4x16x128xf32, #tpu.memory_space<vmem>>, vector<1x16x128xf32>
    %46 = vector.shape_cast %45 : vector<1x16x128xf32> to vector<16x128xf32>
    %47 = vector.shape_cast %39 : vector<16x128xf32> to vector<1x16x128xf32>
    tpu.vector_store %arg7[%44, %c0_20, %c0_21], %47 {strides = array<i32>} : memref<4x16x128xf32, #tpu.memory_space<vmem>>, vector<1x16x128xf32>,
    %48 = arith.index_cast %c0_i32_1 : i32 to index
    %c0_22 = arith.constant 0 : index
    %c0_23 = arith.constant 0 : index
    %49 = vector.load %arg8[%48, %c0_22, %c0_23] : memref<4x16x128xf32, #tpu.memory_space<vmem>>, vector<1x16x128xf32>
    %50 = vector.shape_cast %49 : vector<1x16x128xf32> to vector<16x128xf32>
    %51 = vector.shape_cast %27 : vector<16x128xf32> to vector<1x16x128xf32>
    tpu.vector_store %arg8[%48, %c0_22, %c0_23], %51 {strides = array<i32>} : memref<4x16x128xf32, #tpu.memory_space<vmem>>, vector<1x16x128xf32>,
    %c1_i32 = arith.constant 1 : i32
    %52 = arith.index_cast %c1_i32 : i32 to index
    %c0_24 = arith.constant 0 : index
    %c0_25 = arith.constant 0 : index
    %53 = vector.load %arg2[%52, %c0_24, %c0_25] : memref<4x16x512xf32, #tpu.memory_space<vmem>>, vector<1x16x512xf32>
    %54 = vector.shape_cast %53 : vector<1x16x512xf32> to vector<16x512xf32>
    %c0_26 = arith.constant 0 : index
    %c0_27 = arith.constant 0 : index
    %55 = vector.load %arg9[%c0_26, %c0_27] : memref<16x256xbf16, #tpu.memory_space<vmem>>, vector<16x256xbf16>
    %c0_28 = arith.constant 0 : index
    %c0_29 = arith.constant 0 : index
    %56 = vector.load %arg5[%c0_28, %c0_29] : memref<256x512xbf16, #tpu.memory_space<vmem>>, vector<256x512xbf16>
    %cst_30 = arith.constant dense<0.000000e+00> : vector<16x512xf32>
    %57 = tpu.matmul %55, %56, %cst_30 {dimension_numbers = #tpu.dot_dimension_numbers<[1], [0], [0], [1], [0, 0, 1, 1], [], []>} : vector<16x256xbf16>, vector<256x512xbf16>, vector<16x512xf32> -> vector<16x512xf32>
    %58 = arith.addf %54, %57 : vector<16x512xf32>
    %59 = vector.extract_strided_slice %58 {offsets = [0, 0], sizes = [16, 128], strides = [1, 1]} : vector<16x512xf32> to vector<16x128xf32>
    %60 = arith.negf %59 : vector<16x128xf32>
    %61 = math.exp %60 : vector<16x128xf32>
    %cst_31 = arith.constant 1.000000e+00 : f32
    %62 = vector.broadcast %cst_31 : f32 to vector<16x128xf32>
    %63 = arith.addf %62, %61 : vector<16x128xf32>
    %64 = arith.divf %62, %63 : vector<16x128xf32>
    %65 = vector.extract_strided_slice %58 {offsets = [0, 128], sizes = [16, 128], strides = [1, 1]} : vector<16x512xf32> to vector<16x128xf32>
    %66 = arith.negf %65 : vector<16x128xf32>
    %67 = math.exp %66 : vector<16x128xf32>
    %cst_32 = arith.constant 1.000000e+00 : f32
    %68 = vector.broadcast %cst_32 : f32 to vector<16x128xf32>
    %69 = arith.addf %68, %67 : vector<16x128xf32>
    %70 = arith.divf %68, %69 : vector<16x128xf32>
    %71 = vector.extract_strided_slice %58 {offsets = [0, 256], sizes = [16, 128], strides = [1, 1]} : vector<16x512xf32> to vector<16x128xf32>
    %72 = math.tanh %71 : vector<16x128xf32>
    %c0_33 = arith.constant 0 : index
    %c0_34 = arith.constant 0 : index
    %73 = vector.load %arg10[%c0_33, %c0_34] : memref<16x128xf32, #tpu.memory_space<vmem>>, vector<16x128xf32>
    %74 = arith.mulf %64, %73 : vector<16x128xf32>
    %75 = arith.mulf %70, %72 : vector<16x128xf32>
    %76 = arith.addf %74, %75 : vector<16x128xf32>
    %77 = arith.truncf %76 : vector<16x128xf32> to vector<16x128xbf16>
    %78 = vector.extract_strided_slice %58 {offsets = [0, 384], sizes = [16, 128], strides = [1, 1]} : vector<16x512xf32> to vector<16x128xf32>
    %c0_35 = arith.constant 0 : index
    %c0_36 = arith.constant 0 : index
    %79 = vector.load %arg6[%c0_35, %c0_36] : memref<128x128xbf16, #tpu.memory_space<vmem>>, vector<128x128xbf16>
    %cst_37 = arith.constant dense<0.000000e+00> : vector<16x128xf32>
    %80 = tpu.matmul %77, %79, %cst_37 {dimension_numbers = #tpu.dot_dimension_numbers<[1], [0], [0], [1], [0, 0, 1, 1], [], []>} : vector<16x128xbf16>, vector<128x128xbf16>, vector<16x128xf32> -> vector<16x128xf32>
    %81 = arith.addf %78, %80 : vector<16x128xf32>
    %82 = arith.negf %81 : vector<16x128xf32>
    %83 = math.exp %82 : vector<16x128xf32>
    %cst_38 = arith.constant 1.000000e+00 : f32
    %84 = vector.broadcast %cst_38 : f32 to vector<16x128xf32>
    %85 = arith.addf %84, %83 : vector<16x128xf32>
    %86 = arith.divf %84, %85 : vector<16x128xf32>
    %87 = math.tanh %76 : vector<16x128xf32>
    %88 = arith.mulf %86, %87 : vector<16x128xf32>
    %c0_39 = arith.constant 0 : index
    %c0_40 = arith.constant 0 : index
    %89 = vector.load %arg10[%c0_39, %c0_40] : memref<16x128xf32, #tpu.memory_space<vmem>>, vector<16x128xf32>
    tpu.vector_store %arg10[%c0_39, %c0_40], %76 {strides = array<i32>} : memref<16x128xf32, #tpu.memory_space<vmem>>, vector<16x128xf32>,
    %90 = arith.truncf %88 : vector<16x128xf32> to vector<16x128xbf16>
    %c0_41 = arith.constant 0 : index
    %c0_42 = arith.constant 0 : index
    %91 = vector.load %arg9[%c0_41, %c0_42] : memref<16x256xbf16, #tpu.memory_space<vmem>>, vector<16x128xbf16>
    tpu.vector_store %arg9[%c0_41, %c0_42], %90 {strides = array<i32>} : memref<16x256xbf16, #tpu.memory_space<vmem>>, vector<16x128xbf16>,
    %c0_43 = arith.constant 0 : index
    %c128_44 = arith.constant 128 : index
    %92 = vector.load %arg9[%c0_43, %c128_44] : memref<16x256xbf16, #tpu.memory_space<vmem>>, vector<16x128xbf16>
    tpu.vector_store %arg9[%c0_43, %c128_44], %77 {strides = array<i32>} : memref<16x256xbf16, #tpu.memory_space<vmem>>, vector<16x128xbf16>,
    %93 = arith.index_cast %c1_i32 : i32 to index
    %c0_45 = arith.constant 0 : index
    %c0_46 = arith.constant 0 : index
    %94 = vector.load %arg7[%93, %c0_45, %c0_46] : memref<4x16x128xf32, #tpu.memory_space<vmem>>, vector<1x16x128xf32>
    %95 = vector.shape_cast %94 : vector<1x16x128xf32> to vector<16x128xf32>
    %96 = vector.shape_cast %88 : vector<16x128xf32> to vector<1x16x128xf32>
    tpu.vector_store %arg7[%93, %c0_45, %c0_46], %96 {strides = array<i32>} : memref<4x16x128xf32, #tpu.memory_space<vmem>>, vector<1x16x128xf32>,
    %97 = arith.index_cast %c1_i32 : i32 to index
    %c0_47 = arith.constant 0 : index
    %c0_48 = arith.constant 0 : index
    %98 = vector.load %arg8[%97, %c0_47, %c0_48] : memref<4x16x128xf32, #tpu.memory_space<vmem>>, vector<1x16x128xf32>
    %99 = vector.shape_cast %98 : vector<1x16x128xf32> to vector<16x128xf32>
    %100 = vector.shape_cast %76 : vector<16x128xf32> to vector<1x16x128xf32>
    tpu.vector_store %arg8[%97, %c0_47, %c0_48], %100 {strides = array<i32>} : memref<4x16x128xf32, #tpu.memory_space<vmem>>, vector<1x16x128xf32>,
    %c2_i32 = arith.constant 2 : i32
    %101 = arith.index_cast %c2_i32 : i32 to index
    %c0_49 = arith.constant 0 : index
    %c0_50 = arith.constant 0 : index
    %102 = vector.load %arg2[%101, %c0_49, %c0_50] : memref<4x16x512xf32, #tpu.memory_space<vmem>>, vector<1x16x512xf32>
    %103 = vector.shape_cast %102 : vector<1x16x512xf32> to vector<16x512xf32>
    %c0_51 = arith.constant 0 : index
    %c0_52 = arith.constant 0 : index
    %104 = vector.load %arg9[%c0_51, %c0_52] : memref<16x256xbf16, #tpu.memory_space<vmem>>, vector<16x256xbf16>
    %c0_53 = arith.constant 0 : index
    %c0_54 = arith.constant 0 : index
    %105 = vector.load %arg5[%c0_53, %c0_54] : memref<256x512xbf16, #tpu.memory_space<vmem>>, vector<256x512xbf16>
    %cst_55 = arith.constant dense<0.000000e+00> : vector<16x512xf32>
    %106 = tpu.matmul %104, %105, %cst_55 {dimension_numbers = #tpu.dot_dimension_numbers<[1], [0], [0], [1], [0, 0, 1, 1], [], []>} : vector<16x256xbf16>, vector<256x512xbf16>, vector<16x512xf32> -> vector<16x512xf32>
    %107 = arith.addf %103, %106 : vector<16x512xf32>
    %108 = vector.extract_strided_slice %107 {offsets = [0, 0], sizes = [16, 128], strides = [1, 1]} : vector<16x512xf32> to vector<16x128xf32>
    %109 = arith.negf %108 : vector<16x128xf32>
    %110 = math.exp %109 : vector<16x128xf32>
    %cst_56 = arith.constant 1.000000e+00 : f32
    %111 = vector.broadcast %cst_56 : f32 to vector<16x128xf32>
    %112 = arith.addf %111, %110 : vector<16x128xf32>
    %113 = arith.divf %111, %112 : vector<16x128xf32>
    %114 = vector.extract_strided_slice %107 {offsets = [0, 128], sizes = [16, 128], strides = [1, 1]} : vector<16x512xf32> to vector<16x128xf32>
    %115 = arith.negf %114 : vector<16x128xf32>
    %116 = math.exp %115 : vector<16x128xf32>
    %cst_57 = arith.constant 1.000000e+00 : f32
    %117 = vector.broadcast %cst_57 : f32 to vector<16x128xf32>
    %118 = arith.addf %117, %116 : vector<16x128xf32>
    %119 = arith.divf %117, %118 : vector<16x128xf32>
    %120 = vector.extract_strided_slice %107 {offsets = [0, 256], sizes = [16, 128], strides = [1, 1]} : vector<16x512xf32> to vector<16x128xf32>
    %121 = math.tanh %120 : vector<16x128xf32>
    %c0_58 = arith.constant 0 : index
    %c0_59 = arith.constant 0 : index
    %122 = vector.load %arg10[%c0_58, %c0_59] : memref<16x128xf32, #tpu.memory_space<vmem>>, vector<16x128xf32>
    %123 = arith.mulf %113, %122 : vector<16x128xf32>
    %124 = arith.mulf %119, %121 : vector<16x128xf32>
    %125 = arith.addf %123, %124 : vector<16x128xf32>
    %126 = arith.truncf %125 : vector<16x128xf32> to vector<16x128xbf16>
    %127 = vector.extract_strided_slice %107 {offsets = [0, 384], sizes = [16, 128], strides = [1, 1]} : vector<16x512xf32> to vector<16x128xf32>
    %c0_60 = arith.constant 0 : index
    %c0_61 = arith.constant 0 : index
    %128 = vector.load %arg6[%c0_60, %c0_61] : memref<128x128xbf16, #tpu.memory_space<vmem>>, vector<128x128xbf16>
    %cst_62 = arith.constant dense<0.000000e+00> : vector<16x128xf32>
    %129 = tpu.matmul %126, %128, %cst_62 {dimension_numbers = #tpu.dot_dimension_numbers<[1], [0], [0], [1], [0, 0, 1, 1], [], []>} : vector<16x128xbf16>, vector<128x128xbf16>, vector<16x128xf32> -> vector<16x128xf32>
    %130 = arith.addf %127, %129 : vector<16x128xf32>
    %131 = arith.negf %130 : vector<16x128xf32>
    %132 = math.exp %131 : vector<16x128xf32>
    %cst_63 = arith.constant 1.000000e+00 : f32
    %133 = vector.broadcast %cst_63 : f32 to vector<16x128xf32>
    %134 = arith.addf %133, %132 : vector<16x128xf32>
    %135 = arith.divf %133, %134 : vector<16x128xf32>
    %136 = math.tanh %125 : vector<16x128xf32>
    %137 = arith.mulf %135, %136 : vector<16x128xf32>
    %c0_64 = arith.constant 0 : index
    %c0_65 = arith.constant 0 : index
    %138 = vector.load %arg10[%c0_64, %c0_65] : memref<16x128xf32, #tpu.memory_space<vmem>>, vector<16x128xf32>
    tpu.vector_store %arg10[%c0_64, %c0_65], %125 {strides = array<i32>} : memref<16x128xf32, #tpu.memory_space<vmem>>, vector<16x128xf32>,
    %139 = arith.truncf %137 : vector<16x128xf32> to vector<16x128xbf16>
    %c0_66 = arith.constant 0 : index
    %c0_67 = arith.constant 0 : index
    %140 = vector.load %arg9[%c0_66, %c0_67] : memref<16x256xbf16, #tpu.memory_space<vmem>>, vector<16x128xbf16>
    tpu.vector_store %arg9[%c0_66, %c0_67], %139 {strides = array<i32>} : memref<16x256xbf16, #tpu.memory_space<vmem>>, vector<16x128xbf16>,
    %c0_68 = arith.constant 0 : index
    %c128_69 = arith.constant 128 : index
    %141 = vector.load %arg9[%c0_68, %c128_69] : memref<16x256xbf16, #tpu.memory_space<vmem>>, vector<16x128xbf16>
    tpu.vector_store %arg9[%c0_68, %c128_69], %126 {strides = array<i32>} : memref<16x256xbf16, #tpu.memory_space<vmem>>, vector<16x128xbf16>,
    %142 = arith.index_cast %c2_i32 : i32 to index
    %c0_70 = arith.constant 0 : index
    %c0_71 = arith.constant 0 : index
    %143 = vector.load %arg7[%142, %c0_70, %c0_71] : memref<4x16x128xf32, #tpu.memory_space<vmem>>, vector<1x16x128xf32>
    %144 = vector.shape_cast %143 : vector<1x16x128xf32> to vector<16x128xf32>
    %145 = vector.shape_cast %137 : vector<16x128xf32> to vector<1x16x128xf32>
    tpu.vector_store %arg7[%142, %c0_70, %c0_71], %145 {strides = array<i32>} : memref<4x16x128xf32, #tpu.memory_space<vmem>>, vector<1x16x128xf32>,
    %146 = arith.index_cast %c2_i32 : i32 to index
    %c0_72 = arith.constant 0 : index
    %c0_73 = arith.constant 0 : index
    %147 = vector.load %arg8[%146, %c0_72, %c0_73] : memref<4x16x128xf32, #tpu.memory_space<vmem>>, vector<1x16x128xf32>
    %148 = vector.shape_cast %147 : vector<1x16x128xf32> to vector<16x128xf32>
    %149 = vector.shape_cast %125 : vector<16x128xf32> to vector<1x16x128xf32>
    tpu.vector_store %arg8[%146, %c0_72, %c0_73], %149 {strides = array<i32>} : memref<4x16x128xf32, #tpu.memory_space<vmem>>, vector<1x16x128xf32>,
    %c3_i32 = arith.constant 3 : i32
    %150 = arith.index_cast %c3_i32 : i32 to index
    %c0_74 = arith.constant 0 : index
    %c0_75 = arith.constant 0 : index
    %151 = vector.load %arg2[%150, %c0_74, %c0_75] : memref<4x16x512xf32, #tpu.memory_space<vmem>>, vector<1x16x512xf32>
    %152 = vector.shape_cast %151 : vector<1x16x512xf32> to vector<16x512xf32>
    %c0_76 = arith.constant 0 : index
    %c0_77 = arith.constant 0 : index
    %153 = vector.load %arg9[%c0_76, %c0_77] : memref<16x256xbf16, #tpu.memory_space<vmem>>, vector<16x256xbf16>
    %c0_78 = arith.constant 0 : index
    %c0_79 = arith.constant 0 : index
    %154 = vector.load %arg5[%c0_78, %c0_79] : memref<256x512xbf16, #tpu.memory_space<vmem>>, vector<256x512xbf16>
    %cst_80 = arith.constant dense<0.000000e+00> : vector<16x512xf32>
    %155 = tpu.matmul %153, %154, %cst_80 {dimension_numbers = #tpu.dot_dimension_numbers<[1], [0], [0], [1], [0, 0, 1, 1], [], []>} : vector<16x256xbf16>, vector<256x512xbf16>, vector<16x512xf32> -> vector<16x512xf32>
    %156 = arith.addf %152, %155 : vector<16x512xf32>
    %157 = vector.extract_strided_slice %156 {offsets = [0, 0], sizes = [16, 128], strides = [1, 1]} : vector<16x512xf32> to vector<16x128xf32>
    %158 = arith.negf %157 : vector<16x128xf32>
    %159 = math.exp %158 : vector<16x128xf32>
    %cst_81 = arith.constant 1.000000e+00 : f32
    %160 = vector.broadcast %cst_81 : f32 to vector<16x128xf32>
    %161 = arith.addf %160, %159 : vector<16x128xf32>
    %162 = arith.divf %160, %161 : vector<16x128xf32>
    %163 = vector.extract_strided_slice %156 {offsets = [0, 128], sizes = [16, 128], strides = [1, 1]} : vector<16x512xf32> to vector<16x128xf32>
    %164 = arith.negf %163 : vector<16x128xf32>
    %165 = math.exp %164 : vector<16x128xf32>
    %cst_82 = arith.constant 1.000000e+00 : f32
    %166 = vector.broadcast %cst_82 : f32 to vector<16x128xf32>
    %167 = arith.addf %166, %165 : vector<16x128xf32>
    %168 = arith.divf %166, %167 : vector<16x128xf32>
    %169 = vector.extract_strided_slice %156 {offsets = [0, 256], sizes = [16, 128], strides = [1, 1]} : vector<16x512xf32> to vector<16x128xf32>
    %170 = math.tanh %169 : vector<16x128xf32>
    %c0_83 = arith.constant 0 : index
    %c0_84 = arith.constant 0 : index
    %171 = vector.load %arg10[%c0_83, %c0_84] : memref<16x128xf32, #tpu.memory_space<vmem>>, vector<16x128xf32>
    %172 = arith.mulf %162, %171 : vector<16x128xf32>
    %173 = arith.mulf %168, %170 : vector<16x128xf32>
    %174 = arith.addf %172, %173 : vector<16x128xf32>
    %175 = arith.truncf %174 : vector<16x128xf32> to vector<16x128xbf16>
    %176 = vector.extract_strided_slice %156 {offsets = [0, 384], sizes = [16, 128], strides = [1, 1]} : vector<16x512xf32> to vector<16x128xf32>
    %c0_85 = arith.constant 0 : index
    %c0_86 = arith.constant 0 : index
    %177 = vector.load %arg6[%c0_85, %c0_86] : memref<128x128xbf16, #tpu.memory_space<vmem>>, vector<128x128xbf16>
    %cst_87 = arith.constant dense<0.000000e+00> : vector<16x128xf32>
    %178 = tpu.matmul %175, %177, %cst_87 {dimension_numbers = #tpu.dot_dimension_numbers<[1], [0], [0], [1], [0, 0, 1, 1], [], []>} : vector<16x128xbf16>, vector<128x128xbf16>, vector<16x128xf32> -> vector<16x128xf32>
    %179 = arith.addf %176, %178 : vector<16x128xf32>
    %180 = arith.negf %179 : vector<16x128xf32>
    %181 = math.exp %180 : vector<16x128xf32>
    %cst_88 = arith.constant 1.000000e+00 : f32
    %182 = vector.broadcast %cst_88 : f32 to vector<16x128xf32>
    %183 = arith.addf %182, %181 : vector<16x128xf32>
    %184 = arith.divf %182, %183 : vector<16x128xf32>
    %185 = math.tanh %174 : vector<16x128xf32>
    %186 = arith.mulf %184, %185 : vector<16x128xf32>
    %c0_89 = arith.constant 0 : index
    %c0_90 = arith.constant 0 : index
    %187 = vector.load %arg10[%c0_89, %c0_90] : memref<16x128xf32, #tpu.memory_space<vmem>>, vector<16x128xf32>
    tpu.vector_store %arg10[%c0_89, %c0_90], %174 {strides = array<i32>} : memref<16x128xf32, #tpu.memory_space<vmem>>, vector<16x128xf32>,
    %188 = arith.truncf %186 : vector<16x128xf32> to vector<16x128xbf16>
    %c0_91 = arith.constant 0 : index
    %c0_92 = arith.constant 0 : index
    %189 = vector.load %arg9[%c0_91, %c0_92] : memref<16x256xbf16, #tpu.memory_space<vmem>>, vector<16x128xbf16>
    tpu.vector_store %arg9[%c0_91, %c0_92], %188 {strides = array<i32>} : memref<16x256xbf16, #tpu.memory_space<vmem>>, vector<16x128xbf16>,
    %c0_93 = arith.constant 0 : index
    %c128_94 = arith.constant 128 : index
    %190 = vector.load %arg9[%c0_93, %c128_94] : memref<16x256xbf16, #tpu.memory_space<vmem>>, vector<16x128xbf16>
    tpu.vector_store %arg9[%c0_93, %c128_94], %175 {strides = array<i32>} : memref<16x256xbf16, #tpu.memory_space<vmem>>, vector<16x128xbf16>,
    %191 = arith.index_cast %c3_i32 : i32 to index
    %c0_95 = arith.constant 0 : index
    %c0_96 = arith.constant 0 : index
    %192 = vector.load %arg7[%191, %c0_95, %c0_96] : memref<4x16x128xf32, #tpu.memory_space<vmem>>, vector<1x16x128xf32>
    %193 = vector.shape_cast %192 : vector<1x16x128xf32> to vector<16x128xf32>
    %194 = vector.shape_cast %186 : vector<16x128xf32> to vector<1x16x128xf32>
    tpu.vector_store %arg7[%191, %c0_95, %c0_96], %194 {strides = array<i32>} : memref<4x16x128xf32, #tpu.memory_space<vmem>>, vector<1x16x128xf32>,
    %195 = arith.index_cast %c3_i32 : i32 to index
    %c0_97 = arith.constant 0 : index
    %c0_98 = arith.constant 0 : index
    %196 = vector.load %arg8[%195, %c0_97, %c0_98] : memref<4x16x128xf32, #tpu.memory_space<vmem>>, vector<1x16x128xf32>
    %197 = vector.shape_cast %196 : vector<1x16x128xf32> to vector<16x128xf32>
    %198 = vector.shape_cast %174 : vector<16x128xf32> to vector<1x16x128xf32>
    tpu.vector_store %arg8[%195, %c0_97, %c0_98], %198 {strides = array<i32>} : memref<4x16x128xf32, #tpu.memory_space<vmem>>, vector<1x16x128xf32>,
    %c4_i32 = arith.constant 4 : i32
    return
  }
  func.func @transform_0(%arg0: i32, %arg1: i32) -> (i32, i32, i32) {
    %c0_i32 = arith.constant 0 : i32
    %c0_i32_0 = arith.constant 0 : i32
    return %arg1, %arg0, %c0_i32 : i32, i32, i32
  }
  func.func @transform_1(%arg0: i32, %arg1: i32) -> (i32, i32) {
    %c0_i32 = arith.constant 0 : i32
    %c0_i32_0 = arith.constant 0 : i32
    return %arg0, %c0_i32 : i32, i32
  }
  func.func @transform_2(%arg0: i32, %arg1: i32) -> (i32, i32) {
    %c0_i32 = arith.constant 0 : i32
    %c0_i32_0 = arith.constant 0 : i32
    return %arg0, %c0_i32 : i32, i32
  }
  func.func @transform_3(%arg0: i32, %arg1: i32) -> (i32, i32) {
    %c0_i32 = arith.constant 0 : i32
    %c0_i32_0 = arith.constant 0 : i32
    %c0_i32_1 = arith.constant 0 : i32
    return %c0_i32, %c0_i32_0 : i32, i32
  }
  func.func @transform_4(%arg0: i32, %arg1: i32) -> (i32, i32) {
    %c0_i32 = arith.constant 0 : i32
    %c0_i32_0 = arith.constant 0 : i32
    %c0_i32_1 = arith.constant 0 : i32
    return %c0_i32, %c0_i32_0 : i32, i32
  }
  func.func @transform_5(%arg0: i32, %arg1: i32) -> (i32, i32, i32) {
    %c0_i32 = arith.constant 0 : i32
    %c0_i32_0 = arith.constant 0 : i32
    return %arg1, %arg0, %c0_i32 : i32, i32, i32
  }
  func.func @transform_6(%arg0: i32, %arg1: i32) -> (i32, i32, i32) {
    %c0_i32 = arith.constant 0 : i32
    %c0_i32_0 = arith.constant 0 : i32
    return %arg1, %arg0, %c0_i32 : i32, i32, i32
  }
}

</mosaic_0001>

<bundles_post_ra>
// kernel: pclstm_sequence.1
= control target key start
LH: loop header
LB: loop body
LE: loop exit
PB: predicated region body
PF: predicated region fallthrough
CT: control target
= control target key end

     0   :  { %s7605_s0 = inlined_call_operand.vmem [shape: f32[8,16,512], index: 0, kind: input, shape index: {}]   ;;  %s7606_s1 = inlined_call_operand.vmem [shape: f32[16,128], index: 1, kind: input, shape index: {}]   ;;  %s7607_s2 = inlined_call_operand.vmem [shape: f32[16,128], index: 2, kind: input, shape index: {}]   ;;  %s7608_s3 = inlined_call_operand.vmem [shape: bf16[256,512], index: 3, kind: input, shape index: {}]   ;;  %s7609_s4 = inlined_call_operand.vmem [shape: bf16[128,128], index: 4, kind: input, shape index: {}]   ;;  %s7610_s5 = inlined_call_operand.hbm [shape: f32[8,16,128], index: 5, kind: output, shape index: {0}]   ;;  %s7611_s6 = inlined_call_operand.hbm [shape: f32[8,16,128], index: 6, kind: output, shape index: {1}]  }
   0x1   :  { %7612 = sst [smem:[#allocation10_spill]] %s7605_s0 }
   0x2   :  { %7613 = sst [smem:[#allocation11_spill]] %s7606_s1 }
   0x3   :  { %7614 = sst [smem:[#allocation12_spill]] %s7607_s2 }
   0x4   :  { %7615 = sst [smem:[#allocation13_spill]] %s7608_s3 }
   0x5   :  { %12 = vsyncpa [#allocation5], 0 }
   0x6   :  { %14 = vsyncpa [#allocation5 + $0x1], 0 }
   0x7   :  { %15 = vsyncpa [#allocation7], 0 }
   0x8   :  { %17 = vsyncpa [#allocation7 + $0x1], 0  ;;  %s5529_s21 = smov 0   ;;  %s5531_s22 = smov 0  }
   0x9   :  { %s5533_s23 = smov 0   ;;  %s5535_s24 = smov 0  }
   0xa   :  { %s5537_s25 = smov 0   ;;  %s5539_s26 = smov 0  }
   0xb LB: > { %s3578_s27 = sadd.s32 4294967295, %s5490_s26   ;;  %s3579_s28 = sadd.s32 4294967294, %s5490_s26   ;;  %s5490_s26 = sphi %s5539_s26, %s23_s26   ;;  %s5486_s25 = sphi %s5537_s25, %s7644_s25   ;;  %s5482_s24 = sphi %s5535_s24, %s7643_s24   ;;  %s5478_s23 = sphi %s5533_s23, %s7642_s23   ;;  %s5474_s22 = sphi %s5531_s22, %s7641_s22   ;;  %s5470_s21 = sphi %s5529_s21, %s7640_s21  }
   0xc   : > { %s32_s29 = sadd.s32 1, %s5486_s25  ;;  %s166_s30 = sadd.s32 1, %s5478_s23 }
   0xd   : > { %p33_p0 = scmp.ge.s32.totalorder %s32_s29, 2  ;;  %p176_p1 = scmp.ne.s32.totalorder %s5478_s23, %s5474_s22 }
   0xe   : > { %p177_p2 = scmp.eq.s32.totalorder %s3578_s27, 1  ;;  %p182_p3 = scmp.ne.s32.totalorder %s5474_s22, %s5470_s21 }
   0xf   : > { %s7646_s29 = smov (%p33_p0, %s32_s29), 0  ;;  %p183_p5 = scmp.eq.s32.totalorder %s3579_s28, 1 }
  0x10   : > { %p5569_p4 = por %p177_p2, %p176_p1  ;;  %s161_s8 = ssub.s32 %s5486_s25, %s7646_s29 }
  0x11   : > { %p3584_p6 = scmp.ge.s32.totalorder %s5490_s26, 1  ;;  %p164_p7 = scmp.eq.s32.totalorder %s161_s8, 0 }
  0x12   : > { %p5576_p8 = por %p183_p5, %p182_p3  ;;  %p269_p9 = scmp.lt.s32.totalorder %s5490_s26, 3 }
  0x13   : > { %s5582_s10 = scalar_select %p164_p7, %s5478_s23, %s166_s30  }
  0x14   : > { %p270_p10 = pnand %p3584_p6, %p269_p9 }
  0x15   : > { %s5585_s11 = sand.u32 (!%p270_p10), 1, %s5474_s22   ;;  %s3587_s12 = sshll.u32 (!%p270_p10), %s5482_s24, 2 }
  0x16   : > { %273 = sbr.rel (%p270_p10) target bundleno = 1538 (0x602), region = 40  ;;  %s3585_s13 = sshll.u32 (!%p270_p10), %s5585_s11, 6 }
  0x17   : > { %p322_p11 = scmp.lt.s32.totalorder (!%p270_p10), %s3587_s12, 7  ;;  %s7618_s0 = sld [smem:[#allocation10_spill]] (!%p270_p10) }
  0x18   : > { %s5594_s18 = scalar_lea.vmem (!%p270_p10), [#allocation4], %s3585_s13  ;;  %s5596_s19 = scalar_lea.vmem (!%p270_p10), [#allocation6], %s3585_s13 }
  0x19   : > { %p3590_p12 = scmp.ne.s32.totalorder (!%p270_p10), %s5482_s24, 0 }
  0x1b   : > { %s7648_s12 = smov (!%p322_p11, %s3587_s12), 7  ;;  %352 = sbr.rel (%p3590_p12) target bundleno = 42 (0x2a), region = 44 }
  0x1c   : > { %s4845_s14 = sshll.u32 %s7648_s12, 6  ;;  %s7619_s1 = sld [smem:[#allocation11_spill]] (!%p3590_p12) }
  0x1d   : > { %s5592_s17 = scalar_lea.vmem %s7618_s0, %s4845_s14  ;;  %s7620_s2 = sld [smem:[#allocation12_spill]] (!%p3590_p12) }
  0x22   : > { %v353_v0 = vld [vmem:[%s7619_s1] sm:$0xff]  ;;  %v354_v1 = vld [vmem:[%s7619_s1 + $0x8] sm:$0xff] }
  0x23   : > { %v359_v2 = vld [vmem:[%s7620_s2] sm:$0xff]  ;;  %v355_v3 = vpack.c.bf16 %v353_v0, %v353_v0  ;;  %v356_v4 = vpack.c.bf16 %v354_v1, %v354_v1  ;;  %v360_v6 = vld [vmem:[%s7620_s2 + $0x8] sm:$0xff] }
  0x24   : > { %v361_v5 = vpack.c.bf16 %v359_v2, %v359_v2  ;;  %367 = vst [vmem:[#allocation3] sm:$0xff] %v359_v2  ;;  %v362_v7 = vpack.c.bf16 %v360_v6, %v360_v6 }
  0x25   : > { %368 = vst [vmem:[#allocation3 + $0x8] sm:$0xff] %v360_v6 }
  0x26   : > { %357 = vst [vmem:[#allocation2] sm:$0xf] %v355_v3 }
  0x27   : > { %358 = vst [vmem:[#allocation2 + $0x8] sm:$0xf] %v356_v4 }
  0x28   : > { %363 = vst [vmem:[#allocation2 + $0x4] sm:$0xf] %v361_v5 }
  0x29   : > { %364 = vst [vmem:[#allocation2 + $0xc] sm:$0xf] %v362_v7 }
  0x2a PF: > { %s7621_s3 = sld [smem:[#allocation13_spill]]  ;;  %s5143_s8 = sshll.u32 %s5482_s24, 6 }
  0x2b   : > { %s3426_s0 = scalar_lea.hbm %s7611_s6, %s5143_s8  ;;  %s3427_s14 = sshll.u32 %s5596_s19, 4  ;;  %s3428_s14 = int_to_ptr.vmem [resolvable:$true] %s3427_s14 }
  0x2c   : > { %s3429_s15 = sshll.u32 %s3426_s0, 4  ;;  %s3392_s16 = scalar_lea.sflag [#allocation7], %s5585_s11  ;;  %s3430_s15 = int_to_ptr.hbm [resolvable:$true] %s3429_s15 }
  0x2d   : > { %s5394_s20 = sshra.s32 %s3430_s15, 4  ;;  %s5400_s30 = scalar_lea.hbm %s7611_s6, 128  ;;  %s5395_s20 = int_to_ptr.hbm [resolvable:$true] %s5394_s20 }
  0x2e   : > { %s5396_s1 = scalar_lea.hbm %s5395_s20, 64  ;;  %p5401_p2 = scmp.lt.s32.totalorder %s5395_s20, %s7611_s6 }
  0x2f   : > { %p5397_p13 = scmp.ne.s32.totalorder %s5395_s20, %s5396_s1  ;;  %p5402_p3 = scmp.lt.s32.totalorder %s5400_s30, %s5396_s1 }
  0x30   : > { %v3713_v8 = vld [vmem:[%s7621_s3 + $0xe0] sm:$0xf]  ;;  %v4878_v9 = vld [vmem:[%s7621_s3 + $0xec] sm:$0xf0]  ;;  %v4876_v13 = vld [vmem:[%s7621_s3 + $0xe4] sm:$0xf] }
  0x31   : > { %v3841_v10 = vld [vmem:[%s7621_s3 + $0x1e0] sm:$0xf]  ;;  %v3714_v11 = vor.u32 %v4878_v9, %v3713_v8  ;;  %v4910_v12 = vld [vmem:[%s7621_s3 + $0x1ec] sm:$0xf0]  ;;  %v3715_v14 = vld [vmem:[%s7621_s3 + $0xf0] sm:$0xf0]  ;;  %p5398_p0 = pnand %p5397_p13, %p5569_p4  ;;  %p5403_p5 = por %p5402_p3, %p5401_p2 }
  0x32   : > { %v3842_v15 = vor.u32 %v4910_v12, %v3841_v10  ;;  %v3718_v16 = vor.u32 %v4876_v13, %v3715_v14  ;;  %v4908_v17 = vld [vmem:[%s7621_s3 + $0x1e4] sm:$0xf]  ;;  %v3843_v18 = vld [vmem:[%s7621_s3 + $0x1f0] sm:$0xf0]  ;;  %v3697_v19 = vld [vmem:[%s7621_s3 + $0xc0] sm:$0xf] }
  0x33   : > { %773 = vmatpush.bf16.msra.mxu0 %v3714_v11  ;;  %v3846_v20 = vor.u32 %v4908_v17, %v3843_v18  ;;  %v4874_v21 = vld [vmem:[%s7621_s3 + $0xcc] sm:$0xf0]  ;;  %v3825_v22 = vld [vmem:[%s7621_s3 + $0x1c0] sm:$0xf]  ;;  %v4872_v26 = vld [vmem:[%s7621_s3 + $0xc4] sm:$0xf]  ;;  %p5399_p1 = pneg %p5398_p0 }
  0x34   : > { %v4906_v23 = vld [vmem:[%s7621_s3 + $0x1cc] sm:$0xf0]  ;;  %787 = vmatpush.bf16.msra.mxu1 %v3842_v15  ;;  %801 = vmatpush.bf16.msra.mxu2 %v3718_v16  ;;  %v3698_v24 = vor.u32 %v4874_v21, %v3697_v19  ;;  %v3699_v27 = vld [vmem:[%s7621_s3 + $0xd0] sm:$0xf0]  ;;  %v4904_v28 = vld [vmem:[%s7621_s3 + $0x1c4] sm:$0xf] }
  0x35   : > { %v3826_v25 = vor.u32 %v4906_v23, %v3825_v22  ;;  %815 = vmatpush.bf16.msra.mxu3 %v3846_v20  ;;  %v3702_v29 = vor.u32 %v4872_v26, %v3699_v27  ;;  %v3827_v30 = vld [vmem:[%s7621_s3 + $0x1d0] sm:$0xf0]  ;;  %v3681_v31 = vld [vmem:[%s7621_s3 + $0xa0] sm:$0xf]  ;;  %v4870_v32 = vld [vmem:[%s7621_s3 + $0xac] sm:$0xf0]  ;;  %p5404_p6 = pnand %p5403_p5, %p5399_p1 }
  0x36   : > { %v3830_v33 = vor.u32 %v4904_v28, %v3827_v30  ;;  %v3809_v34 = vld [vmem:[%s7621_s3 + $0x1a0] sm:$0xf]  ;;  %v4902_v35 = vld [vmem:[%s7621_s3 + $0x1ac] sm:$0xf0]  ;;  %v4868_v36 = vld [vmem:[%s7621_s3 + $0xa4] sm:$0xf]  ;;  %v3682_v37 = vor.u32 %v4870_v32, %v3681_v31 }
  0x37   : > { %774 = vmatpush.bf16.msra.mxu0 %v3698_v24  ;;  %v3683_v38 = vld [vmem:[%s7621_s3 + $0xb0] sm:$0xf0]  ;;  %v4900_v39 = vld [vmem:[%s7621_s3 + $0x1a4] sm:$0xf]  ;;  %v3810_v41 = vor.u32 %v4902_v35, %v3809_v34  ;;  %v3665_v43 = vld [vmem:[%s7621_s3 + $0x80] sm:$0xf] }
  0x38   : > { %v3811_v40 = vld [vmem:[%s7621_s3 + $0x1b0] sm:$0xf0]  ;;  %788 = vmatpush.bf16.msra.mxu1 %v3826_v25  ;;  %802 = vmatpush.bf16.msra.mxu2 %v3702_v29  ;;  %v3686_v42 = vor.u32 %v4868_v36, %v3683_v38  ;;  %v4866_v44 = vld [vmem:[%s7621_s3 + $0x8c] sm:$0xf0]  ;;  %v3793_v45 = vld [vmem:[%s7621_s3 + $0x180] sm:$0xf] }
  0x39   : > { %816 = vmatpush.bf16.msra.mxu3 %v3830_v33  ;;  %v3814_v46 = vor.u32 %v4900_v39, %v3811_v40  ;;  %v4898_v47 = vld [vmem:[%s7621_s3 + $0x18c] sm:$0xf0]  ;;  %v4864_v48 = vld [vmem:[%s7621_s3 + $0x84] sm:$0xf]  ;;  %v3667_v49 = vld [vmem:[%s7621_s3 + $0x90] sm:$0xf0]  ;;  %v3666_v52 = vor.u32 %v4866_v44, %v3665_v43 }
  0x3a   : > { %v4896_v50 = vld [vmem:[%s7621_s3 + $0x184] sm:$0xf]  ;;  %v3795_v51 = vld [vmem:[%s7621_s3 + $0x190] sm:$0xf0]  ;;  %v3794_v53 = vor.u32 %v4898_v47, %v3793_v45  ;;  %v3670_v54 = vor.u32 %v4864_v48, %v3667_v49  ;;  %v3649_v55 = vld [vmem:[%s7621_s3 + $0x60] sm:$0xf] }
  0x3b   : > { %775 = vmatpush.bf16.msra.mxu0 %v3682_v37  ;;  %v4862_v56 = vld [vmem:[%s7621_s3 + $0x6c] sm:$0xf0]  ;;  %v3777_v57 = vld [vmem:[%s7621_s3 + $0x160] sm:$0xf]  ;;  %v3798_v58 = vor.u32 %v4896_v50, %v3795_v51  ;;  %v4860_v60 = vld [vmem:[%s7621_s3 + $0x64] sm:$0xf] }
  0x3c   : > { %789 = vmatpush.bf16.msra.mxu1 %v3810_v41  ;;  %803 = vmatpush.bf16.msra.mxu2 %v3686_v42  ;;  %v4894_v59 = vld [vmem:[%s7621_s3 + $0x16c] sm:$0xf0]  ;;  %v3651_v61 = vld [vmem:[%s7621_s3 + $0x70] sm:$0xf0]  ;;  %v4892_v62 = vld [vmem:[%s7621_s3 + $0x164] sm:$0xf]  ;;  %v3650_v0 = vor.u32 %v4862_v56, %v3649_v55 }
  0x3d   : > { %817 = vmatpush.bf16.msra.mxu3 %v3814_v46  ;;  %v3779_v63 = vld [vmem:[%s7621_s3 + $0x170] sm:$0xf0]  ;;  %v3778_v1 = vor.u32 %v4894_v59, %v3777_v57  ;;  %v3654_v2 = vor.u32 %v4860_v60, %v3651_v61  ;;  %v3633_v3 = vld [vmem:[%s7621_s3 + $0x40] sm:$0xf]  ;;  %v4858_v4 = vld [vmem:[%s7621_s3 + $0x4c] sm:$0xf0] }
  0x3e   : > { %v3761_v5 = vld [vmem:[%s7621_s3 + $0x140] sm:$0xf]  ;;  %v3782_v6 = vor.u32 %v4892_v62, %v3779_v63  ;;  %v4890_v7 = vld [vmem:[%s7621_s3 + $0x14c] sm:$0xf0]  ;;  %v4856_v8 = vld [vmem:[%s7621_s3 + $0x44] sm:$0xf]  ;;  %v3634_v12 = vor.u32 %v4858_v4, %v3633_v3 }
  0x3f   : > { %776 = vmatpush.bf16.msra.mxu0 %v3666_v52  ;;  %v3635_v9 = vld [vmem:[%s7621_s3 + $0x50] sm:$0xf0]  ;;  %v4888_v10 = vld [vmem:[%s7621_s3 + $0x144] sm:$0xf]  ;;  %v3762_v13 = vor.u32 %v4890_v7, %v3761_v5  ;;  %v3617_v15 = vld [vmem:[%s7621_s3 + $0x20] sm:$0xf] }
  0x40   : > { %790 = vmatpush.bf16.msra.mxu1 %v3794_v53  ;;  %804 = vmatpush.bf16.msra.mxu2 %v3670_v54  ;;  %v3763_v11 = vld [vmem:[%s7621_s3 + $0x150] sm:$0xf0]  ;;  %v3638_v14 = vor.u32 %v4856_v8, %v3635_v9  ;;  %v4854_v16 = vld [vmem:[%s7621_s3 + $0x2c] sm:$0xf0]  ;;  %v3745_v17 = vld [vmem:[%s7621_s3 + $0x120] sm:$0xf] }
  0x41   : > { %818 = vmatpush.bf16.msra.mxu3 %v3798_v58  ;;  %v3766_v18 = vor.u32 %v4888_v10, %v3763_v11  ;;  %v4886_v19 = vld [vmem:[%s7621_s3 + $0x12c] sm:$0xf0]  ;;  %v4852_v20 = vld [vmem:[%s7621_s3 + $0x24] sm:$0xf]  ;;  %v3619_v21 = vld [vmem:[%s7621_s3 + $0x30] sm:$0xf0]  ;;  %v3618_v24 = vor.u32 %v4854_v16, %v3617_v15 }
  0x42   : > { %v4884_v22 = vld [vmem:[%s7621_s3 + $0x124] sm:$0xf]  ;;  %v3747_v23 = vld [vmem:[%s7621_s3 + $0x130] sm:$0xf0]  ;;  %v3601_v25 = vld [vmem:[%s7621_s3] sm:$0xf]  ;;  %v3746_v27 = vor.u32 %v4886_v19, %v3745_v17  ;;  %v3622_v28 = vor.u32 %v4852_v20, %v3619_v21 }
  0x43   : > { %777 = vmatpush.bf16.msra.mxu0 %v3650_v0  ;;  %v4850_v26 = vld [vmem:[%s7621_s3 + $0xc] sm:$0xf0]  ;;  %v3729_v29 = vld [vmem:[%s7621_s3 + $0x100] sm:$0xf]  ;;  %v4848_v31 = vld [vmem:[%s7621_s3 + $0x4] sm:$0xf]  ;;  %v3750_v32 = vor.u32 %v4884_v22, %v3747_v23 }
  0x44   : > { %791 = vmatpush.bf16.msra.mxu1 %v3778_v1  ;;  %805 = vmatpush.bf16.msra.mxu2 %v3654_v2  ;;  %v4882_v30 = vld [vmem:[%s7621_s3 + $0x10c] sm:$0xf0]  ;;  %v3603_v33 = vld [vmem:[%s7621_s3 + $0x10] sm:$0xf0]  ;;  %v4880_v34 = vld [vmem:[%s7621_s3 + $0x104] sm:$0xf]  ;;  %v3602_v39 = vor.u32 %v4850_v26, %v3601_v25 }
  0x45   : > { %819 = vmatpush.bf16.msra.mxu3 %v3782_v6  ;;  %v3731_v35 = vld [vmem:[%s7621_s3 + $0x110] sm:$0xf0]  ;;  %v3721_v36 = vld [vmem:[%s7621_s3 + $0xe8] sm:$0xf]  ;;  %v4879_v37 = vld [vmem:[%s7621_s3 + $0xf4] sm:$0xf0]  ;;  %v3730_v43 = vor.u32 %v4882_v30, %v3729_v29  ;;  %v3606_v44 = vor.u32 %v4848_v31, %v3603_v33 }
  0x46   : > { %v3849_v38 = vld [vmem:[%s7621_s3 + $0x1e8] sm:$0xf]  ;;  %v4911_v40 = vld [vmem:[%s7621_s3 + $0x1f4] sm:$0xf0]  ;;  %v3593_v41 = vld [vmem:[#allocation2] sm:$0xf]  ;;  %v3734_v47 = vor.u32 %v4880_v34, %v3731_v35  ;;  %v3722_v48 = vor.u32 %v4879_v37, %v3721_v36 }
  0x47   : > { %778 = vmatpush.bf16.msra.mxu0 %v3634_v12  ;;  %v4847_v42 = vld [vmem:[#allocation2 + $0x4] sm:$0xf0]  ;;  %v4846_v45 = vld [vmem:[#allocation2 + $0x4] sm:$0xf]  ;;  %v3595_v46 = vld [vmem:[#allocation2 + $0x8] sm:$0xf0]  ;;  %v3850_v49 = vor.u32 %v4911_v40, %v3849_v38 }
  0x48   : > { %792 = vmatpush.bf16.msra.mxu1 %v3762_v13  ;;  %806 = vmatpush.bf16.msra.mxu2 %v3638_v14  ;;  %v5815_v50 = vor.u32 %v4847_v42, %v3593_v41  ;;  %v3705_v51 = vld [vmem:[%s7621_s3 + $0xc8] sm:$0xf]  ;;  %v4875_v52 = vld [vmem:[%s7621_s3 + $0xd4] sm:$0xf0]  ;;  %v5823_v53 = vor.u32 %v4846_v45, %v3595_v46  ;;  %v4877_v30 = vld [vmem:[%s7621_s3 + $0xec] sm:$0xf] }
  0x49   : > { %820 = vmatpush.bf16.msra.mxu3 %v3766_v18  ;;  %v3833_v54 = vld [vmem:[%s7621_s3 + $0x1c8] sm:$0xf]  ;;  %v4907_v55 = vld [vmem:[%s7621_s3 + $0x1d4] sm:$0xf0]  ;;  %v3706_v56 = vor.u32 %v4875_v52, %v3705_v51  ;;  %v3723_v31 = vld [vmem:[%s7621_s3 + $0xf8] sm:$0xf0] }
  0x4a   : > { %v3834_v57 = vor.u32 %v4907_v55, %v3833_v54  ;;  %v3689_v58 = vld [vmem:[%s7621_s3 + $0xa8] sm:$0xf]  ;;  %v4871_v59 = vld [vmem:[%s7621_s3 + $0xb4] sm:$0xf0]  ;;  %v3726_v33 = vor.u32 %v4877_v30, %v3723_v31  ;;  %v3851_v34 = vld [vmem:[%s7621_s3 + $0x1f8] sm:$0xf0] }
  0x4b   : > { %779 = vmatpush.bf16.msra.mxu0 %v3618_v24  ;;  %v3817_v60 = vld [vmem:[%s7621_s3 + $0x1a8] sm:$0xf]  ;;  %v4903_v61 = vld [vmem:[%s7621_s3 + $0x1b4] sm:$0xf0]  ;;  %v3690_v62 = vor.u32 %v4871_v59, %v3689_v58  ;;  %v4873_v36 = vld [vmem:[%s7621_s3 + $0xcc] sm:$0xf] }
  0x4c   : > { %793 = vmatpush.bf16.msra.mxu1 %v3746_v27  ;;  %807 = vmatpush.bf16.msra.mxu2 %v3622_v28  ;;  %v3818_v63 = vor.u32 %v4903_v61, %v3817_v60  ;;  %v3673_v0 = vld [vmem:[%s7621_s3 + $0x88] sm:$0xf]  ;;  %v4867_v1 = vld [vmem:[%s7621_s3 + $0x94] sm:$0xf0]  ;;  %v3707_v37 = vld [vmem:[%s7621_s3 + $0xd8] sm:$0xf0] }
  0x4d   : > { %821 = vmatpush.bf16.msra.mxu3 %v3750_v32  ;;  %v3801_v2 = vld [vmem:[%s7621_s3 + $0x188] sm:$0xf]  ;;  %v4899_v3 = vld [vmem:[%s7621_s3 + $0x194] sm:$0xf0]  ;;  %v3674_v4 = vor.u32 %v4867_v1, %v3673_v0  ;;  %v4909_v32 = vld [vmem:[%s7621_s3 + $0x1ec] sm:$0xf] }
  0x4e   : > { %v3802_v5 = vor.u32 %v4899_v3, %v3801_v2  ;;  %v3657_v6 = vld [vmem:[%s7621_s3 + $0x68] sm:$0xf]  ;;  %v4863_v7 = vld [vmem:[%s7621_s3 + $0x74] sm:$0xf0]  ;;  %v3854_v35 = vor.u32 %v4909_v32, %v3851_v34  ;;  %v4905_v38 = vld [vmem:[%s7621_s3 + $0x1cc] sm:$0xf] }
  0x4f   : > { %780 = vmatpush.bf16.msra.mxu0 %v3602_v39  ;;  %v3785_v8 = vld [vmem:[%s7621_s3 + $0x168] sm:$0xf]  ;;  %v4895_v9 = vld [vmem:[%s7621_s3 + $0x174] sm:$0xf0]  ;;  %v3658_v10 = vor.u32 %v4863_v7, %v3657_v6  ;;  %v3710_v39 = vor.u32 %v4873_v36, %v3707_v37  ;;  %v3835_v40 = vld [vmem:[%s7621_s3 + $0x1d8] sm:$0xf0] }
  0x50   : > { %794 = vmatpush.bf16.msra.mxu1 %v3730_v43  ;;  %808 = vmatpush.bf16.msra.mxu2 %v3606_v44  ;;  %v3786_v11 = vor.u32 %v4895_v9, %v3785_v8  ;;  %v3641_v12 = vld [vmem:[%s7621_s3 + $0x48] sm:$0xf]  ;;  %v4859_v13 = vld [vmem:[%s7621_s3 + $0x54] sm:$0xf0]  ;;  %v3838_v41 = vor.u32 %v4905_v38, %v3835_v40  ;;  %v4869_v42 = vld [vmem:[%s7621_s3 + $0xac] sm:$0xf] }
  0x51   : > { %822 = vmatpush.bf16.msra.mxu3 %v3734_v47  ;;  %v3769_v14 = vld [vmem:[%s7621_s3 + $0x148] sm:$0xf]  ;;  %v4891_v15 = vld [vmem:[%s7621_s3 + $0x154] sm:$0xf0]  ;;  %v3642_v16 = vor.u32 %v4859_v13, %v3641_v12  ;;  %v3691_v43 = vld [vmem:[%s7621_s3 + $0xb8] sm:$0xf0] }
  0x52   : > { %781 = vmatmul.bf16.vlgmr.msra.gmra.mxu0 %v5815_v50  ;;  %v3770_v17 = vor.u32 %v4891_v15, %v3769_v14  ;;  %v3625_v18 = vld [vmem:[%s7621_s3 + $0x28] sm:$0xf]  ;;  %v4855_v19 = vld [vmem:[%s7621_s3 + $0x34] sm:$0xf0]  ;;  %v4901_v44 = vld [vmem:[%s7621_s3 + $0x1ac] sm:$0xf]  ;;  %v3694_v45 = vor.u32 %v4869_v42, %v3691_v43 }
  0x53   : > { %829 = vmatpush.bf16.msrb.mxu0 %v3722_v48  ;;  %795 = vmatmul.bf16.vlgmr.msra.gmra.mxu1 %v5823_v53  ;;  %v3753_v20 = vld [vmem:[%s7621_s3 + $0x128] sm:$0xf]  ;;  %v4887_v21 = vld [vmem:[%s7621_s3 + $0x134] sm:$0xf0]  ;;  %v3626_v22 = vor.u32 %v4855_v19, %v3625_v18  ;;  %v3819_v46 = vld [vmem:[%s7621_s3 + $0x1b8] sm:$0xf0] }
  0x54   : > { %843 = vmatpush.bf16.msrb.mxu1 %v3850_v49  ;;  %809 = vmatmul.bf16.vlgmr.msra.gmra.mxu2 %v5815_v50  ;;  %v3754_v23 = vor.u32 %v4887_v21, %v3753_v20  ;;  %v3609_v24 = vld [vmem:[%s7621_s3 + $0x8] sm:$0xf]  ;;  %v4851_v25 = vld [vmem:[%s7621_s3 + $0x14] sm:$0xf0]  ;;  %v3822_v47 = vor.u32 %v4901_v44, %v3819_v46  ;;  %v4865_v48 = vld [vmem:[%s7621_s3 + $0x8c] sm:$0xf] }
  0x55   : > { %823 = vmatmul.bf16.vlgmr.msra.gmra.mxu3 %v5823_v53  ;;  %v3737_v26 = vld [vmem:[%s7621_s3 + $0x108] sm:$0xf]  ;;  %v4883_v27 = vld [vmem:[%s7621_s3 + $0x114] sm:$0xf0]  ;;  %v3610_v28 = vor.u32 %v4851_v25, %v3609_v24  ;;  %857 = vmatpush.bf16.msrb.mxu2 %v3726_v33  ;;  %v3675_v49 = vld [vmem:[%s7621_s3 + $0x98] sm:$0xf0] }
  0x56   : > { %v3738_v29 = vor.u32 %v4883_v27, %v3737_v26  ;;  %871 = vmatpush.bf16.msrb.mxu3 %v3854_v35  ;;  %v4897_v51 = vld [vmem:[%s7621_s3 + $0x18c] sm:$0xf]  ;;  %v3678_v52 = vor.u32 %v4865_v48, %v3675_v49  ;;  %v3803_v54 = vld [vmem:[%s7621_s3 + $0x198] sm:$0xf0]  ;;  %v4918_v6 = vld [vmem:[%s7609_s4 + $0x30] sm:$0xff] }
  0x57   : > { %830 = vmatpush.bf16.msrb.mxu0 %v3706_v56  ;;  %v3806_v55 = vor.u32 %v4897_v51, %v3803_v54  ;;  %v4861_v56 = vld [vmem:[%s7621_s3 + $0x6c] sm:$0xf]  ;;  %v3787_v60 = vld [vmem:[%s7621_s3 + $0x178] sm:$0xf0]  ;;  %v369_v7 = vld [vmem:[%s5592_s17] sm:$0xff] }
  0x58   : > { %844 = vmatpush.bf16.msrb.mxu1 %v3834_v57  ;;  %v3659_v57 = vld [vmem:[%s7621_s3 + $0x78] sm:$0xf0]  ;;  %v4893_v58 = vld [vmem:[%s7621_s3 + $0x16c] sm:$0xf]  ;;  %v4916_v33 = vld [vmem:[%s7609_s4 + $0x20] sm:$0xff] }
  0x59   : > { %858 = vmatpush.bf16.msrb.mxu2 %v3710_v39  ;;  %v3662_v59 = vor.u32 %v4861_v56, %v3659_v57  ;;  %v3790_v61 = vor.u32 %v4893_v58, %v3787_v60  ;;  %v3643_v0 = vld [vmem:[%s7621_s3 + $0x58] sm:$0xf0]  ;;  %v4889_v1 = vld [vmem:[%s7621_s3 + $0x14c] sm:$0xf] }
  0x5a   : > { %872 = vmatpush.bf16.msrb.mxu3 %v3838_v41  ;;  %v3771_v3 = vld [vmem:[%s7621_s3 + $0x158] sm:$0xf0]  ;;  %v4853_v9 = vld [vmem:[%s7621_s3 + $0x2c] sm:$0xf] }
  0x5b   : > { %831 = vmatpush.bf16.msrb.mxu0 %v3690_v62  ;;  %v4919_v62 = vld [vmem:[%s7609_s4 + $0x38] sm:$0xff]  ;;  %v4885_v13 = vld [vmem:[%s7621_s3 + $0x12c] sm:$0xf] }
  0x5c   : > { %845 = vmatpush.bf16.msrb.mxu1 %v3818_v63  ;;  %v4857_v63 = vld [vmem:[%s7621_s3 + $0x4c] sm:$0xf]  ;;  %v3755_v14 = vld [vmem:[%s7621_s3 + $0x138] sm:$0xf0] }
  0x5d   : > { %859 = vmatpush.bf16.msrb.mxu2 %v3694_v45  ;;  %v3646_v2 = vor.u32 %v4857_v63, %v3643_v0  ;;  %v3758_v15 = vor.u32 %v4885_v13, %v3755_v14  ;;  %v4849_v20 = vld [vmem:[%s7621_s3 + $0xc] sm:$0xf]  ;;  %v3611_v21 = vld [vmem:[%s7621_s3 + $0x18] sm:$0xf0]  ;;  %v371_v0 = vld [vmem:[%s5592_s17 + $0x10] sm:$0xff] }
  0x5e   : > { %873 = vmatpush.bf16.msrb.mxu3 %v3822_v47  ;;  %v3614_v26 = vor.u32 %v4849_v20, %v3611_v21  ;;  %v3739_v27 = vld [vmem:[%s7621_s3 + $0x118] sm:$0xf0]  ;;  %v374_v42 = vld [vmem:[%s5592_s17 + $0x28] sm:$0xff] }
  0x5f   : > { %832 = vmatpush.bf16.msrb.mxu0 %v3674_v4  ;;  %v3774_v4 = vor.u32 %v4889_v1, %v3771_v3  ;;  %v4915_v39 = vld [vmem:[%s7609_s4 + $0x18] sm:$0xff]  ;;  %v4913_v49 = vld [vmem:[%s7609_s4 + $0x8] sm:$0xff] }
  0x60   : > { %846 = vmatpush.bf16.msrb.mxu1 %v3802_v5 }
  0x61   : > { %860 = vmatpush.bf16.msrb.mxu2 %v3678_v52 }
  0x62   : > { %874 = vmatpush.bf16.msrb.mxu3 %v3806_v55  ;;  %v4912_v55 = vld [vmem:[%s7609_s4] sm:$0xff] }
  0x63   : > { %833 = vmatpush.bf16.msrb.mxu0 %v3658_v10  ;;  %v3627_v10 = vld [vmem:[%s7621_s3 + $0x38] sm:$0xf0] }
  0x64   : > { %847 = vmatpush.bf16.msrb.mxu1 %v3786_v11  ;;  %v3630_v12 = vor.u32 %v4853_v9, %v3627_v10 }
  0x65   : > { %861 = vmatpush.bf16.msrb.mxu2 %v3662_v59 }
  0x66   : > { %875 = vmatpush.bf16.msrb.mxu3 %v3790_v61 }
  0x67   : > { %834 = vmatpush.bf16.msrb.mxu0 %v3642_v16 }
  0x68   : > { %848 = vmatpush.bf16.msrb.mxu1 %v3770_v17  ;;  %v4917_v17 = vld [vmem:[%s7609_s4 + $0x28] sm:$0xff] }
  0x69   : > { %862 = vmatpush.bf16.msrb.mxu2 %v3646_v2 }
  0x6a   : > { %876 = vmatpush.bf16.msrb.mxu3 %v3774_v4 }
  0x6b   : > { %835 = vmatpush.bf16.msrb.mxu0 %v3626_v22  ;;  %v4881_v22 = vld [vmem:[%s7621_s3 + $0x10c] sm:$0xf] }
  0x6c   : > { %849 = vmatpush.bf16.msrb.mxu1 %v3754_v23  ;;  %v370_v23 = vld [vmem:[%s5592_s17 + $0x8] sm:$0xff]  ;;  %v3742_v31 = vor.u32 %v4881_v22, %v3739_v27  ;;  %v971_v27 = vld [vmem:[#allocation3] sm:$0xff] }
  0x6d   : > { %863 = vmatpush.bf16.msrb.mxu2 %v3630_v12 }
  0x6e   : > { %877 = vmatpush.bf16.msrb.mxu3 %v3758_v15 }
  0x6f   : > { %836 = vmatpush.bf16.msrb.mxu0 %v3610_v28 }
  0x70   : > { %850 = vmatpush.bf16.msrb.mxu1 %v3738_v29  ;;  %v373_v29 = vld [vmem:[%s5592_s17 + $0x20] sm:$0xff] }
  0x71   : > { %864 = vmatpush.bf16.msrb.mxu2 %v3614_v26 }
  0x72   : > { %837 = vmatmul.bf16.vlgmr.msrb.gmra.mxu0 %v5815_v50  ;;  %878 = vmatpush.bf16.msrb.mxu3 %v3742_v31 }
  0x73   : > { %851 = vmatmul.bf16.vlgmr.msrb.gmra.mxu1 %v5823_v53  ;;  %1051 = vmatpush.bf16.msra.mxu0 %v4919_v62 }
  0x74   : > { %865 = vmatmul.bf16.vlgmr.msrb.gmra.mxu2 %v5815_v50  ;;  %v4914_v50 = vld [vmem:[%s7609_s4 + $0x10] sm:$0xff] }
  0x75   : > { %879 = vmatmul.bf16.vlgmr.msrb.gmra.mxu3 %v5823_v53 }
  0x77   : > { %1052 = vmatpush.bf16.msra.mxu0 %v4918_v6 }
  0x7b   : > { %1053 = vmatpush.bf16.msra.mxu0 %v4917_v17 }
  0x7f   : > { %1054 = vmatpush.bf16.msra.mxu0 %v4916_v33 }
  0x83   : > { %1055 = vmatpush.bf16.msra.mxu0 %v4915_v39 }
  0x87   : > { %1056 = vmatpush.bf16.msra.mxu0 %v4914_v50 }
  0x8b   : > { %1057 = vmatpush.bf16.msra.mxu0 %v4913_v49 }
  0x8f   : > { %1058 = vmatpush.bf16.msra.mxu0 %v4912_v55 }
  0xcf   : > { %v782_v5 = vpop.f32.mrf.mxu0 }
  0xd0   : > { %v796_v8 = vpop.f32.mrf.mxu1 }
  0xd1   : > { %v797_v11 = vadd.f32 %v796_v8, %v782_v5 }
  0xd3   : > { %v885_v16 = vadd.f32 %v797_v11, %v369_v7  ;;  %v4980_v11 = vld [vmem:[%s7621_s3 + $0x1cc] sm:$0xf0] }
  0xd5   : > { %v3855_v18 = vmul.f32 -1.442695, %v885_v16 }
  0xd7   : > { %v810_v19 = vpop.f32.mrf.mxu2  ;;  %5252 = vpow2.f32 %v3855_v18  ;;  %v784_v25 = vpop.f32.mrf.mxu0 }
  0xd8   : > { %v824_v24 = vpop.f32.mrf.mxu3  ;;  %v798_v30 = vpop.f32.mrf.mxu1 }
  0xd9   : > { %v825_v28 = vadd.f32 %v824_v24, %v810_v19  ;;  %v799_v32 = vadd.f32 %v798_v30, %v784_v25  ;;  %v3991_v19 = vld [vmem:[%s7621_s3 + $0xa0] sm:$0xf] }
  0xdb   : > { %v886_v34 = vadd.f32 %v825_v28, %v370_v23  ;;  %v889_v35 = vadd.f32 %v799_v32, %v373_v29  ;;  %v375_v23 = vld [vmem:[%s5592_s17 + $0x30] sm:$0xff] }
  0xdd   : > { %v3857_v36 = vmul.f32 -1.442695, %v886_v34  ;;  %v5253_v37 = vpop.eup %5252  ;;  %v3856_v38 = vmul.f32 -1.442695, %v889_v35 }
  0xde   : > { %v899_v40 = vadd.f32 1.0, %v5253_v37 }
  0xdf   : > { %5254 = vpow2.f32 %v3857_v36  ;;  %v812_v41 = vpop.f32.mrf.mxu2 }
  0xe0   : > { %5256 = vpow2.f32 %v3856_v38  ;;  %v826_v43 = vpop.f32.mrf.mxu3  ;;  %vm906_vm0 = vweird.f32 %v899_v40  ;;  %v912_v6 = vand.u32 2147483648, %v899_v40  ;;  %v910_v9 = vand.u32 2147483647, %v899_v40 }
  0xe1   : > { %5258 = vrcp.f32 %v899_v40  ;;  %v827_v44 = vadd.f32 %v826_v43, %v812_v41 }
  0xe2   : > { %v913_v18 = vor.u32 1.1754944e-38, %v912_v6  ;;  %vm911_vm6 = vcmp.eq.f32.partialorder %v910_v9, 8.507059e+37  ;;  %v4135_v9 = vld [vmem:[%s7621_s3 + $0x1c0] sm:$0xf] }
  0xe3   : > { %v890_v45 = vadd.f32 %v827_v44, %v374_v42 }
  0xe5   : > { %v5255_v53 = vpop.eup %5254  ;;  %v3858_v46 = vmul.f32 -1.442695, %v890_v45 }
  0xe6   : > { %v5257_v47 = vpop.eup %5256  ;;  %v937_v48 = vadd.f32 1.0, %v5255_v53 }
  0xe7   : > { %v5259_v51 = vpop.eup %5258  ;;  %v6032_v52 = vadd.f32 1.0, %v5257_v47  ;;  %5260 = vpow2.f32 %v3858_v46  ;;  %v972_v46 = vld [vmem:[#allocation3 + $0x8] sm:$0xff] }
  0xe8   : > { %v902_v54 = vmul.f32 %v5259_v51, %v899_v40  ;;  %5262 = vrcp.f32 %v937_v48  ;;  %vm907_vm1 = vweird.f32 %v5259_v51  ;;  %vm944_vm4 = vweird.f32 %v937_v48 }
  0xe9   : > { %5264 = vrcp.f32 %v6032_v52  ;;  %vm6046_vm3 = vmor %vm906_vm0, %vm907_vm1  ;;  %v950_v12 = vand.u32 2147483648, %v937_v48  ;;  %v948_v16 = vand.u32 2147483647, %v937_v48  ;;  %vm921_vm7 = vweird.f32 %v6032_v52 }
  0xea   : > { %v903_v56 = vsub.f32 1.0, %v902_v54  ;;  %v927_v32 = vand.u32 2147483648, %v6032_v52  ;;  %v925_v35 = vand.u32 2147483647, %v6032_v52 }
  0xeb   : > { %v951_v26 = vor.u32 1.1754944e-38, %v950_v12  ;;  %vm949_vm9 = vcmp.eq.f32.partialorder %v948_v16, 8.507059e+37  ;;  %v4946_v12 = vld [vmem:[%s7621_s3 + $0xc4] sm:$0xf] }
  0xec   : > { %v904_v58 = vmul.f32 %v5259_v51, %v903_v56  ;;  %v928_v44 = vor.u32 1.1754944e-38, %v927_v32  ;;  %vm926_vm14 = vcmp.eq.f32.partialorder %v925_v35, 8.507059e+37  ;;  %v4978_v16 = vld [vmem:[%s7621_s3 + $0x1c4] sm:$0xf]  ;;  %v4940_v32 = vld [vmem:[%s7621_s3 + $0x8c] sm:$0xf0] }
  0xed   : > { %v5261_v57 = vpop.eup %5260 }
  0xee   : > { %v5263_v59 = vpop.eup %5262  ;;  %v6038_v60 = vadd.f32 1.0, %v5261_v57  ;;  %v905_v5 = vadd.f32 %v5259_v51, %v904_v58 }
  0xef   : > { %v838_v61 = vpop.f32.mrf.mxu0  ;;  %v6040_v62 = vpop.eup %5264  ;;  %v940_v63 = vmul.f32 %v5263_v59, %v937_v48  ;;  %vm945_vm2 = vweird.f32 %v5263_v59 }
  0xf0   : > { %v852_v1 = vpop.f32.mrf.mxu1  ;;  %v917_v2 = vmul.f32 %v6040_v62, %v6032_v52  ;;  %5266 = vrcp.f32 %v6038_v60  ;;  %v909_v14 = vsel %vm6046_vm3, %v5259_v51, %v905_v5  ;;  %vm6053_vm5 = vmor %vm944_vm4, %vm945_vm2  ;;  %vm922_vm8 = vweird.f32 %v6040_v62  ;;  %v4153_v5 = vld [vmem:[%s7621_s3 + $0x1f0] sm:$0xf0] }
  0xf1   : > { %v853_v3 = vadd.f32 %v852_v1, %v838_v61  ;;  %v941_v4 = vsub.f32 1.0, %v940_v63  ;;  %v914_v25 = vsel %vm911_vm6, %v913_v18, %v909_v14  ;;  %vm923_vm11 = vmor %vm921_vm7, %vm922_vm8  ;;  %vm959_vm12 = vweird.f32 %v6038_v60  ;;  %v4151_v61 = vld [vmem:[%s7621_s3 + $0x1e0] sm:$0xf]  ;;  %v4984_v63 = vld [vmem:[%s7621_s3 + $0x1ec] sm:$0xf0] }
  0xf2   : > { %v918_v7 = vsub.f32 1.0, %v917_v2  ;;  %v973_v36 = vmul.f32 %v971_v27, %v914_v25  ;;  %v965_v39 = vand.u32 2147483648, %v6038_v60  ;;  %v963_v43 = vand.u32 2147483647, %v6038_v60  ;;  %v4025_v1 = vld [vmem:[%s7621_s3 + $0xf0] sm:$0xf0] }
  0xf3   : > { %v887_v8 = vadd.f32 %v853_v3, %v371_v0  ;;  %v942_v10 = vmul.f32 %v5263_v59, %v941_v4  ;;  %v4950_v0 = vld [vmem:[%s7621_s3 + $0xe4] sm:$0xf]  ;;  %v4152_v2 = vor.u32 %v4984_v63, %v4151_v61  ;;  %v4136_v14 = vor.u32 %v4980_v11, %v4135_v9  ;;  %v3993_v25 = vld [vmem:[%s7621_s3 + $0xb0] sm:$0xf0]  ;;  %v3943_v61 = vld [vmem:[%s7621_s3 + $0x40] sm:$0xf] }
  0xf4   : > { %v919_v13 = vmul.f32 %v6040_v62, %v918_v7  ;;  %v966_v53 = vor.u32 1.1754944e-38, %v965_v39  ;;  %vm964_vm15 = vcmp.eq.f32.partialorder %v963_v43, 8.507059e+37  ;;  %v4028_v3 = vor.u32 %v4950_v0, %v4025_v1  ;;  %v4982_v4 = vld [vmem:[%s7621_s3 + $0x1e4] sm:$0xf]  ;;  %v4007_v7 = vld [vmem:[%s7621_s3 + $0xc0] sm:$0xf] }
  0xf5   : > { %5268 = vtanh.f32 %v887_v8  ;;  %v943_v15 = vadd.f32 %v5263_v59, %v942_v10  ;;  %v4156_v6 = vor.u32 %v4982_v4, %v4153_v5  ;;  %1540 = vmatpush.bf16.msra.mxu2 %v4152_v2  ;;  %v4948_v8 = vld [vmem:[%s7621_s3 + $0xcc] sm:$0xf0]  ;;  %v4970_v43 = vld [vmem:[%s7621_s3 + $0x184] sm:$0xf]  ;;  %v4071_v63 = vld [vmem:[%s7621_s3 + $0x140] sm:$0xf] }
  0xf6   : > { %v5267_v17 = vpop.eup %5266  ;;  %v920_v30 = vadd.f32 %v6040_v62, %v919_v13  ;;  %1554 = vmatpush.bf16.msra.mxu3 %v4028_v3  ;;  %v4008_v10 = vor.u32 %v4948_v8, %v4007_v7  ;;  %v4009_v13 = vld [vmem:[%s7621_s3 + $0xd0] sm:$0xf0]  ;;  %v4964_v2 = vld [vmem:[%s7621_s3 + $0x14c] sm:$0xf0]  ;;  %v4930_v3 = vld [vmem:[%s7621_s3 + $0x44] sm:$0xf] }
  0xf7   : > { %v840_v20 = vpop.f32.mrf.mxu0  ;;  %v955_v21 = vmul.f32 %v5267_v17, %v6038_v60  ;;  %v947_v22 = vsel %vm6053_vm5, %v5263_v59, %v943_v15  ;;  %vm960_vm10 = vweird.f32 %v5267_v17  ;;  %v4023_v59 = vld [vmem:[%s7621_s3 + $0xe0] sm:$0xf]  ;;  %v4952_v60 = vld [vmem:[%s7621_s3 + $0xec] sm:$0xf0]  ;;  %1568 = vmatpush.bf16.msrb.mxu0 %v4156_v6  ;;  %v4012_v15 = vor.u32 %v4946_v12, %v4009_v13  ;;  %v3945_v4 = vld [vmem:[%s7621_s3 + $0x50] sm:$0xf0] }
  0xf8   : > { %v854_v24 = vpop.f32.mrf.mxu1  ;;  %v952_v33 = vsel %vm949_vm9, %v951_v26, %v947_v22  ;;  %v924_v41 = vsel %vm923_vm11, %v6040_v62, %v920_v30  ;;  %vm961_vm13 = vmor %vm959_vm12, %vm960_vm10  ;;  %v4024_v62 = vor.u32 %v4952_v60, %v4023_v59  ;;  %v880_v39 = vpop.f32.mrf.mxu3  ;;  %v4089_v59 = vld [vmem:[%s7621_s3 + $0x170] sm:$0xf0]  ;;  %v4072_v5 = vor.u32 %v4964_v2, %v4071_v63  ;;  %v4962_v7 = vld [vmem:[%s7621_s3 + $0x144] sm:$0xf] }
  0xf9   : > { %v855_v28 = vadd.f32 %v854_v24, %v840_v20  ;;  %v956_v29 = vsub.f32 1.0, %v955_v21  ;;  %v929_v45 = vsel %vm926_vm14, %v928_v44, %v924_v41  ;;  %1541 = vmatpush.bf16.msra.mxu2 %v4136_v14  ;;  %v4944_v20 = vld [vmem:[%s7621_s3 + $0xac] sm:$0xf0]  ;;  %v4119_v21 = vld [vmem:[%s7621_s3 + $0x1a0] sm:$0xf]  ;;  %v3948_v6 = vor.u32 %v4930_v3, %v3945_v4 }
  0xfa   : > { %v974_v49 = vmul.f32 %v972_v46, %v929_v45  ;;  %1526 = vmatpush.bf16.msra.mxu1 %v4024_v62  ;;  %1555 = vmatpush.bf16.msra.mxu3 %v4012_v15  ;;  %v3992_v22 = vor.u32 %v4944_v20, %v3991_v19  ;;  %v4942_v24 = vld [vmem:[%s7621_s3 + $0xa4] sm:$0xf]  ;;  %v4105_v44 = vld [vmem:[%s7621_s3 + $0x190] sm:$0xf0]  ;;  %v3959_v45 = vld [vmem:[%s7621_s3 + $0x60] sm:$0xf] }
  0xfb   : > { %v5269_v31 = vpop.eup %5268  ;;  %v891_v34 = vadd.f32 %v855_v28, %v375_v23  ;;  %v957_v38 = vmul.f32 %v5267_v17, %v956_v29  ;;  %v4976_v23 = vld [vmem:[%s7621_s3 + $0x1ac] sm:$0xf0]  ;;  %v3996_v27 = vor.u32 %v4942_v24, %v3993_v25  ;;  %v4974_v28 = vld [vmem:[%s7621_s3 + $0x1a4] sm:$0xf]  ;;  %v4121_v29 = vld [vmem:[%s7621_s3 + $0x1b0] sm:$0xf0] }
  0xfc   : > { %v975_v37 = vmul.f32 %v5269_v31, %v952_v33  ;;  %v4120_v26 = vor.u32 %v4976_v23, %v4119_v21  ;;  %v4124_v30 = vor.u32 %v4974_v28, %v4121_v29  ;;  %v3975_v31 = vld [vmem:[%s7621_s3 + $0x80] sm:$0xf]  ;;  %v4932_v62 = vld [vmem:[%s7621_s3 + $0x4c] sm:$0xf0]  ;;  %v4073_v8 = vld [vmem:[%s7621_s3 + $0x150] sm:$0xf0] }
  0xfd   : > { %5270 = vtanh.f32 %v891_v34  ;;  %v958_v42 = vadd.f32 %v5267_v17, %v957_v38  ;;  %v4103_v33 = vld [vmem:[%s7621_s3 + $0x180] sm:$0xf]  ;;  %v866_v34 = vpop.f32.mrf.mxu2  ;;  %v3976_v35 = vor.u32 %v4940_v32, %v3975_v31  ;;  %v3977_v38 = vld [vmem:[%s7621_s3 + $0x90] sm:$0xf0]  ;;  %v3944_v1 = vor.u32 %v4932_v62, %v3943_v61  ;;  %v4928_v14 = vld [vmem:[%s7621_s3 + $0x2c] sm:$0xf0] }
  0xfe   : > { %v6070_v40 = vadd.f32 %v975_v37, %v973_v36  ;;  %1527 = vmatpush.bf16.msra.mxu1 %v4008_v10  ;;  %1542 = vmatpush.bf16.msra.mxu2 %v4120_v26  ;;  %v4972_v36 = vld [vmem:[%s7621_s3 + $0x18c] sm:$0xf0]  ;;  %v4938_v37 = vld [vmem:[%s7621_s3 + $0x84] sm:$0xf]  ;;  %v4087_v46 = vld [vmem:[%s7621_s3 + $0x160] sm:$0xf]  ;;  %v4076_v10 = vor.u32 %v4962_v7, %v4073_v8 }
  0xff   : > { %v962_v50 = vsel %vm961_vm13, %v5267_v17, %v958_v42  ;;  %v4137_v17 = vld [vmem:[%s7621_s3 + $0x1d0] sm:$0xf0]  ;;  %1556 = vmatpush.bf16.msra.mxu3 %v3996_v27  ;;  %v4104_v41 = vor.u32 %v4972_v36, %v4103_v33  ;;  %v3980_v42 = vor.u32 %v4938_v37, %v3977_v38  ;;  %v3927_v13 = vld [vmem:[%s7621_s3 + $0x20] sm:$0xf]  ;;  %v4926_v19 = vld [vmem:[%s7621_s3 + $0x24] sm:$0xf] }
 0x100   : > { %1119 = vst [vmem:[%s5596_s19] sm:$0xff] %v6070_v40  ;;  %v967_v48 = vsel %vm964_vm15, %v966_v53, %v962_v50  ;;  %v979_v54 = vpack.c.bf16 %v6070_v40, %v6070_v40  ;;  %v4140_v18 = vor.u32 %v4978_v16, %v4137_v17  ;;  %v4108_v50 = vor.u32 %v4970_v43, %v4105_v44  ;;  %v4936_v53 = vld [vmem:[%s7621_s3 + $0x6c] sm:$0xf0]  ;;  %v882_v11 = vpop.f32.mrf.mxu3  ;;  %v4055_v15 = vld [vmem:[%s7621_s3 + $0x120] sm:$0xf]  ;;  %v3929_v20 = vld [vmem:[%s7621_s3 + $0x30] sm:$0xf0] }
 0x101   : > { %v3928_v17 = vor.u32 %v4928_v14, %v3927_v13  ;;  %v4958_v23 = vld [vmem:[%s7621_s3 + $0x124] sm:$0xf]  ;;  %v4057_v24 = vld [vmem:[%s7621_s3 + $0x130] sm:$0xf0]  ;;  %v376_v27 = vld [vmem:[%s5592_s17 + $0x38] sm:$0xff] }
 0x102   : > { %v999_v56 = vunpack.c.l.b16 %v979_v54  ;;  %1569 = vmatpush.bf16.msrb.mxu0 %v4140_v18  ;;  %1528 = vmatpush.bf16.msra.mxu1 %v3992_v22  ;;  %v3961_v54 = vld [vmem:[%s7621_s3 + $0x70] sm:$0xf0]  ;;  %v4960_v18 = vld [vmem:[%s7621_s3 + $0x12c] sm:$0xf0]  ;;  %v3932_v22 = vor.u32 %v4926_v19, %v3929_v20  ;;  %v4060_v28 = vor.u32 %v4958_v23, %v4057_v24  ;;  %v3911_v29 = vld [vmem:[%s7621_s3] sm:$0xf] }
 0x103   : > { %v5271_v47 = vpop.eup %5270  ;;  %1543 = vmatpush.bf16.msra.mxu2 %v4104_v41  ;;  %1557 = vmatpush.bf16.msra.mxu3 %v3980_v42  ;;  %v4056_v21 = vor.u32 %v4960_v18, %v4055_v15  ;;  %v4039_v31 = vld [vmem:[%s7621_s3 + $0x100] sm:$0xf]  ;;  %v4956_v33 = vld [vmem:[%s7621_s3 + $0x10c] sm:$0xf0]  ;;  %v4954_v38 = vld [vmem:[%s7621_s3 + $0x104] sm:$0xf] }
 0x104   : > { %v976_v51 = vmul.f32 %v5271_v47, %v967_v48  ;;  %v881_v47 = vadd.f32 %v880_v39, %v866_v34  ;;  %v3960_v48 = vor.u32 %v4936_v53, %v3959_v45  ;;  %v4922_v34 = vld [vmem:[%s7621_s3 + $0x4] sm:$0xf]  ;;  %v4040_v36 = vor.u32 %v4956_v33, %v4039_v31  ;;  %v4041_v39 = vld [vmem:[%s7621_s3 + $0x110] sm:$0xf0]  ;;  %v4031_v41 = vld [vmem:[%s7621_s3 + $0xe8] sm:$0xf] }
 0x105   : > { %v868_v9 = vpop.f32.mrf.mxu2  ;;  %v4044_v43 = vor.u32 %v4954_v38, %v4041_v39  ;;  %v4953_v44 = vld [vmem:[%s7621_s3 + $0xf4] sm:$0xf0]  ;;  %v4143_v61 = vld [vmem:[%s7621_s3 + $0x1c8] sm:$0xf]  ;;  %v4947_v63 = vld [vmem:[%s7621_s3 + $0xcc] sm:$0xf] }
 0x106   : > { %v6076_v52 = vadd.f32 %v976_v51, %v974_v49  ;;  %1570 = vmatpush.bf16.msrb.mxu0 %v4124_v30  ;;  %1529 = vmatpush.bf16.msra.mxu1 %v3976_v35  ;;  %v4968_v49 = vld [vmem:[%s7621_s3 + $0x16c] sm:$0xf0]  ;;  %v4934_v51 = vld [vmem:[%s7621_s3 + $0x64] sm:$0xf]  ;;  %v883_v25 = vadd.f32 %v882_v11, %v868_v9  ;;  %v3913_v35 = vld [vmem:[%s7621_s3 + $0x10] sm:$0xf0] }
 0x107   : > { %v4924_v30 = vld [vmem:[%s7621_s3 + $0xc] sm:$0xf0]  ;;  %v3916_v37 = vor.u32 %v4922_v34, %v3913_v35  ;;  %v4985_v45 = vld [vmem:[%s7621_s3 + $0x1f4] sm:$0xf0]  ;;  %v4017_v3 = vld [vmem:[%s7621_s3 + $0xd8] sm:$0xf0] }
 0x108   : > { %1120 = vst [vmem:[%s5596_s19 + $0x8] sm:$0xff] %v6076_v52  ;;  %v980_v55 = vpack.c.bf16 %v6076_v52, %v6076_v52  ;;  %v3912_v32 = vor.u32 %v4924_v30, %v3911_v29  ;;  %v892_v42 = vadd.f32 %v883_v25, %v376_v27  ;;  %v4981_v62 = vld [vmem:[%s7621_s3 + $0x1d4] sm:$0xf0]  ;;  %v4979_v4 = vld [vmem:[%s7621_s3 + $0x1cc] sm:$0xf] }
 0x109   : > { %v4144_v2 = vor.u32 %v4981_v62, %v4143_v61  ;;  %v4145_v7 = vld [vmem:[%s7621_s3 + $0x1d8] sm:$0xf0]  ;;  %v3999_v8 = vld [vmem:[%s7621_s3 + $0xa8] sm:$0xf]  ;;  %v4943_v13 = vld [vmem:[%s7621_s3 + $0xac] sm:$0xf] }
 0x10a   : > { %v1000_v57 = vunpack.c.l.b16 %v980_v55  ;;  %1571 = vmatpush.bf16.msrb.mxu0 %v4108_v50  ;;  %v372_v55 = vld [vmem:[%s5592_s17 + $0x18] sm:$0xff]  ;;  %1530 = vmatpush.bf16.msra.mxu1 %v3960_v48  ;;  %v4159_v50 = vld [vmem:[%s7621_s3 + $0x1e8] sm:$0xf]  ;;  %v4951_v48 = vld [vmem:[%s7621_s3 + $0xec] sm:$0xf]  ;;  %v4148_v9 = vor.u32 %v4979_v4, %v4145_v7 }
 0x10b   : > { %v888_v0 = vadd.f32 %v881_v47, %v372_v55  ;;  %v4160_v47 = vor.u32 %v4985_v45, %v4159_v50  ;;  %v4127_v11 = vld [vmem:[%s7621_s3 + $0x1a8] sm:$0xf]  ;;  %v4129_v18 = vld [vmem:[%s7621_s3 + $0x1b8] sm:$0xf0]  ;;  %v4973_v24 = vld [vmem:[%s7621_s3 + $0x194] sm:$0xf0] }
 0x10c   : > { %v1001_v58 = vpack.c.b16 %v1000_v57, %v999_v56  ;;  %v4088_v56 = vor.u32 %v4968_v49, %v4087_v46  ;;  %v3964_v57 = vor.u32 %v4934_v51, %v3961_v54  ;;  %v4032_v46 = vor.u32 %v4953_v44, %v4031_v41  ;;  %v4033_v49 = vld [vmem:[%s7621_s3 + $0xf8] sm:$0xf0]  ;;  %v4983_v51 = vld [vmem:[%s7621_s3 + $0x1ec] sm:$0xf]  ;;  %v4111_v23 = vld [vmem:[%s7621_s3 + $0x188] sm:$0xf] }
 0x10d   : > { %v4036_v55 = vor.u32 %v4951_v48, %v4033_v49  ;;  %v4939_v25 = vld [vmem:[%s7621_s3 + $0x8c] sm:$0xf]  ;;  %v4112_v27 = vor.u32 %v4973_v24, %v4111_v23  ;;  %v4113_v30 = vld [vmem:[%s7621_s3 + $0x198] sm:$0xf0]  ;;  %v3967_v39 = vld [vmem:[%s7621_s3 + $0x68] sm:$0xf] }
 0x10e   : > { %1059 = vmatmul.bf16.vlgmr.msra.gmra.mxu0 %v1001_v58  ;;  %v4966_v58 = vld [vmem:[%s7621_s3 + $0x164] sm:$0xf]  ;;  %1544 = vmatpush.bf16.msra.mxu2 %v4088_v56  ;;  %v4161_v56 = vld [vmem:[%s7621_s3 + $0x1f8] sm:$0xf0]  ;;  %v4971_v29 = vld [vmem:[%s7621_s3 + $0x18c] sm:$0xf] }
 0x10f   : > { %v4092_v60 = vor.u32 %v4966_v58, %v4089_v59  ;;  %1558 = vmatpush.bf16.msra.mxu3 %v3964_v57  ;;  %1531 = vmatpush.bf16.msra.mxu1 %v3944_v1  ;;  %v4015_v57 = vld [vmem:[%s7621_s3 + $0xc8] sm:$0xf]  ;;  %v4949_v58 = vld [vmem:[%s7621_s3 + $0xd4] sm:$0xf0]  ;;  %v4164_v59 = vor.u32 %v4983_v51, %v4161_v56  ;;  %v4963_v4 = vld [vmem:[%s7621_s3 + $0x14c] sm:$0xf] }
 0x110   : > { %v4937_v41 = vld [vmem:[%s7621_s3 + $0x74] sm:$0xf0] }
 0x111   : > { %1572 = vmatpush.bf16.msrb.mxu0 %v4092_v60  ;;  %v4016_v60 = vor.u32 %v4949_v58, %v4015_v57  ;;  %v3968_v50 = vor.u32 %v4937_v41, %v3967_v39  ;;  %v3951_v58 = vld [vmem:[%s7621_s3 + $0x48] sm:$0xf]  ;;  %v4965_v62 = vld [vmem:[%s7621_s3 + $0x154] sm:$0xf0] }
 0x112   : > { %1545 = vmatpush.bf16.msra.mxu2 %v4072_v5 }
 0x113   : > { %1559 = vmatpush.bf16.msra.mxu3 %v3948_v6  ;;  %1532 = vmatpush.bf16.msra.mxu1 %v3928_v17  ;;  %v4020_v6 = vor.u32 %v4947_v63, %v4017_v3  ;;  %v4975_v17 = vld [vmem:[%s7621_s3 + $0x1ac] sm:$0xf] }
 0x114   : > { %v4132_v20 = vor.u32 %v4975_v17, %v4129_v18  ;;  %v4931_v63 = vld [vmem:[%s7621_s3 + $0x4c] sm:$0xf] }
 0x115   : > { %1573 = vmatpush.bf16.msrb.mxu0 %v4076_v10  ;;  %v4945_v10 = vld [vmem:[%s7621_s3 + $0xb4] sm:$0xf0] }
 0x116   : > { %1546 = vmatpush.bf16.msra.mxu2 %v4056_v21  ;;  %v4000_v14 = vor.u32 %v4945_v10, %v3999_v8  ;;  %v3983_v21 = vld [vmem:[%s7621_s3 + $0x88] sm:$0xf] }
 0x117   : > { %1560 = vmatpush.bf16.msra.mxu3 %v3932_v22  ;;  %1533 = vmatpush.bf16.msra.mxu1 %v3912_v32  ;;  %v4941_v22 = vld [vmem:[%s7621_s3 + $0x94] sm:$0xf0]  ;;  %v4063_v10 = vld [vmem:[%s7621_s3 + $0x128] sm:$0xf] }
 0x119   : > { %1574 = vmatpush.bf16.msrb.mxu0 %v4060_v28  ;;  %v3985_v28 = vld [vmem:[%s7621_s3 + $0x98] sm:$0xf0] }
 0x11a   : > { %1547 = vmatpush.bf16.msra.mxu2 %v4040_v36  ;;  %v3988_v32 = vor.u32 %v4939_v25, %v3985_v28  ;;  %v4047_v28 = vld [vmem:[%s7621_s3 + $0x108] sm:$0xf] }
 0x11b   : > { %1561 = vmatpush.bf16.msra.mxu3 %v3916_v37  ;;  %1582 = vmatpush.bf16.msrb.mxu1 %v4032_v46  ;;  %v4116_v37 = vor.u32 %v4971_v29, %v4113_v30  ;;  %v3969_v46 = vld [vmem:[%s7621_s3 + $0x78] sm:$0xf0]  ;;  %v4957_v30 = vld [vmem:[%s7621_s3 + $0x114] sm:$0xf0] }
 0x11c   : > { %v4048_v41 = vor.u32 %v4957_v30, %v4047_v28 }
 0x11d   : > { %1575 = vmatpush.bf16.msrb.mxu0 %v4044_v43  ;;  %v4969_v43 = vld [vmem:[%s7621_s3 + $0x174] sm:$0xf0] }
 0x11e   : > { %1596 = vmatpush.bf16.msrb.mxu2 %v4160_v47 }
 0x11f   : > { %1610 = vmatpush.bf16.msrb.mxu3 %v4036_v55  ;;  %1583 = vmatpush.bf16.msrb.mxu1 %v4016_v60  ;;  %v4097_v55 = vld [vmem:[%s7621_s3 + $0x178] sm:$0xf0]  ;;  %v4079_v60 = vld [vmem:[%s7621_s3 + $0x148] sm:$0xf] }
 0x121   : > { %1624 = vmatpush.bf16.msra.mxu0 %v4164_v59  ;;  %v4933_v59 = vld [vmem:[%s7621_s3 + $0x54] sm:$0xf0] }
 0x122   : > { %1597 = vmatpush.bf16.msrb.mxu2 %v4144_v2  ;;  %v3952_v61 = vor.u32 %v4933_v59, %v3951_v58  ;;  %v4080_v2 = vor.u32 %v4965_v62, %v4079_v60  ;;  %v4992_v58 = vld [vmem:[%s7609_s4 + $0x30] sm:$0xff]  ;;  %v4991_v60 = vld [vmem:[%s7609_s4 + $0x28] sm:$0xff]  ;;  %v3893_v62 = vld [vmem:[%s5592_s17 + $0x40] sm:$0xff] }
 0x123   : > { %1611 = vmatpush.bf16.msrb.mxu3 %v4020_v6  ;;  %1584 = vmatpush.bf16.msrb.mxu1 %v4000_v14  ;;  %v3935_v6 = vld [vmem:[%s7621_s3 + $0x28] sm:$0xf]  ;;  %v4927_v14 = vld [vmem:[%s7621_s3 + $0x2c] sm:$0xf] }
 0x125   : > { %1625 = vmatpush.bf16.msra.mxu0 %v4148_v9  ;;  %v4929_v9 = vld [vmem:[%s7621_s3 + $0x34] sm:$0xf0] }
 0x129   : > { %1626 = vmatpush.bf16.msra.mxu0 %v4132_v20 }
 0x12d   : > { %1627 = vmatpush.bf16.msra.mxu0 %v4116_v37  ;;  %v4955_v37 = vld [vmem:[%s7621_s3 + $0x10c] sm:$0xf] }
 0x18b   : > { %v1060_v12 = vpop.f32.mrf.mxu0 }
 0x18c   : > { %v1065_v16 = vadd.f32 %v1060_v12, %v888_v0  ;;  %v4977_v12 = vld [vmem:[%s7621_s3 + $0x1b4] sm:$0xf0] }
 0x18d   : > { %v4128_v15 = vor.u32 %v4977_v12, %v4127_v11  ;;  %v4961_v11 = vld [vmem:[%s7621_s3 + $0x134] sm:$0xf0] }
 0x18e   : > { %v3891_v26 = vmul.f32 -1.442695, %v1065_v16  ;;  %v4001_v16 = vld [vmem:[%s7621_s3 + $0xb8] sm:$0xf0]  ;;  %v4064_v20 = vor.u32 %v4961_v11, %v4063_v10  ;;  %v3897_v11 = vld [vmem:[%s5592_s17 + $0x60] sm:$0xff] }
 0x18f   : > { %v4004_v19 = vor.u32 %v4943_v13, %v4001_v16  ;;  %1598 = vmatpush.bf16.msrb.mxu2 %v4128_v15  ;;  %v3937_v15 = vld [vmem:[%s7621_s3 + $0x38] sm:$0xf0]  ;;  %v4959_v16 = vld [vmem:[%s7621_s3 + $0x12c] sm:$0xf] }
 0x190   : > { %5272 = vpow2.f32 %v3891_v26  ;;  %v3984_v26 = vor.u32 %v4941_v22, %v3983_v21  ;;  %v4065_v21 = vld [vmem:[%s7621_s3 + $0x138] sm:$0xf0]  ;;  %v3919_v22 = vld [vmem:[%s7621_s3 + $0x8] sm:$0xf] }
 0x191   : > { %1612 = vmatpush.bf16.msrb.mxu3 %v4004_v19  ;;  %v3936_v19 = vor.u32 %v4929_v9, %v3935_v6  ;;  %v4068_v29 = vor.u32 %v4959_v16, %v4065_v21  ;;  %v4989_v9 = vld [vmem:[%s7609_s4 + $0x18] sm:$0xff] }
 0x192   : > { %1585 = vmatpush.bf16.msrb.mxu1 %v3984_v26  ;;  %v3940_v26 = vor.u32 %v4927_v14, %v3937_v15  ;;  %v3898_v15 = vld [vmem:[%s5592_s17 + $0x68] sm:$0xff] }
 0x193   : > { %v1062_v53 = vpop.f32.mrf.mxu0  ;;  %1599 = vmatpush.bf16.msrb.mxu2 %v4112_v27  ;;  %v4925_v27 = vld [vmem:[%s7621_s3 + $0x14] sm:$0xf0] }
 0x194   : > { %v1066_v54 = vadd.f32 %v1062_v53, %v892_v42  ;;  %v4095_v42 = vld [vmem:[%s7621_s3 + $0x168] sm:$0xf]  ;;  %v4935_v53 = vld [vmem:[%s7621_s3 + $0x6c] sm:$0xf]  ;;  %v3920_v39 = vor.u32 %v4925_v27, %v3919_v22 }
 0x195   : > { %1613 = vmatpush.bf16.msrb.mxu3 %v3988_v32  ;;  %v4096_v45 = vor.u32 %v4969_v43, %v4095_v42  ;;  %v3972_v51 = vor.u32 %v4935_v53, %v3969_v46  ;;  %v3921_v32 = vld [vmem:[%s7621_s3 + $0x18] sm:$0xf0] }
 0x196   : > { %v5273_v0 = vpop.eup %5272  ;;  %v3892_v1 = vmul.f32 -1.442695, %v1066_v54  ;;  %v4967_v54 = vld [vmem:[%s7621_s3 + $0x16c] sm:$0xf]  ;;  %1586 = vmatpush.bf16.msrb.mxu1 %v3968_v50 }
 0x197   : > { %v6323_v5 = vadd.f32 1.0, %v5273_v0  ;;  %v4100_v57 = vor.u32 %v4967_v54, %v4097_v55  ;;  %1600 = vmatpush.bf16.msrb.mxu2 %v4096_v45  ;;  %v3953_v0 = vld [vmem:[%s7621_s3 + $0x58] sm:$0xf0] }
 0x198   : > { %5274 = vpow2.f32 %v3892_v1  ;;  %v3956_v3 = vor.u32 %v4931_v63, %v3953_v0 }
 0x199   : > { %5276 = vrcp.f32 %v6323_v5  ;;  %v1084_v34 = vand.u32 2147483647, %v6323_v5  ;;  %v1086_v35 = vand.u32 2147483648, %v6323_v5  ;;  %vm1080_vm1 = vweird.f32 %v6323_v5  ;;  %1614 = vmatpush.bf16.msrb.mxu3 %v3972_v51  ;;  %1628 = vmatpush.bf16.msra.mxu0 %v4100_v57  ;;  %v4993_v57 = vld [vmem:[%s7609_s4 + $0x38] sm:$0xff] }
 0x19a   : > { %1587 = vmatpush.bf16.msrb.mxu1 %v3952_v61 }
 0x19b   : > { %vm6408_vm3 = vcmp.eq.f32.partialorder %v1084_v34, 8.507059e+37  ;;  %v1087_v49 = vor.u32 1.1754944e-38, %v1086_v35  ;;  %1601 = vmatpush.bf16.msrb.mxu2 %v4080_v2 }
 0x19d   : > { %1615 = vmatpush.bf16.msrb.mxu3 %v3956_v3 }
 0x19e   : > { %v5275_v31 = vpop.eup %5274  ;;  %1588 = vmatpush.bf16.msrb.mxu1 %v3936_v19 }
 0x19f   : > { %v5277_v33 = vpop.eup %5276  ;;  %v6379_v36 = vadd.f32 1.0, %v5275_v31  ;;  %v4923_v31 = vld [vmem:[%s7621_s3 + $0xc] sm:$0xf]  ;;  %1602 = vmatpush.bf16.msrb.mxu2 %v4064_v20 }
 0x1a0   : > { %v1076_v38 = vmul.f32 %v5277_v33, %v6323_v5  ;;  %vm1081_vm0 = vweird.f32 %v5277_v33  ;;  %v4081_v5 = vld [vmem:[%s7621_s3 + $0x158] sm:$0xf0]  ;;  %v3924_v43 = vor.u32 %v4923_v31, %v3921_v32  ;;  %v3895_v32 = vld [vmem:[%s5592_s17 + $0x50] sm:$0xff] }
 0x1a1   : > { %5278 = vrcp.f32 %v6379_v36  ;;  %vm6404_vm2 = vmor %vm1080_vm1, %vm1081_vm0  ;;  %v4084_v8 = vor.u32 %v4963_v4, %v4081_v5  ;;  %v1101_v25 = vand.u32 2147483648, %v6379_v36  ;;  %v1099_v35 = vand.u32 2147483647, %v6379_v36  ;;  %1616 = vmatpush.bf16.msrb.mxu3 %v3940_v26  ;;  %v4990_v4 = vld [vmem:[%s7609_s4 + $0x20] sm:$0xff]  ;;  %v4987_v26 = vld [vmem:[%s7609_s4 + $0x8] sm:$0xff] }
 0x1a2   : > { %v1077_v44 = vsub.f32 1.0, %v1076_v38  ;;  %5280 = vtanh.f32 %v6070_v40  ;;  %v4049_v38 = vld [vmem:[%s7621_s3 + $0x118] sm:$0xf0]  ;;  %vm1095_vm5 = vweird.f32 %v6379_v36  ;;  %1589 = vmatpush.bf16.msrb.mxu1 %v3920_v39 }
 0x1a3   : > { %5282 = vtanh.f32 %v6076_v52  ;;  %1629 = vmatpush.bf16.msra.mxu0 %v4084_v8  ;;  %v4052_v50 = vor.u32 %v4955_v37, %v4049_v38  ;;  %vm1100_vm7 = vcmp.eq.f32.partialorder %v1099_v35, 8.507059e+37  ;;  %1603 = vmatpush.bf16.msrb.mxu2 %v4048_v41 }
 0x1a4   : > { %v1078_v56 = vmul.f32 %v5277_v33, %v1077_v44  ;;  %v1102_v44 = vor.u32 1.1754944e-38, %v1101_v25 }
 0x1a5   : > { %1617 = vmatpush.bf16.msrb.mxu3 %v3924_v43 }
 0x1a6   : > { %v1079_v1 = vadd.f32 %v5277_v33, %v1078_v56 }
 0x1a7   : > { %v5279_v7 = vpop.eup %5278  ;;  %1630 = vmatpush.bf16.msra.mxu0 %v4068_v29  ;;  %v4986_v29 = vld [vmem:[%s7609_s4] sm:$0xff] }
 0x1a8   : > { %v1083_v12 = vsel %vm6404_vm2, %v5277_v33, %v1079_v1  ;;  %v1091_v13 = vmul.f32 %v5279_v7, %v6379_v36  ;;  %v5281_v17 = vpop.eup %5280  ;;  %vm1096_vm4 = vweird.f32 %v5279_v7  ;;  %v3894_v1 = vld [vmem:[%s5592_s17 + $0x48] sm:$0xff] }
 0x1a9   : > { %v1088_v18 = vsel %vm6408_vm3, %v1087_v49, %v1083_v12  ;;  %vm1097_vm6 = vmor %vm1095_vm5, %vm1096_vm4  ;;  %v5283_v53 = vpop.eup %5282 }
 0x1aa   : > { %v1107_v23 = vmul.f32 %v5281_v17, %v1088_v18  ;;  %v1092_v24 = vsub.f32 1.0, %v1091_v13  ;;  %v4988_v18 = vld [vmem:[%s7609_s4 + $0x10] sm:$0xff] }
 0x1ab   : > { %1631 = vmatpush.bf16.msra.mxu0 %v4052_v50 }
 0x1ac   : > { %v5149_v33 = vpack.c.bf16 %v6070_v40, %v1107_v23  ;;  %1117 = vst [vmem:[%s5594_s18] sm:$0xff] %v1107_v23  ;;  %v1093_v34 = vmul.f32 %v5279_v7, %v1092_v24 }
 0x1ae   : > { %5150 = vst [vmem:[#allocation2] sm:$0xff] %v5149_v33   ;;  %v1094_v42 = vadd.f32 %v5279_v7, %v1093_v34 }
 0x1b0   : > { %v1098_v45 = vsel %vm1097_vm6, %v5279_v7, %v1094_v42 }
 0x1b1   : > { %v1103_v46 = vsel %vm1100_vm7, %v1102_v44, %v1098_v45 }
 0x1b2   : > { %v1108_v47 = vmul.f32 %v5283_v53, %v1103_v46 }
 0x1b4   : > { %v5154_v48 = vpack.c.bf16 %v6076_v52, %v1108_v47  ;;  %1118 = vst [vmem:[%s5594_s18 + $0x8] sm:$0xff] %v1108_v47 }
 0x1b5   : > { %v3903_v36 = vld [vmem:[#allocation2] sm:$0xf]  ;;  %v4920_v51 = vld [vmem:[#allocation2 + $0x4] sm:$0xf] }
 0x1b6   : > { %5186 = vst [vmem:[#allocation2 + $0x8] sm:$0xff] %v5154_v48  }
 0x1bd   : > { %v4921_v49 = vld [vmem:[#allocation2 + $0x4] sm:$0xf0]  ;;  %v3905_v54 = vld [vmem:[#allocation2 + $0x8] sm:$0xf0] }
 0x1be   : > { %v3904_v55 = vor.u32 %v4921_v49, %v3903_v36  ;;  %v3908_v56 = vor.u32 %v4920_v51, %v3905_v54 }
 0x1c0   : > { %1534 = vmatmul.bf16.vlgmr.msra.gmra.mxu1 %v3904_v55  ;;  %1548 = vmatmul.bf16.vlgmr.msra.gmra.mxu2 %v3908_v56 }
 0x1c1   : > { %1562 = vmatmul.bf16.vlgmr.msra.gmra.mxu3 %v3904_v55  ;;  %1576 = vmatmul.bf16.vlgmr.msrb.gmra.mxu0 %v3908_v56 }
 0x1c2   : > { %1804 = vmatpush.bf16.msra.mxu1 %v4993_v57 }
 0x1c6   : > { %1805 = vmatpush.bf16.msra.mxu1 %v4992_v58 }
 0x1ca   : > { %1806 = vmatpush.bf16.msra.mxu1 %v4991_v60 }
 0x1ce   : > { %1807 = vmatpush.bf16.msra.mxu1 %v4990_v4 }
 0x1d0   : > { %1590 = vmatmul.bf16.vlgmr.msrb.gmra.mxu1 %v3904_v55  ;;  %1604 = vmatmul.bf16.vlgmr.msrb.gmra.mxu2 %v3908_v56 }
 0x1d1   : > { %1618 = vmatmul.bf16.vlgmr.msrb.gmra.mxu3 %v3904_v55  ;;  %1632 = vmatmul.bf16.vlgmr.msra.gmra.mxu0 %v3908_v56 }
 0x1d2   : > { %1808 = vmatpush.bf16.msra.mxu1 %v4989_v9 }
 0x1d6   : > { %1809 = vmatpush.bf16.msra.mxu1 %v4988_v18 }
 0x1da   : > { %1810 = vmatpush.bf16.msra.mxu1 %v4987_v26 }
 0x1de   : > { %1811 = vmatpush.bf16.msra.mxu1 %v4986_v29 }
 0x23d   : > { %v1535_v59 = vpop.f32.mrf.mxu1 }
 0x23e   : > { %v1577_v61 = vpop.f32.mrf.mxu0 }
 0x243   : > { %v1549_v63 = vpop.f32.mrf.mxu2 }
 0x244   : > { %v1550_v0 = vadd.f32 %v1549_v63, %v1535_v59  ;;  %v1563_v2 = vpop.f32.mrf.mxu3  ;;  %v3899_v59 = vld [vmem:[%s5592_s17 + $0x70] sm:$0xff] }
 0x245   : > { %v1578_v3 = vadd.f32 %v1577_v61, %v1563_v2  ;;  %v1537_v10 = vpop.f32.mrf.mxu1 }
 0x246   : > { %v1638_v5 = vadd.f32 %v3893_v62, %v1550_v0  ;;  %v1579_v13 = vpop.f32.mrf.mxu0 }
 0x247   : > { %v1639_v6 = vadd.f32 %v3894_v1, %v1578_v3 }
 0x248   : > { %v4165_v7 = vmul.f32 -1.442695, %v1638_v5 }
 0x249   : > { %v4167_v8 = vmul.f32 -1.442695, %v1639_v6 }
 0x24a   : > { %5284 = vpow2.f32 %v4165_v7 }
 0x24b   : > { %5286 = vpow2.f32 %v4167_v8  ;;  %v1551_v12 = vpop.f32.mrf.mxu2 }
 0x24c   : > { %v1552_v14 = vadd.f32 %v1551_v12, %v1537_v10  ;;  %v1565_v16 = vpop.f32.mrf.mxu3 }
 0x24d   : > { %v1580_v17 = vadd.f32 %v1579_v13, %v1565_v16  ;;  %v1591_v30 = vpop.f32.mrf.mxu1 }
 0x24e   : > { %v1642_v19 = vadd.f32 %v3897_v11, %v1552_v14 }
 0x24f   : > { %v1643_v20 = vadd.f32 %v3898_v15, %v1580_v17 }
 0x250   : > { %v5285_v21 = vpop.eup %5284  ;;  %v4166_v22 = vmul.f32 -1.442695, %v1642_v19 }
 0x251   : > { %v5287_v23 = vpop.eup %5286  ;;  %v1652_v24 = vadd.f32 1.0, %v5285_v21  ;;  %v4168_v25 = vmul.f32 -1.442695, %v1643_v20 }
 0x252   : > { %v1690_v27 = vadd.f32 1.0, %v5287_v23  ;;  %5288 = vpow2.f32 %v4166_v22 }
 0x253   : > { %5290 = vrcp.f32 %v1652_v24  ;;  %v1605_v28 = vpop.f32.mrf.mxu2  ;;  %v1665_v50 = vand.u32 2147483648, %v1652_v24  ;;  %v1663_v53 = vand.u32 2147483647, %v1652_v24  ;;  %vm1659_vm10 = vweird.f32 %v1652_v24 }
 0x254   : > { %5292 = vrcp.f32 %v1690_v27  ;;  %v1606_v31 = vadd.f32 %v1605_v28, %v1591_v30  ;;  %v1703_v48 = vand.u32 2147483648, %v1690_v27  ;;  %v1701_v49 = vand.u32 2147483647, %v1690_v27 }
 0x255   : > { %5294 = vpow2.f32 %v4168_v25  ;;  %v1593_v51 = vpop.f32.mrf.mxu1  ;;  %v1666_v57 = vor.u32 1.1754944e-38, %v1665_v50  ;;  %vm1697_vm12 = vweird.f32 %v1690_v27  ;;  %vm1664_vm13 = vcmp.eq.f32.partialorder %v1663_v53, 8.507059e+37  ;;  %v5022_v53 = vld [vmem:[%s7621_s3 + $0xcc] sm:$0xf0] }
 0x256   : > { %v1640_v37 = vadd.f32 %v3895_v32, %v1606_v31  ;;  %v1704_v62 = vor.u32 1.1754944e-38, %v1703_v48  ;;  %vm1702_vm15 = vcmp.eq.f32.partialorder %v1701_v49, 8.507059e+37  ;;  %v5054_v48 = vld [vmem:[%s7621_s3 + $0x1cc] sm:$0xf0]  ;;  %v4323_v49 = vld [vmem:[%s7621_s3 + $0xd0] sm:$0xf0] }
 0x258   : > { %v5289_v33 = vpop.eup %5288 }
 0x259   : > { %v5291_v34 = vpop.eup %5290  ;;  %v6532_v35 = vadd.f32 1.0, %v5289_v33  ;;  %v5026_v33 = vld [vmem:[%s7621_s3 + $0xec] sm:$0xf0] }
 0x25a   : > { %v5293_v38 = vpop.eup %5292  ;;  %v1655_v39 = vmul.f32 %v5291_v34, %v1652_v24  ;;  %vm1660_vm8 = vweird.f32 %v5291_v34 }
 0x25b   : > { %v5295_v41 = vpop.eup %5294  ;;  %v1693_v42 = vmul.f32 %v5293_v38, %v1690_v27  ;;  %5296 = vrcp.f32 %v6532_v35  ;;  %v1607_v46 = vpop.f32.mrf.mxu2  ;;  %vm1698_vm9 = vweird.f32 %v5293_v38  ;;  %vm1661_vm11 = vmor %vm1659_vm10, %vm1660_vm8  ;;  %v1680_v7 = vand.u32 2147483648, %v6532_v35 }
 0x25c   : > { %v1656_v43 = vsub.f32 1.0, %v1655_v39  ;;  %v6535_v44 = vadd.f32 1.0, %v5295_v41  ;;  %5298 = vtanh.f32 %v1640_v37  ;;  %v1608_v55 = vadd.f32 %v1607_v46, %v1593_v51  ;;  %vm1699_vm14 = vmor %vm1697_vm12, %vm1698_vm9  ;;  %v5058_v37 = vld [vmem:[%s7621_s3 + $0x1ec] sm:$0xf0]  ;;  %v4339_v39 = vld [vmem:[%s7621_s3 + $0xf0] sm:$0xf0] }
 0x25d   : > { %v1694_v45 = vsub.f32 1.0, %v1693_v42  ;;  %v1678_v11 = vand.u32 2147483647, %v6532_v35  ;;  %vm1674_vm1 = vweird.f32 %v6532_v35  ;;  %v4449_v46 = vld [vmem:[%s7621_s3 + $0x1c0] sm:$0xf] }
 0x25e   : > { %v1657_v47 = vmul.f32 %v5291_v34, %v1656_v43  ;;  %5300 = vrcp.f32 %v6535_v44  ;;  %v1644_v6 = vadd.f32 %v3899_v59, %v1608_v55  ;;  %v1718_v15 = vand.u32 2147483648, %v6535_v44  ;;  %v5056_v43 = vld [vmem:[%s7621_s3 + $0x1e4] sm:$0xf]  ;;  %v5018_v59 = vld [vmem:[%s7621_s3 + $0xac] sm:$0xf0] }
 0x25f   : > { %v1695_v36 = vmul.f32 %v5293_v38, %v1694_v45  ;;  %v1716_v17 = vand.u32 2147483647, %v6535_v44  ;;  %vm1679_vm4 = vcmp.eq.f32.partialorder %v1678_v11, 8.507059e+37  ;;  %vm1712_vm5 = vweird.f32 %v6535_v44  ;;  %v4321_v45 = vld [vmem:[%s7621_s3 + $0xc0] sm:$0xf] }
 0x260   : > { %v1658_v54 = vadd.f32 %v5291_v34, %v1657_v47  ;;  %5302 = vtanh.f32 %v1644_v6  ;;  %v1719_v21 = vor.u32 1.1754944e-38, %v1718_v15  ;;  %v4322_v47 = vor.u32 %v5022_v53, %v4321_v45  ;;  %v5052_v55 = vld [vmem:[%s7621_s3 + $0x1c4] sm:$0xf]  ;;  %v4289_v6 = vld [vmem:[%s7621_s3 + $0x80] sm:$0xf] }
 0x261   : > { %v5297_v56 = vpop.eup %5296  ;;  %v1696_v58 = vadd.f32 %v5293_v38, %v1695_v36  ;;  %vm1717_vm7 = vcmp.eq.f32.partialorder %v1716_v17, 8.507059e+37  ;;  %v5020_v36 = vld [vmem:[%s7621_s3 + $0xc4] sm:$0xf]  ;;  %v4450_v51 = vor.u32 %v5054_v48, %v4449_v46  ;;  %v1619_v17 = vpop.f32.mrf.mxu3  ;;  %v4387_v45 = vld [vmem:[%s7621_s3 + $0x150] sm:$0xf0] }
 0x262   : > { %v1670_v60 = vmul.f32 %v5297_v56, %v6532_v35  ;;  %v1662_v61 = vsel %vm1661_vm11, %v5291_v34, %v1658_v54  ;;  %v5299_v63 = vpop.eup %5298  ;;  %vm1675_vm0 = vweird.f32 %v5297_v56  ;;  %v4465_v34 = vld [vmem:[%s7621_s3 + $0x1e0] sm:$0xf]  ;;  %v4326_v54 = vor.u32 %v5020_v36, %v4323_v49  ;;  %v5012_v11 = vld [vmem:[%s7621_s3 + $0x84] sm:$0xf]  ;;  %v5002_v48 = vld [vmem:[%s7621_s3 + $0x2c] sm:$0xf0] }
 0x263   : > { %v1667_v0 = vsel %vm1664_vm13, %v1666_v57, %v1662_v61  ;;  %v1700_v1 = vsel %vm1699_vm14, %v5293_v38, %v1696_v58  ;;  %vm1676_vm2 = vmor %vm1674_vm1, %vm1675_vm0  ;;  %v5024_v38 = vld [vmem:[%s7621_s3 + $0xe4] sm:$0xf]  ;;  %v4466_v41 = vor.u32 %v5058_v37, %v4465_v34  ;;  %v4305_v58 = vld [vmem:[%s7621_s3 + $0xa0] sm:$0xf] }
 0x264   : > { %v5301_v2 = vpop.eup %5300  ;;  %v1671_v3 = vsub.f32 1.0, %v1670_v60  ;;  %v1705_v4 = vsel %vm1702_vm15, %v1704_v62, %v1700_v1  ;;  %v1726_v5 = vmul.f32 %v1667_v0, %v6070_v40  ;;  %v1681_v40 = vor.u32 1.1754944e-38, %v1680_v7  ;;  %v4433_v60 = vld [vmem:[%s7621_s3 + $0x1a0] sm:$0xf]  ;;  %v5050_v62 = vld [vmem:[%s7621_s3 + $0x1ac] sm:$0xf0] }
 0x265   : > { %v1708_v8 = vmul.f32 %v5301_v2, %v6535_v44  ;;  %v1728_v9 = vmul.f32 %v5299_v63, %v1705_v4  ;;  %vm1713_vm3 = vweird.f32 %v5301_v2  ;;  %v4342_v42 = vor.u32 %v5024_v38, %v4339_v39  ;;  %v4467_v44 = vld [vmem:[%s7621_s3 + $0x1f0] sm:$0xf0]  ;;  %2295 = vmatpush.bf16.msra.mxu3 %v4466_v41  ;;  %v5016_v63 = vld [vmem:[%s7621_s3 + $0xa4] sm:$0xf]  ;;  %v5014_v7 = vld [vmem:[%s7621_s3 + $0x8c] sm:$0xf0] }
 0x266   : > { %v1672_v10 = vmul.f32 %v5297_v56, %v1671_v3  ;;  %vm1714_vm6 = vmor %vm1712_vm5, %vm1713_vm3  ;;  %v5303_v24 = vpop.eup %5302  ;;  %v4470_v50 = vor.u32 %v5056_v43, %v4467_v44  ;;  %v4306_v61 = vor.u32 %v5018_v59, %v4305_v58  ;;  %v4307_v0 = vld [vmem:[%s7621_s3 + $0xb0] sm:$0xf0]  ;;  %v4434_v1 = vor.u32 %v5050_v62, %v4433_v60  ;;  %v5048_v3 = vld [vmem:[%s7621_s3 + $0x1a4] sm:$0xf] }
 0x267   : > { %v1709_v12 = vsub.f32 1.0, %v1708_v8  ;;  %v6545_v13 = vadd.f32 %v1728_v9, %v1726_v5  ;;  %2309 = vmatpush.bf16.msrb.mxu0 %v4342_v42  ;;  %v4435_v4 = vld [vmem:[%s7621_s3 + $0x1b0] sm:$0xf0]  ;;  %v4417_v8 = vld [vmem:[%s7621_s3 + $0x180] sm:$0xf]  ;;  %v4290_v9 = vor.u32 %v5014_v7, %v4289_v6 }
 0x268   : > { %v1673_v14 = vadd.f32 %v5297_v56, %v1672_v10  ;;  %2323 = vmatpush.bf16.msrb.mxu1 %v4470_v50  ;;  %v4438_v5 = vor.u32 %v5048_v3, %v4435_v4  ;;  %v5046_v10 = vld [vmem:[%s7621_s3 + $0x18c] sm:$0xf0]  ;;  %v4257_v34 = vld [vmem:[%s7621_s3 + $0x40] sm:$0xf]  ;;  %v5004_v41 = vld [vmem:[%s7621_s3 + $0x44] sm:$0xf] }
 0x269   : > { %4205 = vst [vmem:[%s5596_s19 + $0x10] sm:$0xff] %v6545_v13  ;;  %v1710_v16 = vmul.f32 %v5301_v2, %v1709_v12  ;;  %v1732_v28 = vpack.c.bf16 %v6545_v13, %v6545_v13  ;;  %2296 = vmatpush.bf16.msra.mxu3 %v4450_v51  ;;  %v4291_v12 = vld [vmem:[%s7621_s3 + $0x90] sm:$0xf0]  ;;  %v4385_v37 = vld [vmem:[%s7621_s3 + $0x140] sm:$0xf]  ;;  %v1621_v49 = vpop.f32.mrf.mxu3 }
 0x26a   : > { %v1677_v18 = vsel %vm1676_vm2, %v5297_v56, %v1673_v14  ;;  %v4451_v56 = vld [vmem:[%s7621_s3 + $0x1d0] sm:$0xf0]  ;;  %v4418_v14 = vor.u32 %v5046_v10, %v4417_v8  ;;  %v4294_v15 = vor.u32 %v5012_v11, %v4291_v12  ;;  %v5038_v39 = vld [vmem:[%s7621_s3 + $0x14c] sm:$0xf0]  ;;  %v5036_v50 = vld [vmem:[%s7621_s3 + $0x144] sm:$0xf] }
 0x26b   : > { %v1682_v19 = vsel %vm1679_vm4, %v1681_v40, %v1677_v18  ;;  %v1711_v20 = vadd.f32 %v5301_v2, %v1710_v16  ;;  %v1752_v30 = vunpack.c.l.b16 %v1732_v28  ;;  %v4454_v57 = vor.u32 %v5052_v55, %v4451_v56  ;;  %2310 = vmatpush.bf16.msrb.mxu0 %v4326_v54  ;;  %v5044_v40 = vld [vmem:[%s7621_s3 + $0x184] sm:$0xf]  ;;  %v4419_v16 = vld [vmem:[%s7621_s3 + $0x190] sm:$0xf0]  ;;  %v4369_v36 = vld [vmem:[%s7621_s3 + $0x120] sm:$0xf] }
 0x26c   : > { %v1727_v23 = vmul.f32 %v1682_v19, %v6076_v52  ;;  %v4337_v52 = vld [vmem:[%s7621_s3 + $0xe0] sm:$0xf]  ;;  %v4422_v18 = vor.u32 %v5044_v40, %v4419_v16  ;;  %v4259_v42 = vld [vmem:[%s7621_s3 + $0x50] sm:$0xf0]  ;;  %v4386_v43 = vor.u32 %v5038_v39, %v4385_v37  ;;  %v4390_v53 = vor.u32 %v5036_v50, %v4387_v45  ;;  %v5034_v55 = vld [vmem:[%s7621_s3 + $0x12c] sm:$0xf0] }
 0x26d   : > { %v1715_v22 = vsel %vm1714_vm6, %v5301_v2, %v1711_v20  ;;  %v4338_v35 = vor.u32 %v5026_v33, %v4337_v52  ;;  %2324 = vmatpush.bf16.msrb.mxu1 %v4454_v57  ;;  %v4310_v2 = vor.u32 %v5016_v63, %v4307_v0  ;;  %2297 = vmatpush.bf16.msra.mxu3 %v4434_v1  ;;  %v4273_v19 = vld [vmem:[%s7621_s3 + $0x60] sm:$0xf]  ;;  %v5010_v20 = vld [vmem:[%s7621_s3 + $0x6c] sm:$0xf0]  ;;  %v5000_v56 = vld [vmem:[%s7621_s3 + $0x24] sm:$0xf] }
 0x26e   : > { %v1720_v25 = vsel %vm1717_vm7, %v1719_v21, %v1715_v22  ;;  %v4401_v21 = vld [vmem:[%s7621_s3 + $0x160] sm:$0xf]  ;;  %v1633_v22 = vpop.f32.mrf.mxu0  ;;  %v4262_v44 = vor.u32 %v5004_v41, %v4259_v42  ;;  %v4243_v57 = vld [vmem:[%s7621_s3 + $0x30] sm:$0xf0]  ;;  %v4370_v59 = vor.u32 %v5034_v55, %v4369_v36  ;;  %v3900_v0 = vld [vmem:[%s5592_s17 + $0x78] sm:$0xff] }
 0x26f   : > { %v1729_v26 = vmul.f32 %v5303_v24, %v1720_v25  ;;  %2281 = vmatpush.bf16.msra.mxu2 %v4338_v35  ;;  %2311 = vmatpush.bf16.msrb.mxu0 %v4310_v2  ;;  %v5042_v24 = vld [vmem:[%s7621_s3 + $0x16c] sm:$0xf0]  ;;  %v5008_v25 = vld [vmem:[%s7621_s3 + $0x64] sm:$0xf]  ;;  %v1634_v33 = vadd.f32 %v1633_v22, %v1619_v17  ;;  %v4246_v60 = vor.u32 %v5000_v56, %v4243_v57  ;;  %v4371_v62 = vld [vmem:[%s7621_s3 + $0x130] sm:$0xf0] }
 0x270   : > { %v4402_v28 = vor.u32 %v5042_v24, %v4401_v21  ;;  %v5006_v35 = vld [vmem:[%s7621_s3 + $0x4c] sm:$0xf0]  ;;  %v4225_v4 = vld [vmem:[%s7621_s3] sm:$0xf]  ;;  %v4227_v11 = vld [vmem:[%s7621_s3 + $0x10] sm:$0xf0] }
 0x271   : > { %v6554_v27 = vadd.f32 %v1729_v26, %v1727_v23  ;;  %2325 = vmatpush.bf16.msrb.mxu1 %v4438_v5  ;;  %2298 = vmatpush.bf16.msra.mxu3 %v4418_v14  ;;  %v4274_v23 = vor.u32 %v5010_v20, %v4273_v19  ;;  %v4275_v26 = vld [vmem:[%s7621_s3 + $0x70] sm:$0xf0]  ;;  %v4258_v38 = vor.u32 %v5006_v35, %v4257_v34  ;;  %v4998_v5 = vld [vmem:[%s7621_s3 + $0xc] sm:$0xf0]  ;;  %v4353_v7 = vld [vmem:[%s7621_s3 + $0x100] sm:$0xf] }
 0x272   : > { %v4226_v6 = vor.u32 %v4998_v5, %v4225_v4  ;;  %v5030_v8 = vld [vmem:[%s7621_s3 + $0x10c] sm:$0xf0]  ;;  %v5028_v12 = vld [vmem:[%s7621_s3 + $0x104] sm:$0xf]  ;;  %v4355_v14 = vld [vmem:[%s7621_s3 + $0x110] sm:$0xf0] }
 0x273   : > { %4206 = vst [vmem:[%s5596_s19 + $0x18] sm:$0xff] %v6554_v27  ;;  %v1733_v29 = vpack.c.bf16 %v6554_v27, %v6554_v27  ;;  %2282 = vmatpush.bf16.msra.mxu2 %v4322_v47  ;;  %2312 = vmatpush.bf16.msrb.mxu0 %v4294_v15  ;;  %v4241_v47 = vld [vmem:[%s7621_s3 + $0x20] sm:$0xf]  ;;  %v4354_v10 = vor.u32 %v5030_v8, %v4353_v7  ;;  %v4345_v16 = vld [vmem:[%s7621_s3 + $0xe8] sm:$0xf] }
 0x274   : > { %v4242_v54 = vor.u32 %v5002_v48, %v4241_v47  ;;  %v4358_v40 = vor.u32 %v5028_v12, %v4355_v14  ;;  %v5027_v17 = vld [vmem:[%s7621_s3 + $0xf4] sm:$0xf0]  ;;  %v5025_v22 = vld [vmem:[%s7621_s3 + $0xec] sm:$0xf]  ;;  %v4331_v39 = vld [vmem:[%s7621_s3 + $0xd8] sm:$0xf0] }
 0x275   : > { %v1753_v31 = vunpack.c.l.b16 %v1733_v29  ;;  %2326 = vmatpush.bf16.msrb.mxu1 %v4422_v18  ;;  %v4278_v29 = vor.u32 %v5008_v25, %v4275_v26  ;;  %2299 = vmatpush.bf16.msra.mxu3 %v4402_v28  ;;  %v4473_v18 = vld [vmem:[%s7621_s3 + $0x1e8] sm:$0xf]  ;;  %v4346_v20 = vor.u32 %v5027_v17, %v4345_v16  ;;  %v5059_v21 = vld [vmem:[%s7621_s3 + $0x1f4] sm:$0xf0]  ;;  %v5057_v28 = vld [vmem:[%s7621_s3 + $0x1ec] sm:$0xf] }
 0x276   : > { %v1635_v63 = vpop.f32.mrf.mxu0  ;;  %v4474_v25 = vor.u32 %v5059_v21, %v4473_v18  ;;  %v5055_v34 = vld [vmem:[%s7621_s3 + $0x1d4] sm:$0xf0]  ;;  %v5053_v41 = vld [vmem:[%s7621_s3 + $0x1cc] sm:$0xf]  ;;  %v4459_v50 = vld [vmem:[%s7621_s3 + $0x1d8] sm:$0xf0] }
 0x277   : > { %v1754_v32 = vpack.c.b16 %v1753_v31, %v1752_v30  ;;  %2283 = vmatpush.bf16.msra.mxu2 %v4306_v61  ;;  %v5040_v30 = vld [vmem:[%s7621_s3 + $0x164] sm:$0xf]  ;;  %v4403_v31 = vld [vmem:[%s7621_s3 + $0x170] sm:$0xf0]  ;;  %2313 = vmatpush.bf16.msrb.mxu0 %v4278_v29  ;;  %v1636_v2 = vadd.f32 %v1635_v63, %v1621_v49  ;;  %v4475_v29 = vld [vmem:[%s7621_s3 + $0x1f8] sm:$0xf0] }
 0x278   : > { %v4406_v52 = vor.u32 %v5040_v30, %v4403_v31  ;;  %v5032_v61 = vld [vmem:[%s7621_s3 + $0x124] sm:$0xf]  ;;  %v4329_v30 = vld [vmem:[%s7621_s3 + $0xc8] sm:$0xf]  ;;  %v5019_v47 = vld [vmem:[%s7621_s3 + $0xb4] sm:$0xf0] }
 0x279   : > { %1812 = vmatmul.bf16.vlgmr.msra.gmra.mxu1 %v1754_v32  ;;  %v3896_v32 = vld [vmem:[%s5592_s17 + $0x58] sm:$0xff]  ;;  %2300 = vmatpush.bf16.msra.mxu3 %v4386_v43  ;;  %v4374_v1 = vor.u32 %v5032_v61, %v4371_v62  ;;  %v1645_v19 = vadd.f32 %v3900_v0, %v1636_v2  ;;  %v4313_v45 = vld [vmem:[%s7621_s3 + $0xa8] sm:$0xf]  ;;  %v5049_v55 = vld [vmem:[%s7621_s3 + $0x1ac] sm:$0xf] }
 0x27a   : > { %2327 = vmatpush.bf16.msrb.mxu1 %v4406_v52  ;;  %v1641_v46 = vadd.f32 %v3896_v32, %v1634_v33  ;;  %v4478_v32 = vor.u32 %v5057_v28, %v4475_v29  ;;  %v5023_v52 = vld [vmem:[%s7621_s3 + $0xd4] sm:$0xf0]  ;;  %v4457_v33 = vld [vmem:[%s7621_s3 + $0x1c8] sm:$0xf]  ;;  %v4314_v36 = vor.u32 %v5019_v47, %v4313_v45  ;;  %v4299_v2 = vld [vmem:[%s7621_s3 + $0x98] sm:$0xf0] }
 0x27b   : > { %2284 = vmatpush.bf16.msra.mxu2 %v4290_v9  ;;  %2314 = vmatpush.bf16.msrb.mxu0 %v4262_v44  ;;  %v4996_v9 = vld [vmem:[%s7621_s3 + $0x4] sm:$0xf]  ;;  %v4330_v35 = vor.u32 %v5023_v52, %v4329_v30  ;;  %v4458_v37 = vor.u32 %v5055_v34, %v4457_v33  ;;  %v4441_v48 = vld [vmem:[%s7621_s3 + $0x1a8] sm:$0xf]  ;;  %v5051_v49 = vld [vmem:[%s7621_s3 + $0x1b4] sm:$0xf0] }
 0x27c   : > { %v4230_v15 = vor.u32 %v4996_v9, %v4227_v11  ;;  %v4442_v56 = vor.u32 %v5051_v49, %v4441_v48  ;;  %v4425_v62 = vld [vmem:[%s7621_s3 + $0x188] sm:$0xf]  ;;  %v5047_v63 = vld [vmem:[%s7621_s3 + $0x194] sm:$0xf0]  ;;  %v4251_v49 = vld [vmem:[%s7621_s3 + $0x38] sm:$0xf0] }
 0x27d   : > { %2301 = vmatpush.bf16.msra.mxu3 %v4370_v59  ;;  %v4297_v59 = vld [vmem:[%s7621_s3 + $0x88] sm:$0xf]  ;;  %v4426_v4 = vor.u32 %v5047_v63, %v4425_v62  ;;  %v5043_v18 = vld [vmem:[%s7621_s3 + $0x174] sm:$0xf0] }
 0x27e   : > { %2328 = vmatpush.bf16.msrb.mxu1 %v4390_v53  ;;  %v4281_v14 = vld [vmem:[%s7621_s3 + $0x68] sm:$0xf]  ;;  %v5035_v48 = vld [vmem:[%s7621_s3 + $0x134] sm:$0xf0] }
 0x27f   : > { %2285 = vmatpush.bf16.msra.mxu2 %v4274_v23  ;;  %2315 = vmatpush.bf16.msrb.mxu0 %v4246_v60  ;;  %v4347_v23 = vld [vmem:[%s7621_s3 + $0xf8] sm:$0xf0]  ;;  %v5015_v60 = vld [vmem:[%s7621_s3 + $0x94] sm:$0xf0]  ;;  %v4409_v17 = vld [vmem:[%s7621_s3 + $0x168] sm:$0xf] }
 0x280   : > { %v4350_v26 = vor.u32 %v5025_v22, %v4347_v23  ;;  %v4298_v0 = vor.u32 %v5015_v60, %v4297_v59  ;;  %v4410_v22 = vor.u32 %v5043_v18, %v4409_v17  ;;  %v4393_v34 = vld [vmem:[%s7621_s3 + $0x148] sm:$0xf] }
 0x281   : > { %2302 = vmatpush.bf16.msra.mxu3 %v4354_v10  ;;  %v4249_v45 = vld [vmem:[%s7621_s3 + $0x28] sm:$0xf] }
 0x282   : > { %2329 = vmatpush.bf16.msrb.mxu1 %v4374_v1  ;;  %v5013_v1 = vld [vmem:[%s7621_s3 + $0x8c] sm:$0xf]  ;;  %v4233_v63 = vld [vmem:[%s7621_s3 + $0x8] sm:$0xf] }
 0x283   : > { %2286 = vmatpush.bf16.msra.mxu2 %v4258_v38  ;;  %2316 = vmatpush.bf16.msrb.mxu0 %v4230_v15  ;;  %v5021_v38 = vld [vmem:[%s7621_s3 + $0xcc] sm:$0xf]  ;;  %v4302_v5 = vor.u32 %v5013_v1, %v4299_v2  ;;  %v5011_v15 = vld [vmem:[%s7621_s3 + $0x74] sm:$0xf0]  ;;  %v4361_v1 = vld [vmem:[%s7621_s3 + $0x108] sm:$0xf] }
 0x284   : > { %v4334_v44 = vor.u32 %v5021_v38, %v4331_v39  ;;  %v4282_v16 = vor.u32 %v5011_v15, %v4281_v14  ;;  %v4267_v39 = vld [vmem:[%s7621_s3 + $0x58] sm:$0xf0] }
 0x285   : > { %2351 = vmatpush.bf16.msrb.mxu3 %v4474_v25  ;;  %v4411_v25 = vld [vmem:[%s7621_s3 + $0x178] sm:$0xf0] }
 0x286   : > { %2330 = vmatpush.bf16.msrb.mxu1 %v4358_v40 }
 0x287   : > { %2287 = vmatpush.bf16.msra.mxu2 %v4242_v54  ;;  %2365 = vmatpush.bf16.msra.mxu0 %v4350_v26  ;;  %v4315_v54 = vld [vmem:[%s7621_s3 + $0xb8] sm:$0xf0] }
 0x289   : > { %2352 = vmatpush.bf16.msrb.mxu3 %v4458_v37  ;;  %v5005_v37 = vld [vmem:[%s7621_s3 + $0x4c] sm:$0xf] }
 0x28a   : > { %2379 = vmatpush.bf16.msra.mxu1 %v4478_v32  ;;  %v5007_v32 = vld [vmem:[%s7621_s3 + $0x54] sm:$0xf0] }
 0x28b   : > { %2288 = vmatpush.bf16.msra.mxu2 %v4226_v6  ;;  %2366 = vmatpush.bf16.msra.mxu0 %v4334_v44  ;;  %v4427_v6 = vld [vmem:[%s7621_s3 + $0x198] sm:$0xf0]  ;;  %v4270_v44 = vor.u32 %v5005_v37, %v4267_v39  ;;  %v5065_v37 = vld [vmem:[%s7609_s4 + $0x28] sm:$0xff] }
 0x28d   : > { %2353 = vmatpush.bf16.msrb.mxu3 %v4442_v56 }
 0x28f   : > { %2337 = vmatpush.bf16.msrb.mxu2 %v4346_v20  ;;  %v4283_v20 = vld [vmem:[%s7621_s3 + $0x78] sm:$0xf0] }
 0x291   : > { %2354 = vmatpush.bf16.msrb.mxu3 %v4426_v4 }
 0x293   : > { %2338 = vmatpush.bf16.msrb.mxu2 %v4330_v35  ;;  %v5039_v35 = vld [vmem:[%s7621_s3 + $0x154] sm:$0xf0] }
 0x294   : > { %v4394_v38 = vor.u32 %v5039_v35, %v4393_v34 }
 0x295   : > { %2355 = vmatpush.bf16.msrb.mxu3 %v4410_v22 }
 0x297   : > { %2339 = vmatpush.bf16.msrb.mxu2 %v4314_v36  ;;  %v5001_v36 = vld [vmem:[%s7621_s3 + $0x2c] sm:$0xf] }
 0x298   : > { %v4254_v62 = vor.u32 %v5001_v36, %v4251_v49  ;;  %v5063_v36 = vld [vmem:[%s7609_s4 + $0x18] sm:$0xff] }
 0x299   : > { %2356 = vmatpush.bf16.msrb.mxu3 %v4394_v38 }
 0x29b   : > { %2340 = vmatpush.bf16.msrb.mxu2 %v4298_v0  ;;  %v4999_v0 = vld [vmem:[%s7621_s3 + $0x14] sm:$0xf0] }
 0x29c   : > { %v4234_v15 = vor.u32 %v4999_v0, %v4233_v63  ;;  %v5061_v63 = vld [vmem:[%s7609_s4 + $0x8] sm:$0xff] }
 0x29f   : > { %2341 = vmatpush.bf16.msrb.mxu2 %v4282_v16 }
 0x2f6   : > { %v1813_v51 = vpop.f32.mrf.mxu1 }
 0x2f7   : > { %v1818_v58 = vadd.f32 %v1813_v51, %v1641_v46  ;;  %v4462_v46 = vor.u32 %v5053_v41, %v4459_v50  ;;  %v5017_v51 = vld [vmem:[%s7621_s3 + $0xac] sm:$0xf] }
 0x2f8   : > { %v4318_v57 = vor.u32 %v5017_v51, %v4315_v54  ;;  %v5037_v41 = vld [vmem:[%s7621_s3 + $0x14c] sm:$0xf] }
 0x2f9   : > { %v4201_v3 = vmul.f32 -1.442695, %v1818_v58  ;;  %2380 = vmatpush.bf16.msra.mxu1 %v4462_v46  ;;  %v4443_v58 = vld [vmem:[%s7621_s3 + $0x1b8] sm:$0xf0]  ;;  %v4377_v46 = vld [vmem:[%s7621_s3 + $0x128] sm:$0xf] }
 0x2fa   : > { %v4446_v61 = vor.u32 %v5049_v55, %v4443_v58  ;;  %2367 = vmatpush.bf16.msra.mxu0 %v4318_v57  ;;  %v5033_v57 = vld [vmem:[%s7621_s3 + $0x12c] sm:$0xf]  ;;  %v4379_v58 = vld [vmem:[%s7621_s3 + $0x138] sm:$0xf0] }
 0x2fb   : > { %5304 = vpow2.f32 %v4201_v3  ;;  %v5045_v3 = vld [vmem:[%s7621_s3 + $0x18c] sm:$0xf] }
 0x2fc   : > { %v4430_v9 = vor.u32 %v5045_v3, %v4427_v6  ;;  %v5031_v6 = vld [vmem:[%s7621_s3 + $0x114] sm:$0xf0] }
 0x2fd   : > { %2381 = vmatpush.bf16.msra.mxu1 %v4446_v61  ;;  %v4378_v61 = vor.u32 %v5035_v48, %v4377_v46  ;;  %v4212_v46 = vld [vmem:[%s5592_s17 + $0xa8] sm:$0xff] }
 0x2fe   : > { %v1815_v24 = vpop.f32.mrf.mxu1  ;;  %2368 = vmatpush.bf16.msra.mxu0 %v4302_v5  ;;  %v4382_v5 = vor.u32 %v5033_v57, %v4379_v58  ;;  %v4211_v57 = vld [vmem:[%s5592_s17 + $0xa0] sm:$0xff] }
 0x2ff   : > { %v1819_v31 = vadd.f32 %v1815_v24, %v1645_v19  ;;  %v5009_v19 = vld [vmem:[%s7621_s3 + $0x6c] sm:$0xf]  ;;  %2357 = vmatpush.bf16.msrb.mxu3 %v4378_v61 }
 0x300   : > { %v4286_v23 = vor.u32 %v5009_v19, %v4283_v20  ;;  %v5041_v24 = vld [vmem:[%s7621_s3 + $0x16c] sm:$0xf] }
 0x301   : > { %v5305_v42 = vpop.eup %5304  ;;  %v4202_v43 = vmul.f32 -1.442695, %v1819_v31  ;;  %2382 = vmatpush.bf16.msra.mxu1 %v4430_v9  ;;  %v4414_v30 = vor.u32 %v5041_v24, %v4411_v25  ;;  %v4265_v31 = vld [vmem:[%s7621_s3 + $0x48] sm:$0xf]  ;;  %v5029_v9 = vld [vmem:[%s7621_s3 + $0x10c] sm:$0xf] }
 0x302   : > { %v6807_v53 = vadd.f32 1.0, %v5305_v42  ;;  %v4266_v33 = vor.u32 %v5007_v32, %v4265_v31  ;;  %2369 = vmatpush.bf16.msra.mxu0 %v4286_v23  ;;  %v4395_v42 = vld [vmem:[%s7621_s3 + $0x158] sm:$0xf0]  ;;  %v5066_v32 = vld [vmem:[%s7609_s4 + $0x30] sm:$0xff] }
 0x303   : > { %5306 = vpow2.f32 %v4202_v43  ;;  %v4398_v50 = vor.u32 %v5037_v41, %v4395_v42  ;;  %v5067_v31 = vld [vmem:[%s7609_s4 + $0x38] sm:$0xff]  ;;  %v4207_v42 = vld [vmem:[%s5592_s17 + $0x80] sm:$0xff] }
 0x304   : > { %5308 = vrcp.f32 %v6807_v53  ;;  %v1837_v8 = vand.u32 2147483647, %v6807_v53  ;;  %v1839_v11 = vand.u32 2147483648, %v6807_v53  ;;  %vm1833_vm9 = vweird.f32 %v6807_v53  ;;  %2342 = vmatpush.bf16.msrb.mxu2 %v4266_v33  ;;  %v4208_v33 = vld [vmem:[%s5592_s17 + $0x88] sm:$0xff] }
 0x305   : > { %2383 = vmatpush.bf16.msra.mxu1 %v4414_v30 }
 0x306   : > { %vm6897_vm11 = vcmp.eq.f32.partialorder %v1837_v8, 8.507059e+37  ;;  %v1840_v29 = vor.u32 1.1754944e-38, %v1839_v11  ;;  %2370 = vmatpush.bf16.msra.mxu0 %v4270_v44  ;;  %v4235_v8 = vld [vmem:[%s7621_s3 + $0x18] sm:$0xf0]  ;;  %v5064_v44 = vld [vmem:[%s7609_s4 + $0x20] sm:$0xff] }
 0x309   : > { %v5307_v7 = vpop.eup %5306  ;;  %2384 = vmatpush.bf16.msra.mxu1 %v4398_v50 }
 0x30a   : > { %v6856_v10 = vpop.eup %5308  ;;  %v6859_v12 = vadd.f32 1.0, %v5307_v7  ;;  %v4997_v7 = vld [vmem:[%s7621_s3 + $0xc] sm:$0xf]  ;;  %2371 = vmatpush.bf16.msra.mxu0 %v4254_v62 }
 0x30b   : > { %v1829_v40 = vmul.f32 %v6856_v10, %v6807_v53  ;;  %vm1834_vm8 = vweird.f32 %v6856_v10  ;;  %v5003_v53 = vld [vmem:[%s7621_s3 + $0x34] sm:$0xf0]  ;;  %v4238_v16 = vor.u32 %v4997_v7, %v4235_v8 }
 0x30c   : > { %5310 = vrcp.f32 %v6859_v12  ;;  %vm6893_vm10 = vmor %vm1833_vm9, %vm1834_vm8  ;;  %v1852_v55 = vand.u32 2147483647, %v6859_v12  ;;  %v4250_v56 = vor.u32 %v5003_v53, %v4249_v45  ;;  %v1854_v4 = vand.u32 2147483648, %v6859_v12 }
 0x30d   : > { %v1830_v21 = vsub.f32 1.0, %v1829_v40  ;;  %5312 = vtanh.f32 %v6545_v13  ;;  %v4362_v40 = vor.u32 %v5031_v6, %v4361_v1  ;;  %vm1848_vm13 = vweird.f32 %v6859_v12  ;;  %2385 = vmatpush.bf16.msra.mxu1 %v4382_v5  ;;  %v4209_v6 = vld [vmem:[%s5592_s17 + $0x90] sm:$0xff] }
 0x30e   : > { %5314 = vtanh.f32 %v6554_v27  ;;  %2343 = vmatpush.bf16.msrb.mxu2 %v4250_v56  ;;  %v1855_v19 = vor.u32 1.1754944e-38, %v1854_v4  ;;  %vm1853_vm15 = vcmp.eq.f32.partialorder %v1852_v55, 8.507059e+37  ;;  %2372 = vmatpush.bf16.msra.mxu0 %v4238_v16 }
 0x30f   : > { %v1831_v52 = vmul.f32 %v6856_v10, %v1830_v21  ;;  %2358 = vmatpush.bf16.msrb.mxu3 %v4362_v40 }
 0x311   : > { %v1832_v43 = vadd.f32 %v6856_v10, %v1831_v52 }
 0x312   : > { %v5311_v47 = vpop.eup %5310  ;;  %2344 = vmatpush.bf16.msrb.mxu2 %v4234_v15 }
 0x313   : > { %v1836_v51 = vsel %vm6893_vm10, %v6856_v10, %v1832_v43  ;;  %v1844_v54 = vmul.f32 %v5311_v47, %v6859_v12  ;;  %v5313_v59 = vpop.eup %5312  ;;  %v4363_v10 = vld [vmem:[%s7621_s3 + $0x118] sm:$0xf0]  ;;  %vm1849_vm12 = vweird.f32 %v5311_v47 }
 0x314   : > { %v1841_v60 = vsel %vm6897_vm11, %v1840_v29, %v1836_v51  ;;  %v4366_v18 = vor.u32 %v5029_v9, %v4363_v10  ;;  %vm1850_vm14 = vmor %vm1848_vm13, %vm1849_vm12  ;;  %v5315_v21 = vpop.eup %5314 }
 0x315   : > { %v1860_v2 = vmul.f32 %v5313_v59, %v1841_v60  ;;  %v1845_v3 = vsub.f32 1.0, %v1844_v54  ;;  %v5062_v59 = vld [vmem:[%s7609_s4 + $0x10] sm:$0xff] }
 0x316   : > { %2386 = vmatpush.bf16.msra.mxu1 %v4366_v18 }
 0x317   : > { %v5159_v11 = vpack.c.bf16 %v6545_v13, %v1860_v2  ;;  %4203 = vst [vmem:[%s5594_s18 + $0x10] sm:$0xff] %v1860_v2  ;;  %v1846_v14 = vmul.f32 %v5311_v47, %v1845_v3  ;;  %v5060_v3 = vld [vmem:[%s7609_s4] sm:$0xff] }
 0x319   : > { %5160 = vst [vmem:[#allocation2] sm:$0xff] %v5159_v11   ;;  %v1847_v17 = vadd.f32 %v5311_v47, %v1846_v14 }
 0x31b   : > { %v1851_v20 = vsel %vm1850_vm14, %v5311_v47, %v1847_v17 }
 0x31c   : > { %v1856_v22 = vsel %vm1853_vm15, %v1855_v19, %v1851_v20 }
 0x31d   : > { %v1861_v23 = vmul.f32 %v5315_v21, %v1856_v22 }
 0x31f   : > { %v5164_v24 = vpack.c.bf16 %v6554_v27, %v1861_v23  ;;  %4204 = vst [vmem:[%s5594_s18 + $0x18] sm:$0xff] %v1861_v23 }
 0x320   : > { %v4217_v25 = vld [vmem:[#allocation2] sm:$0xf]  ;;  %v4994_v12 = vld [vmem:[#allocation2 + $0x4] sm:$0xf] }
 0x321   : > { %5187 = vst [vmem:[#allocation2 + $0x8] sm:$0xff] %v5164_v24  }
 0x328   : > { %v4995_v26 = vld [vmem:[#allocation2 + $0x4] sm:$0xf0]  ;;  %v4219_v28 = vld [vmem:[#allocation2 + $0x8] sm:$0xf0] }
 0x329   : > { %v4218_v29 = vor.u32 %v4995_v26, %v4217_v25  ;;  %v4222_v30 = vor.u32 %v4994_v12, %v4219_v28  ;;  %v4213_v12 = vld [vmem:[%s5592_s17 + $0xb0] sm:$0xff] }
 0x32b   : > { %2289 = vmatmul.bf16.vlgmr.msra.gmra.mxu2 %v4218_v29  ;;  %2303 = vmatmul.bf16.vlgmr.msra.gmra.mxu3 %v4222_v30 }
 0x32c   : > { %2317 = vmatmul.bf16.vlgmr.msrb.gmra.mxu0 %v4218_v29  ;;  %2331 = vmatmul.bf16.vlgmr.msrb.gmra.mxu1 %v4222_v30 }
 0x32d   : > { %2559 = vmatpush.bf16.msra.mxu2 %v5067_v31 }
 0x331   : > { %2560 = vmatpush.bf16.msra.mxu2 %v5066_v32 }
 0x335   : > { %2561 = vmatpush.bf16.msra.mxu2 %v5065_v37 }
 0x339   : > { %2562 = vmatpush.bf16.msra.mxu2 %v5064_v44 }
 0x33b   : > { %2345 = vmatmul.bf16.vlgmr.msrb.gmra.mxu2 %v4218_v29  ;;  %2359 = vmatmul.bf16.vlgmr.msrb.gmra.mxu3 %v4222_v30 }
 0x33c   : > { %2373 = vmatmul.bf16.vlgmr.msra.gmra.mxu0 %v4218_v29  ;;  %2387 = vmatmul.bf16.vlgmr.msra.gmra.mxu1 %v4222_v30 }
 0x33d   : > { %2563 = vmatpush.bf16.msra.mxu2 %v5063_v36 }
 0x341   : > { %2564 = vmatpush.bf16.msra.mxu2 %v5062_v59 }
 0x345   : > { %2565 = vmatpush.bf16.msra.mxu2 %v5061_v63 }
 0x349   : > { %2566 = vmatpush.bf16.msra.mxu2 %v5060_v3 }
 0x3a9   : > { %v2318_v52 = vpop.f32.mrf.mxu0  ;;  %v2332_v34 = vpop.f32.mrf.mxu1 }
 0x3aa   : > { %v2333_v35 = vadd.f32 %v2332_v34, %v2318_v52 }
 0x3ac   : > { %v2394_v38 = vadd.f32 %v4208_v33, %v2333_v35 }
 0x3ae   : > { %v4481_v39 = vmul.f32 -1.442695, %v2394_v38  ;;  %v2290_v41 = vpop.f32.mrf.mxu2  ;;  %v2304_v43 = vpop.f32.mrf.mxu3 }
 0x3af   : > { %v2305_v50 = vadd.f32 %v2304_v43, %v2290_v41 }
 0x3b0   : > { %5316 = vpow2.f32 %v4481_v39 }
 0x3b1   : > { %v2393_v45 = vadd.f32 %v4207_v42, %v2305_v50  ;;  %v2320_v53 = vpop.f32.mrf.mxu0  ;;  %v2334_v47 = vpop.f32.mrf.mxu1 }
 0x3b2   : > { %v2335_v48 = vadd.f32 %v2334_v47, %v2320_v53 }
 0x3b3   : > { %v4479_v49 = vmul.f32 -1.442695, %v2393_v45 }
 0x3b4   : > { %v2398_v51 = vadd.f32 %v4212_v46, %v2335_v48 }
 0x3b5   : > { %5318 = vpow2.f32 %v4479_v49 }
 0x3b6   : > { %v5317_v54 = vpop.eup %5316  ;;  %v4482_v55 = vmul.f32 -1.442695, %v2398_v51  ;;  %v2292_v56 = vpop.f32.mrf.mxu2 }
 0x3b7   : > { %v2306_v58 = vpop.f32.mrf.mxu3  ;;  %v2445_v60 = vadd.f32 1.0, %v5317_v54 }
 0x3b8   : > { %v2307_v61 = vadd.f32 %v2306_v58, %v2292_v56  ;;  %5320 = vpow2.f32 %v4482_v55 }
 0x3b9   : > { %5322 = vrcp.f32 %v2445_v60  ;;  %v2458_v21 = vand.u32 2147483648, %v2445_v60  ;;  %vm2452_vm1 = vweird.f32 %v2445_v60  ;;  %v2456_v26 = vand.u32 2147483647, %v2445_v60 }
 0x3ba   : > { %v2397_v62 = vadd.f32 %v4211_v57, %v2307_v61 }
 0x3bb   : > { %v5319_v0 = vpop.eup %5318  ;;  %v2459_v35 = vor.u32 1.1754944e-38, %v2458_v21  ;;  %vm2457_vm5 = vcmp.eq.f32.partialorder %v2456_v26, 8.507059e+37  ;;  %v4635_v21 = vld [vmem:[%s7621_s3 + $0xc0] sm:$0xf]  ;;  %v5094_v26 = vld [vmem:[%s7621_s3 + $0xc4] sm:$0xf] }
 0x3bc   : > { %v4480_v1 = vmul.f32 -1.442695, %v2397_v62  ;;  %v2407_v2 = vadd.f32 1.0, %v5319_v0 }
 0x3be   : > { %5324 = vpow2.f32 %v4480_v1  ;;  %v5321_v4 = vpop.eup %5320  ;;  %v2346_v5 = vpop.f32.mrf.mxu2  ;;  %v2420_v29 = vand.u32 2147483648, %v2407_v2  ;;  %v2418_v31 = vand.u32 2147483647, %v2407_v2  ;;  %vm2414_vm4 = vweird.f32 %v2407_v2 }
 0x3bf   : > { %5326 = vrcp.f32 %v2407_v2  ;;  %v2360_v7 = vpop.f32.mrf.mxu3  ;;  %v5323_v8 = vpop.eup %5322  ;;  %v7018_v9 = vadd.f32 1.0, %v5321_v4 }
 0x3c0   : > { %v2361_v10 = vadd.f32 %v2360_v7, %v2346_v5  ;;  %v2448_v11 = vmul.f32 %v5323_v8, %v2445_v60  ;;  %vm2453_vm0 = vweird.f32 %v5323_v8  ;;  %v2421_v42 = vor.u32 1.1754944e-38, %v2420_v29 }
 0x3c1   : > { %5328 = vrcp.f32 %v7018_v9  ;;  %vm7027_vm2 = vmor %vm2452_vm1, %vm2453_vm0  ;;  %vm2419_vm7 = vcmp.eq.f32.partialorder %v2418_v31, 8.507059e+37  ;;  %vm2467_vm8 = vweird.f32 %v7018_v9  ;;  %v2473_v47 = vand.u32 2147483648, %v7018_v9  ;;  %v4765_v31 = vld [vmem:[%s7621_s3 + $0x1d0] sm:$0xf0] }
 0x3c2   : > { %v2395_v14 = vadd.f32 %v4209_v6, %v2361_v10  ;;  %v2449_v15 = vsub.f32 1.0, %v2448_v11  ;;  %v2471_v51 = vand.u32 2147483647, %v7018_v9  ;;  %v4779_v10 = vld [vmem:[%s7621_s3 + $0x1e0] sm:$0xf] }
 0x3c3   : > { %v2474_v59 = vor.u32 1.1754944e-38, %v2473_v47  ;;  %v2374_v47 = vpop.f32.mrf.mxu0 }
 0x3c4   : > { %v5325_v40 = vpop.eup %5324  ;;  %v2450_v18 = vmul.f32 %v5323_v8, %v2449_v15  ;;  %5330 = vtanh.f32 %v2395_v14  ;;  %vm2472_vm13 = vcmp.eq.f32.partialorder %v2471_v51, 8.507059e+37  ;;  %v5132_v14 = vld [vmem:[%s7621_s3 + $0x1ec] sm:$0xf0]  ;;  %v5098_v15 = vld [vmem:[%s7621_s3 + $0xe4] sm:$0xf] }
 0x3c5   : > { %v5327_v16 = vpop.eup %5326  ;;  %v7021_v17 = vadd.f32 1.0, %v5325_v40  ;;  %v4653_v40 = vld [vmem:[%s7621_s3 + $0xf0] sm:$0xf0] }
 0x3c6   : > { %v2410_v19 = vmul.f32 %v5327_v16, %v2407_v2  ;;  %v2451_v20 = vadd.f32 %v5323_v8, %v2450_v18  ;;  %v2348_v22 = vpop.f32.mrf.mxu2  ;;  %vm2415_vm3 = vweird.f32 %v5327_v16  ;;  %v5130_v18 = vld [vmem:[%s7621_s3 + $0x1e4] sm:$0xf]  ;;  %v4605_v51 = vld [vmem:[%s7621_s3 + $0x90] sm:$0xf0] }
 0x3c7   : > { %5332 = vrcp.f32 %v7021_v17  ;;  %v2362_v23 = vpop.f32.mrf.mxu3  ;;  %v5329_v24 = vpop.eup %5328  ;;  %vm2416_vm6 = vmor %vm2414_vm4, %vm2415_vm3  ;;  %v2435_v54 = vand.u32 2147483648, %v7021_v17  ;;  %v2433_v55 = vand.u32 2147483647, %v7021_v17  ;;  %vm2429_vm12 = vweird.f32 %v7021_v17 }
 0x3c8   : > { %v2411_v25 = vsub.f32 1.0, %v2410_v19  ;;  %v2363_v28 = vadd.f32 %v2362_v23, %v2348_v22  ;;  %v2463_v30 = vmul.f32 %v5329_v24, %v7018_v9  ;;  %v2455_v33 = vsel %vm7027_vm2, %v5323_v8, %v2451_v20  ;;  %v4651_v9 = vld [vmem:[%s7621_s3 + $0xe0] sm:$0xf]  ;;  %v4781_v19 = vld [vmem:[%s7621_s3 + $0x1f0] sm:$0xf0] }
 0x3c9   : > { %v2460_v43 = vsel %vm2457_vm5, %v2459_v35, %v2455_v33  ;;  %vm2468_vm9 = vweird.f32 %v5329_v24  ;;  %v2436_v61 = vor.u32 1.1754944e-38, %v2435_v54  ;;  %vm2434_vm15 = vcmp.eq.f32.partialorder %v2433_v55, 8.507059e+37  ;;  %v5096_v22 = vld [vmem:[%s7621_s3 + $0xcc] sm:$0xf0]  ;;  %v4763_v23 = vld [vmem:[%s7621_s3 + $0x1c0] sm:$0xf]  ;;  %v2388_v54 = vpop.f32.mrf.mxu1 }
 0x3ca   : > { %v2412_v52 = vmul.f32 %v5327_v16, %v2411_v25  ;;  %v2464_v34 = vsub.f32 1.0, %v2463_v30  ;;  %v2399_v37 = vadd.f32 %v4213_v12, %v2363_v28  ;;  %v5331_v38 = vpop.eup %5330  ;;  %vm2469_vm10 = vmor %vm2467_vm8, %vm2468_vm9  ;;  %v4784_v20 = vor.u32 %v5130_v18, %v4781_v19  ;;  %v5128_v25 = vld [vmem:[%s7621_s3 + $0x1cc] sm:$0xf0]  ;;  %v4637_v12 = vld [vmem:[%s7621_s3 + $0xd0] sm:$0xf0] }
 0x3cb   : > { %v2483_v49 = vmul.f32 %v5331_v38, %v2460_v43  ;;  %v4764_v28 = vor.u32 %v5128_v25, %v4763_v23  ;;  %v4640_v29 = vor.u32 %v5094_v26, %v4637_v12  ;;  %v5126_v30 = vld [vmem:[%s7621_s3 + $0x1c4] sm:$0xf]  ;;  %v5092_v33 = vld [vmem:[%s7621_s3 + $0xac] sm:$0xf0]  ;;  %v4555_v12 = vld [vmem:[%s7621_s3 + $0x20] sm:$0xf] }
 0x3cc   : > { %v2413_v39 = vadd.f32 %v5327_v16, %v2412_v52  ;;  %v2465_v44 = vmul.f32 %v5329_v24, %v2464_v34  ;;  %5334 = vtanh.f32 %v2399_v37  ;;  %3078 = vmatpush.bf16.msrb.mxu2 %v4784_v20  ;;  %v4768_v32 = vor.u32 %v5126_v30, %v4765_v31  ;;  %v4619_v52 = vld [vmem:[%s7621_s3 + $0xa0] sm:$0xf]  ;;  %v5124_v37 = vld [vmem:[%s7621_s3 + $0x1ac] sm:$0xf0]  ;;  %v5090_v38 = vld [vmem:[%s7621_s3 + $0xa4] sm:$0xf] }
 0x3cd   : > { %v5333_v41 = vpop.eup %5332  ;;  %v4747_v34 = vld [vmem:[%s7621_s3 + $0x1a0] sm:$0xf]  ;;  %v4620_v35 = vor.u32 %v5092_v33, %v4619_v52  ;;  %v5122_v43 = vld [vmem:[%s7621_s3 + $0x1a4] sm:$0xf]  ;;  %v4557_v33 = vld [vmem:[%s7621_s3 + $0x30] sm:$0xf0] }
 0x3ce   : > { %v2425_v50 = vmul.f32 %v5333_v41, %v7021_v17  ;;  %v2417_v45 = vsel %vm2416_vm6, %v5327_v16, %v2413_v39  ;;  %v2466_v46 = vadd.f32 %v5329_v24, %v2465_v44  ;;  %vm2430_vm11 = vweird.f32 %v5333_v41  ;;  %v4621_v39 = vld [vmem:[%s7621_s3 + $0xb0] sm:$0xf0]  ;;  %v5110_v20 = vld [vmem:[%s7621_s3 + $0x144] sm:$0xf] }
 0x3cf   : > { %v2422_v53 = vsel %vm2419_vm7, %v2421_v42, %v2417_v45  ;;  %vm2431_vm14 = vmor %vm2429_vm12, %vm2430_vm11  ;;  %v4780_v16 = vor.u32 %v5132_v14, %v4779_v10  ;;  %v4656_v17 = vor.u32 %v5098_v15, %v4653_v40  ;;  %v4624_v42 = vor.u32 %v5090_v38, %v4621_v39  ;;  %v4749_v44 = vld [vmem:[%s7621_s3 + $0x1b0] sm:$0xf0]  ;;  %v4603_v45 = vld [vmem:[%s7621_s3 + $0x80] sm:$0xf] }
 0x3d0   : > { %v2426_v48 = vsub.f32 1.0, %v2425_v50  ;;  %v2481_v36 = vmul.f32 %v2422_v53, %v6545_v13  ;;  %v2470_v58 = vsel %vm2469_vm10, %v5329_v24, %v2466_v46  ;;  %v4636_v24 = vor.u32 %v5096_v22, %v4635_v21  ;;  %3079 = vmatpush.bf16.msrb.mxu2 %v4768_v32  ;;  %v5088_v53 = vld [vmem:[%s7621_s3 + $0x8c] sm:$0xf0]  ;;  %v4731_v46 = vld [vmem:[%s7621_s3 + $0x180] sm:$0xf]  ;;  %v2376_v22 = vpop.f32.mrf.mxu0 }
 0x3d1   : > { %v2475_v62 = vsel %vm2472_vm13, %v2474_v59, %v2470_v58  ;;  %3050 = vmatpush.bf16.msrb.mxu0 %v4780_v16  ;;  %3064 = vmatpush.bf16.msrb.mxu1 %v4656_v17  ;;  %v4752_v50 = vor.u32 %v5122_v43, %v4749_v44  ;;  %v5118_v58 = vld [vmem:[%s7621_s3 + $0x184] sm:$0xf]  ;;  %v4733_v59 = vld [vmem:[%s7621_s3 + $0x190] sm:$0xf0]  ;;  %v4571_v10 = vld [vmem:[%s7621_s3 + $0x40] sm:$0xf]  ;;  %v2390_v25 = vpop.f32.mrf.mxu1 }
 0x3d2   : > { %v2427_v56 = vmul.f32 %v5333_v41, %v2426_v48  ;;  %v7040_v57 = vadd.f32 %v2483_v49, %v2481_v36  ;;  %v5335_v60 = vpop.eup %5334  ;;  %v4604_v48 = vor.u32 %v5088_v53, %v4603_v45  ;;  %v5120_v36 = vld [vmem:[%s7621_s3 + $0x18c] sm:$0xf0]  ;;  %v5086_v49 = vld [vmem:[%s7621_s3 + $0x84] sm:$0xf]  ;;  %v4699_v14 = vld [vmem:[%s7621_s3 + $0x140] sm:$0xf]  ;;  %v2391_v39 = vadd.f32 %v2390_v25, %v2376_v22 }
 0x3d3   : > { %v2484_v2 = vmul.f32 %v5335_v60, %v2475_v62  ;;  %v4732_v55 = vor.u32 %v5120_v36, %v4731_v46  ;;  %v4587_v60 = vld [vmem:[%s7621_s3 + $0x60] sm:$0xf]  ;;  %v5112_v40 = vld [vmem:[%s7621_s3 + $0x14c] sm:$0xf0]  ;;  %v5078_v16 = vld [vmem:[%s7621_s3 + $0x44] sm:$0xf] }
 0x3d4   : > { %4519 = vst [vmem:[%s5596_s19 + $0x20] sm:$0xff] %v7040_v57  ;;  %v2428_v13 = vadd.f32 %v5333_v41, %v2427_v56  ;;  %v2487_v4 = vpack.c.bf16 %v7040_v57, %v7040_v57  ;;  %3080 = vmatpush.bf16.msrb.mxu2 %v4752_v50  ;;  %v4608_v56 = vor.u32 %v5086_v49, %v4605_v51  ;;  %v4715_v62 = vld [vmem:[%s7621_s3 + $0x160] sm:$0xf]  ;;  %v4573_v17 = vld [vmem:[%s7621_s3 + $0x50] sm:$0xf0] }
 0x3d5   : > { %3051 = vmatpush.bf16.msrb.mxu0 %v4764_v28  ;;  %3065 = vmatpush.bf16.msrb.mxu1 %v4640_v29  ;;  %v4700_v18 = vor.u32 %v5112_v40, %v4699_v14  ;;  %v4576_v19 = vor.u32 %v5078_v16, %v4573_v17  ;;  %v4701_v21 = vld [vmem:[%s7621_s3 + $0x150] sm:$0xf0]  ;;  %v5076_v28 = vld [vmem:[%s7621_s3 + $0x2c] sm:$0xf0]  ;;  %v4683_v29 = vld [vmem:[%s7621_s3 + $0x120] sm:$0xf] }
 0x3d6   : > { %v2432_v63 = vsel %vm2431_vm14, %v5333_v41, %v2428_v13  ;;  %v2507_v6 = vunpack.c.l.b16 %v2487_v4  ;;  %v4748_v41 = vor.u32 %v5124_v37, %v4747_v34  ;;  %v4736_v13 = vor.u32 %v5118_v58, %v4733_v59  ;;  %v5108_v32 = vld [vmem:[%s7621_s3 + $0x12c] sm:$0xf0]  ;;  %v5074_v52 = vld [vmem:[%s7621_s3 + $0x24] sm:$0xf]  ;;  %v4685_v38 = vld [vmem:[%s7621_s3 + $0x130] sm:$0xf0] }
 0x3d7   : > { %v2437_v0 = vsel %vm2434_vm15, %v2436_v61, %v2432_v63  ;;  %v5084_v61 = vld [vmem:[%s7621_s3 + $0x6c] sm:$0xf0]  ;;  %v4556_v31 = vor.u32 %v5076_v28, %v4555_v12  ;;  %v4684_v34 = vor.u32 %v5108_v32, %v4683_v29  ;;  %v5106_v37 = vld [vmem:[%s7621_s3 + $0x124] sm:$0xf]  ;;  %v4539_v44 = vld [vmem:[%s7621_s3] sm:$0xf] }
 0x3d8   : > { %v2482_v1 = vmul.f32 %v2437_v0, %v6554_v27  ;;  %v5100_v27 = vld [vmem:[%s7621_s3 + $0xec] sm:$0xf0]  ;;  %3081 = vmatpush.bf16.msrb.mxu2 %v4736_v13  ;;  %v4588_v63 = vor.u32 %v5084_v61, %v4587_v60  ;;  %v4688_v43 = vor.u32 %v5106_v37, %v4685_v38  ;;  %v4667_v45 = vld [vmem:[%s7621_s3 + $0x100] sm:$0xf]  ;;  %v5102_v51 = vld [vmem:[%s7621_s3 + $0x104] sm:$0xf] }
 0x3d9   : > { %v4652_v11 = vor.u32 %v5100_v27, %v4651_v9  ;;  %3052 = vmatpush.bf16.msrb.mxu0 %v4748_v41  ;;  %3066 = vmatpush.bf16.msrb.mxu1 %v4624_v42  ;;  %v5116_v0 = vld [vmem:[%s7621_s3 + $0x16c] sm:$0xf0]  ;;  %v4210_v9 = vld [vmem:[%s5592_s17 + $0x98] sm:$0xff]  ;;  %v4787_v13 = vld [vmem:[%s7621_s3 + $0x1e8] sm:$0xf] }
 0x3da   : > { %v7046_v3 = vadd.f32 %v2484_v2, %v2482_v1  ;;  %v5082_v1 = vld [vmem:[%s7621_s3 + $0x64] sm:$0xf]  ;;  %v4589_v2 = vld [vmem:[%s7621_s3 + $0x70] sm:$0xf0]  ;;  %v4716_v4 = vor.u32 %v5116_v0, %v4715_v62  ;;  %v4214_v42 = vld [vmem:[%s5592_s17 + $0xb8] sm:$0xff] }
 0x3db   : > { %3036 = vmatpush.bf16.msra.mxu3 %v4652_v11  ;;  %v5080_v11 = vld [vmem:[%s7621_s3 + $0x4c] sm:$0xf0]  ;;  %v5101_v59 = vld [vmem:[%s7621_s3 + $0xf4] sm:$0xf0]  ;;  %v5099_v0 = vld [vmem:[%s7621_s3 + $0xec] sm:$0xf] }
 0x3dc   : > { %4520 = vst [vmem:[%s5596_s19 + $0x28] sm:$0xff] %v7046_v3  ;;  %v2488_v5 = vpack.c.bf16 %v7046_v3, %v7046_v3  ;;  %v4572_v15 = vor.u32 %v5080_v11, %v4571_v10  ;;  %v5072_v50 = vld [vmem:[%s7621_s3 + $0xc] sm:$0xf0]  ;;  %v5133_v60 = vld [vmem:[%s7621_s3 + $0x1f4] sm:$0xf0] }
 0x3dd   : > { %3053 = vmatpush.bf16.msrb.mxu0 %v4732_v55  ;;  %3067 = vmatpush.bf16.msrb.mxu1 %v4608_v56  ;;  %v4540_v53 = vor.u32 %v5072_v50, %v4539_v44  ;;  %v5104_v46 = vld [vmem:[%s7621_s3 + $0x10c] sm:$0xf0]  ;;  %v4659_v55 = vld [vmem:[%s7621_s3 + $0xe8] sm:$0xf]  ;;  %v2400_v56 = vadd.f32 %v4214_v42, %v2391_v39  ;;  %v5129_v11 = vld [vmem:[%s7621_s3 + $0x1d4] sm:$0xf0] }
 0x3de   : > { %v2508_v7 = vunpack.c.l.b16 %v2488_v5  ;;  %v4592_v5 = vor.u32 %v5082_v1, %v4589_v2  ;;  %v4668_v36 = vor.u32 %v5104_v46, %v4667_v45  ;;  %v4660_v62 = vor.u32 %v5101_v59, %v4659_v55  ;;  %v4661_v1 = vld [vmem:[%s7621_s3 + $0xf8] sm:$0xf0]  ;;  %v5131_v2 = vld [vmem:[%s7621_s3 + $0x1ec] sm:$0xf]  ;;  %v4771_v10 = vld [vmem:[%s7621_s3 + $0x1c8] sm:$0xf] }
 0x3df   : > { %3037 = vmatpush.bf16.msra.mxu3 %v4636_v24  ;;  %v4704_v24 = vor.u32 %v5110_v20, %v4701_v21  ;;  %v5095_v14 = vld [vmem:[%s7621_s3 + $0xcc] sm:$0xf]  ;;  %v4772_v16 = vor.u32 %v5129_v11, %v4771_v10  ;;  %v4645_v17 = vld [vmem:[%s7621_s3 + $0xd8] sm:$0xf0]  ;;  %v4627_v22 = vld [vmem:[%s7621_s3 + $0xa8] sm:$0xf] }
 0x3e0   : > { %v2509_v8 = vpack.c.b16 %v2508_v7, %v2507_v6  ;;  %v5114_v6 = vld [vmem:[%s7621_s3 + $0x164] sm:$0xf]  ;;  %v4717_v7 = vld [vmem:[%s7621_s3 + $0x170] sm:$0xf0]  ;;  %v4648_v20 = vor.u32 %v5095_v14, %v4645_v17  ;;  %v4773_v21 = vld [vmem:[%s7621_s3 + $0x1d8] sm:$0xf0] }
 0x3e1   : > { %v4720_v27 = vor.u32 %v5114_v6, %v4717_v7  ;;  %3054 = vmatpush.bf16.msrb.mxu0 %v4716_v4  ;;  %3068 = vmatpush.bf16.msrb.mxu1 %v4592_v5  ;;  %v4664_v5 = vor.u32 %v5099_v0, %v4661_v1  ;;  %v4789_v6 = vld [vmem:[%s7621_s3 + $0x1f8] sm:$0xf0]  ;;  %v4643_v7 = vld [vmem:[%s7621_s3 + $0xc8] sm:$0xf]  ;;  %v5091_v12 = vld [vmem:[%s7621_s3 + $0xac] sm:$0xf] }
 0x3e2   : > { %2567 = vmatmul.bf16.vlgmr.msra.gmra.mxu2 %v2509_v8  ;;  %v2389_v8 = vadd.f32 %v2388_v54, %v2374_v47  ;;  %v5070_v47 = vld [vmem:[%s7621_s3 + $0x4] sm:$0xf]  ;;  %v4669_v54 = vld [vmem:[%s7621_s3 + $0x110] sm:$0xf0]  ;;  %v4755_v25 = vld [vmem:[%s7621_s3 + $0x1a8] sm:$0xf] }
 0x3e3   : > { %3038 = vmatpush.bf16.msra.mxu3 %v4620_v35  ;;  %3082 = vmatpush.bf16.msrb.mxu2 %v4720_v27  ;;  %v4560_v35 = vor.u32 %v5074_v52, %v4557_v33  ;;  %v4672_v58 = vor.u32 %v5102_v51, %v4669_v54  ;;  %v4757_v32 = vld [vmem:[%s7621_s3 + $0x1b8] sm:$0xf0]  ;;  %v4739_v37 = vld [vmem:[%s7621_s3 + $0x188] sm:$0xf]  ;;  %v5121_v38 = vld [vmem:[%s7621_s3 + $0x194] sm:$0xf0] }
 0x3e4   : > { %v2396_v23 = vadd.f32 %v4210_v9, %v2389_v8  ;;  %v5097_v8 = vld [vmem:[%s7621_s3 + $0xd4] sm:$0xf0]  ;;  %v4792_v9 = vor.u32 %v5131_v2, %v4789_v6  ;;  %v5087_v39 = vld [vmem:[%s7621_s3 + $0x8c] sm:$0xf]  ;;  %v4740_v42 = vor.u32 %v5121_v38, %v4739_v37  ;;  %v4741_v50 = vld [vmem:[%s7621_s3 + $0x198] sm:$0xf0] }
 0x3e5   : > { %3055 = vmatpush.bf16.msrb.mxu0 %v4700_v18  ;;  %3069 = vmatpush.bf16.msrb.mxu1 %v4576_v19  ;;  %v4644_v27 = vor.u32 %v5097_v8, %v4643_v7  ;;  %v5127_v18 = vld [vmem:[%s7621_s3 + $0x1cc] sm:$0xf]  ;;  %v4595_v54 = vld [vmem:[%s7621_s3 + $0x68] sm:$0xf]  ;;  %v5085_v55 = vld [vmem:[%s7621_s3 + $0x74] sm:$0xf0] }
 0x3e6   : > { %v5119_v44 = vld [vmem:[%s7621_s3 + $0x18c] sm:$0xf]  ;;  %v4579_v8 = vld [vmem:[%s7621_s3 + $0x48] sm:$0xf]  ;;  %v5113_v11 = vld [vmem:[%s7621_s3 + $0x154] sm:$0xf0] }
 0x3e7   : > { %3039 = vmatpush.bf16.msra.mxu3 %v4604_v48  ;;  %3083 = vmatpush.bf16.msrb.mxu2 %v4704_v24  ;;  %v4541_v48 = vld [vmem:[%s7621_s3 + $0x10] sm:$0xf0]  ;;  %v5093_v24 = vld [vmem:[%s7621_s3 + $0xb4] sm:$0xf0]  ;;  %v5079_v14 = vld [vmem:[%s7621_s3 + $0x4c] sm:$0xf] }
 0x3e8   : > { %v4544_v49 = vor.u32 %v5070_v47, %v4541_v48  ;;  %v4628_v28 = vor.u32 %v5093_v24, %v4627_v22  ;;  %v4691_v24 = vld [vmem:[%s7621_s3 + $0x128] sm:$0xf] }
 0x3e9   : > { %3056 = vmatpush.bf16.msrb.mxu0 %v4684_v34  ;;  %3070 = vmatpush.bf16.msrb.mxu1 %v4560_v35  ;;  %v4611_v34 = vld [vmem:[%s7621_s3 + $0x88] sm:$0xf]  ;;  %v5089_v35 = vld [vmem:[%s7621_s3 + $0x94] sm:$0xf0] }
 0x3ea   : > { %v4547_v37 = vld [vmem:[%s7621_s3 + $0x8] sm:$0xf] }
 0x3eb   : > { %3040 = vmatpush.bf16.msra.mxu3 %v4588_v63  ;;  %3084 = vmatpush.bf16.msrb.mxu2 %v4688_v43  ;;  %v4788_v63 = vor.u32 %v5133_v60, %v4787_v13  ;;  %v4613_v43 = vld [vmem:[%s7621_s3 + $0x98] sm:$0xf0]  ;;  %v4596_v13 = vor.u32 %v5085_v55, %v4595_v54 }
 0x3ed   : > { %3057 = vmatpush.bf16.msrb.mxu0 %v4668_v36  ;;  %3071 = vmatpush.bf16.msrb.mxu1 %v4544_v49  ;;  %v4744_v49 = vor.u32 %v5119_v44, %v4741_v50  ;;  %v4675_v44 = vld [vmem:[%s7621_s3 + $0x108] sm:$0xf] }
 0x3ef   : > { %3041 = vmatpush.bf16.msra.mxu3 %v4572_v15  ;;  %3085 = vmatpush.bf16.msrb.mxu2 %v4672_v58  ;;  %v5117_v58 = vld [vmem:[%s7621_s3 + $0x174] sm:$0xf0] }
 0x3f1   : > { %3106 = vmatpush.bf16.msra.mxu0 %v4788_v63  ;;  %3120 = vmatpush.bf16.msra.mxu1 %v4664_v5  ;;  %v4725_v5 = vld [vmem:[%s7621_s3 + $0x178] sm:$0xf0] }
 0x3f3   : > { %3042 = vmatpush.bf16.msra.mxu3 %v4556_v31  ;;  %3134 = vmatpush.bf16.msra.mxu2 %v4792_v9  ;;  %v5123_v31 = vld [vmem:[%s7621_s3 + $0x1ac] sm:$0xf]  ;;  %v5081_v9 = vld [vmem:[%s7621_s3 + $0x54] sm:$0xf0] }
 0x3f4   : > { %v4760_v33 = vor.u32 %v5123_v31, %v4757_v32  ;;  %v4580_v10 = vor.u32 %v5081_v9, %v4579_v8  ;;  %v5140_v8 = vld [vmem:[%s7609_s4 + $0x30] sm:$0xff] }
 0x3f5   : > { %3107 = vmatpush.bf16.msra.mxu0 %v4772_v16  ;;  %3121 = vmatpush.bf16.msra.mxu1 %v4648_v20  ;;  %v4563_v20 = vld [vmem:[%s7621_s3 + $0x28] sm:$0xf] }
 0x3f7   : > { %3043 = vmatpush.bf16.msra.mxu3 %v4540_v53  ;;  %v4616_v53 = vor.u32 %v5087_v39, %v4613_v43  ;;  %v5073_v43 = vld [vmem:[%s7621_s3 + $0x14] sm:$0xf0] }
 0x3f8   : > { %v4548_v54 = vor.u32 %v5073_v43, %v4547_v37 }
 0x3fb   : > { %3092 = vmatpush.bf16.msrb.mxu3 %v4660_v62  ;;  %v4597_v62 = vld [vmem:[%s7621_s3 + $0x78] sm:$0xf0] }
 0x3ff   : > { %3093 = vmatpush.bf16.msrb.mxu3 %v4644_v27  ;;  %v4707_v27 = vld [vmem:[%s7621_s3 + $0x148] sm:$0xf] }
 0x400   : > { %v4708_v16 = vor.u32 %v5113_v11, %v4707_v27  ;;  %v5139_v27 = vld [vmem:[%s7609_s4 + $0x28] sm:$0xff]  ;;  %v4521_v11 = vld [vmem:[%s5592_s17 + $0xc0] sm:$0xff] }
 0x403   : > { %3094 = vmatpush.bf16.msrb.mxu3 %v4628_v28  ;;  %v5075_v28 = vld [vmem:[%s7621_s3 + $0x2c] sm:$0xf] }
 0x465   : > { %v2568_v26 = vpop.f32.mrf.mxu2 }
 0x466   : > { %v2573_v30 = vadd.f32 %v2568_v26, %v2396_v23  ;;  %v4776_v23 = vor.u32 %v5127_v18, %v4773_v21  ;;  %v5125_v26 = vld [vmem:[%s7621_s3 + $0x1b4] sm:$0xf0]  ;;  %v5111_v18 = vld [vmem:[%s7621_s3 + $0x14c] sm:$0xf] }
 0x467   : > { %v4756_v29 = vor.u32 %v5125_v26, %v4755_v25  ;;  %v5109_v25 = vld [vmem:[%s7621_s3 + $0x134] sm:$0xf0] }
 0x468   : > { %v4515_v41 = vmul.f32 -1.442695, %v2573_v30  ;;  %v4629_v30 = vld [vmem:[%s7621_s3 + $0xb8] sm:$0xf0]  ;;  %3135 = vmatpush.bf16.msra.mxu2 %v4776_v23  ;;  %v5077_v23 = vld [vmem:[%s7621_s3 + $0x34] sm:$0xf0] }
 0x469   : > { %v4632_v52 = vor.u32 %v5091_v12, %v4629_v30  ;;  %3108 = vmatpush.bf16.msra.mxu0 %v4756_v29  ;;  %v4565_v29 = vld [vmem:[%s7621_s3 + $0x38] sm:$0xf0]  ;;  %v5107_v30 = vld [vmem:[%s7621_s3 + $0x12c] sm:$0xf] }
 0x46a   : > { %5336 = vpow2.f32 %v4515_v41  ;;  %v4612_v41 = vor.u32 %v5089_v35, %v4611_v34  ;;  %v4692_v34 = vor.u32 %v5109_v25, %v4691_v24  ;;  %v4693_v35 = vld [vmem:[%s7621_s3 + $0x138] sm:$0xf0]  ;;  %v4525_v25 = vld [vmem:[%s5592_s17 + $0xe0] sm:$0xff] }
 0x46b   : > { %3122 = vmatpush.bf16.msra.mxu1 %v4632_v52  ;;  %v4696_v50 = vor.u32 %v5107_v30, %v4693_v35 }
 0x46c   : > { %3136 = vmatpush.bf16.msra.mxu2 %v4760_v33  ;;  %3095 = vmatpush.bf16.msrb.mxu3 %v4612_v41  ;;  %v4564_v33 = vor.u32 %v5077_v23, %v4563_v20  ;;  %v5137_v23 = vld [vmem:[%s7609_s4 + $0x18] sm:$0xff] }
 0x46d   : > { %v2570_v61 = vpop.f32.mrf.mxu2  ;;  %3109 = vmatpush.bf16.msra.mxu0 %v4740_v42  ;;  %v4568_v42 = vor.u32 %v5075_v28, %v4565_v29  ;;  %v4526_v29 = vld [vmem:[%s5592_s17 + $0xe8] sm:$0xff] }
 0x46e   : > { %v2574_v4 = vadd.f32 %v2570_v61, %v2400_v56  ;;  %v4723_v56 = vld [vmem:[%s7621_s3 + $0x168] sm:$0xf]  ;;  %v5083_v61 = vld [vmem:[%s7621_s3 + $0x6c] sm:$0xf] }
 0x46f   : > { %3123 = vmatpush.bf16.msra.mxu1 %v4616_v53  ;;  %v4724_v60 = vor.u32 %v5117_v58, %v4723_v56  ;;  %v4600_v2 = vor.u32 %v5083_v61, %v4597_v62  ;;  %v5071_v53 = vld [vmem:[%s7621_s3 + $0xc] sm:$0xf] }
 0x470   : > { %v5337_v15 = vpop.eup %5336  ;;  %v4516_v40 = vmul.f32 -1.442695, %v2574_v4  ;;  %3137 = vmatpush.bf16.msra.mxu2 %v4744_v49  ;;  %v5115_v4 = vld [vmem:[%s7621_s3 + $0x16c] sm:$0xf]  ;;  %3096 = vmatpush.bf16.msrb.mxu3 %v4596_v13 }
 0x471   : > { %v7293_v19 = vadd.f32 1.0, %v5337_v15  ;;  %v4728_v7 = vor.u32 %v5115_v4, %v4725_v5  ;;  %3110 = vmatpush.bf16.msra.mxu0 %v4724_v60  ;;  %v4581_v15 = vld [vmem:[%s7621_s3 + $0x58] sm:$0xf0]  ;;  %v5103_v49 = vld [vmem:[%s7621_s3 + $0x10c] sm:$0xf] }
 0x472   : > { %5338 = vpow2.f32 %v4516_v40  ;;  %v4584_v17 = vor.u32 %v5079_v14, %v4581_v15 }
 0x473   : > { %5340 = vrcp.f32 %v7293_v19  ;;  %v2592_v47 = vand.u32 2147483647, %v7293_v19  ;;  %v2594_v48 = vand.u32 2147483648, %v7293_v19  ;;  %vm2588_vm1 = vweird.f32 %v7293_v19  ;;  %3124 = vmatpush.bf16.msra.mxu1 %v4600_v2 }
 0x474   : > { %3138 = vmatpush.bf16.msra.mxu2 %v4728_v7  ;;  %3097 = vmatpush.bf16.msrb.mxu3 %v4580_v10  ;;  %v5141_v7 = vld [vmem:[%s7609_s4 + $0x38] sm:$0xff] }
 0x475   : > { %vm7378_vm3 = vcmp.eq.f32.partialorder %v2592_v47, 8.507059e+37  ;;  %v2595_v1 = vor.u32 1.1754944e-38, %v2594_v48  ;;  %3111 = vmatpush.bf16.msra.mxu0 %v4708_v16 }
 0x477   : > { %3125 = vmatpush.bf16.msra.mxu1 %v4584_v17 }
 0x478   : > { %v5339_v45 = vpop.eup %5338  ;;  %3098 = vmatpush.bf16.msrb.mxu3 %v4564_v33 }
 0x479   : > { %v5341_v46 = vpop.eup %5340  ;;  %v7349_v36 = vadd.f32 1.0, %v5339_v45  ;;  %v5105_v45 = vld [vmem:[%s7621_s3 + $0x114] sm:$0xf0]  ;;  %3112 = vmatpush.bf16.msra.mxu0 %v4692_v34 }
 0x47a   : > { %v2584_v51 = vmul.f32 %v5341_v46, %v7293_v19  ;;  %vm2589_vm0 = vweird.f32 %v5341_v46  ;;  %v4709_v19 = vld [vmem:[%s7621_s3 + $0x158] sm:$0xf0]  ;;  %v4676_v55 = vor.u32 %v5105_v45, %v4675_v44 }
 0x47b   : > { %5342 = vrcp.f32 %v7349_v36  ;;  %vm7374_vm2 = vmor %vm2588_vm1, %vm2589_vm0  ;;  %v4712_v22 = vor.u32 %v5111_v18, %v4709_v19  ;;  %v2607_v52 = vand.u32 2147483647, %v7349_v36  ;;  %v2609_v41 = vand.u32 2147483648, %v7349_v36  ;;  %3126 = vmatpush.bf16.msra.mxu1 %v4568_v42  ;;  %v5138_v18 = vld [vmem:[%s7609_s4 + $0x20] sm:$0xff] }
 0x47c   : > { %v2585_v59 = vsub.f32 1.0, %v2584_v51  ;;  %5344 = vtanh.f32 %v7040_v57  ;;  %v4677_v51 = vld [vmem:[%s7621_s3 + $0x118] sm:$0xf0]  ;;  %vm2603_vm5 = vweird.f32 %v7349_v36  ;;  %3099 = vmatpush.bf16.msrb.mxu3 %v4548_v54 }
 0x47d   : > { %5346 = vtanh.f32 %v7046_v3  ;;  %3139 = vmatpush.bf16.msra.mxu2 %v4712_v22  ;;  %v4680_v13 = vor.u32 %v5103_v49, %v4677_v51  ;;  %vm2608_vm7 = vcmp.eq.f32.partialorder %v2607_v52, 8.507059e+37  ;;  %3113 = vmatpush.bf16.msra.mxu0 %v4676_v55 }
 0x47e   : > { %v2586_v6 = vmul.f32 %v5341_v46, %v2585_v59  ;;  %v2610_v59 = vor.u32 1.1754944e-38, %v2609_v41  ;;  %v5135_v41 = vld [vmem:[%s7609_s4 + $0x8] sm:$0xff] }
 0x480   : > { %v2587_v40 = vadd.f32 %v5341_v46, %v2586_v6 }
 0x481   : > { %v5343_v21 = vpop.eup %5342  ;;  %3140 = vmatpush.bf16.msra.mxu2 %v4696_v50  ;;  %v5134_v50 = vld [vmem:[%s7609_s4] sm:$0xff] }
 0x482   : > { %v2591_v26 = vsel %vm7374_vm2, %v5341_v46, %v2587_v40  ;;  %v2599_v12 = vmul.f32 %v5343_v21, %v7349_v36  ;;  %v5345_v31 = vpop.eup %5344  ;;  %v4549_v46 = vld [vmem:[%s7621_s3 + $0x18] sm:$0xf0]  ;;  %vm2604_vm4 = vweird.f32 %v5343_v21  ;;  %v4522_v40 = vld [vmem:[%s5592_s17 + $0xc8] sm:$0xff] }
 0x483   : > { %v2596_v32 = vsel %vm7378_vm3, %v2595_v1, %v2591_v26  ;;  %v4552_v58 = vor.u32 %v5071_v53, %v4549_v46  ;;  %vm2605_vm6 = vmor %vm2603_vm5, %vm2604_vm4  ;;  %v5347_v61 = vpop.eup %5346  ;;  %v4523_v53 = vld [vmem:[%s5592_s17 + $0xd0] sm:$0xff] }
 0x484   : > { %v2615_v38 = vmul.f32 %v5345_v31, %v2596_v32  ;;  %v2600_v39 = vsub.f32 1.0, %v2599_v12  ;;  %v5136_v32 = vld [vmem:[%s7609_s4 + $0x10] sm:$0xff] }
 0x485   : > { %3127 = vmatpush.bf16.msra.mxu1 %v4552_v58  ;;  %3141 = vmatpush.bf16.msra.mxu2 %v4680_v13 }
 0x486   : > { %v5169_v47 = vpack.c.bf16 %v7040_v57, %v2615_v38  ;;  %4517 = vst [vmem:[%s5594_s18 + $0x20] sm:$0xff] %v2615_v38  ;;  %v2601_v48 = vmul.f32 %v5343_v21, %v2600_v39 }
 0x488   : > { %5170 = vst [vmem:[#allocation2] sm:$0xff] %v5169_v47   ;;  %v2602_v56 = vadd.f32 %v5343_v21, %v2601_v48 }
 0x48a   : > { %v2606_v60 = vsel %vm2605_vm6, %v5343_v21, %v2602_v56 }
 0x48b   : > { %v2611_v62 = vsel %vm2608_vm7, %v2610_v59, %v2606_v60 }
 0x48c   : > { %v2616_v63 = vmul.f32 %v5347_v61, %v2611_v62 }
 0x48e   : > { %v5174_v0 = vpack.c.bf16 %v7046_v3, %v2616_v63  ;;  %4518 = vst [vmem:[%s5594_s18 + $0x28] sm:$0xff] %v2616_v63 }
 0x48f   : > { %v4531_v36 = vld [vmem:[#allocation2] sm:$0xf]  ;;  %v5068_v2 = vld [vmem:[#allocation2 + $0x4] sm:$0xf] }
 0x490   : > { %5188 = vst [vmem:[#allocation2 + $0x8] sm:$0xff] %v5174_v0  }
 0x497   : > { %v5069_v1 = vld [vmem:[#allocation2 + $0x4] sm:$0xf0]  ;;  %v4533_v4 = vld [vmem:[#allocation2 + $0x8] sm:$0xf0] }
 0x498   : > { %v4532_v5 = vor.u32 %v5069_v1, %v4531_v36  ;;  %v4536_v6 = vor.u32 %v5068_v2, %v4533_v4 }
 0x49a   : > { %3044 = vmatmul.bf16.vlgmr.msra.gmra.mxu3 %v4532_v5  ;;  %3058 = vmatmul.bf16.vlgmr.msrb.gmra.mxu0 %v4536_v6 }
 0x49b   : > { %3072 = vmatmul.bf16.vlgmr.msrb.gmra.mxu1 %v4532_v5  ;;  %3086 = vmatmul.bf16.vlgmr.msrb.gmra.mxu2 %v4536_v6 }
 0x49c   : > { %3314 = vmatpush.bf16.msra.mxu3 %v5141_v7 }
 0x4a0   : > { %3315 = vmatpush.bf16.msra.mxu3 %v5140_v8 }
 0x4a4   : > { %3316 = vmatpush.bf16.msra.mxu3 %v5139_v27 }
 0x4a8   : > { %3317 = vmatpush.bf16.msra.mxu3 %v5138_v18 }
 0x4aa   : > { %3100 = vmatmul.bf16.vlgmr.msrb.gmra.mxu3 %v4532_v5  ;;  %3114 = vmatmul.bf16.vlgmr.msra.gmra.mxu0 %v4536_v6 }
 0x4ab   : > { %3128 = vmatmul.bf16.vlgmr.msra.gmra.mxu1 %v4532_v5  ;;  %3142 = vmatmul.bf16.vlgmr.msra.gmra.mxu2 %v4536_v6 }
 0x4ac   : > { %3318 = vmatpush.bf16.msra.mxu3 %v5137_v23 }
 0x4b0   : > { %3319 = vmatpush.bf16.msra.mxu3 %v5136_v32 }
 0x4b4   : > { %3320 = vmatpush.bf16.msra.mxu3 %v5135_v41 }
 0x4b8   : > { %3321 = vmatpush.bf16.msra.mxu3 %v5134_v50 }
 0x517   : > { %v3059_v9 = vpop.f32.mrf.mxu0 }
 0x518   : > { %v3073_v10 = vpop.f32.mrf.mxu1 }
 0x51d   : > { %v3045_v14 = vpop.f32.mrf.mxu3 }
 0x51e   : > { %v3060_v15 = vadd.f32 %v3059_v9, %v3045_v14  ;;  %v3087_v16 = vpop.f32.mrf.mxu2  ;;  %v4527_v9 = vld [vmem:[%s5592_s17 + $0xf0] sm:$0xff] }
 0x51f   : > { %v3088_v17 = vadd.f32 %v3087_v16, %v3073_v10  ;;  %v3061_v24 = vpop.f32.mrf.mxu0 }
 0x520   : > { %v3148_v19 = vadd.f32 %v4521_v11, %v3060_v15  ;;  %v3075_v12 = vpop.f32.mrf.mxu1 }
 0x521   : > { %v3149_v20 = vadd.f32 %v4522_v40, %v3088_v17 }
 0x522   : > { %v4793_v21 = vmul.f32 -1.442695, %v3148_v19 }
 0x523   : > { %v4795_v22 = vmul.f32 -1.442695, %v3149_v20 }
 0x524   : > { %5348 = vpow2.f32 %v4793_v21 }
 0x525   : > { %5350 = vpow2.f32 %v4795_v22  ;;  %v3047_v26 = vpop.f32.mrf.mxu3 }
 0x526   : > { %v3062_v28 = vadd.f32 %v3061_v24, %v3047_v26  ;;  %v3089_v30 = vpop.f32.mrf.mxu2 }
 0x527   : > { %v3090_v31 = vadd.f32 %v3089_v30, %v3075_v12  ;;  %v3115_v44 = vpop.f32.mrf.mxu0 }
 0x528   : > { %v3152_v52 = vadd.f32 %v4525_v25, %v3062_v28 }
 0x529   : > { %v3153_v33 = vadd.f32 %v4526_v29, %v3090_v31 }
 0x52a   : > { %v5349_v34 = vpop.eup %5348  ;;  %v4794_v35 = vmul.f32 -1.442695, %v3152_v52 }
 0x52b   : > { %v5351_v37 = vpop.eup %5350  ;;  %v3162_v38 = vadd.f32 1.0, %v5349_v34  ;;  %v4796_v39 = vmul.f32 -1.442695, %v3153_v33 }
 0x52c   : > { %v3200_v42 = vadd.f32 1.0, %v5351_v37  ;;  %5352 = vpow2.f32 %v4794_v35 }
 0x52d   : > { %5354 = vrcp.f32 %v3162_v38  ;;  %v3101_v43 = vpop.f32.mrf.mxu3  ;;  %v3175_v13 = vand.u32 2147483648, %v3162_v38  ;;  %v3173_v61 = vand.u32 2147483647, %v3162_v38  ;;  %vm3169_vm10 = vweird.f32 %v3162_v38 }
 0x52e   : > { %5356 = vrcp.f32 %v3200_v42  ;;  %v3116_v45 = vadd.f32 %v3115_v44, %v3101_v43  ;;  %v3213_v0 = vand.u32 2147483648, %v3200_v42  ;;  %v3211_v1 = vand.u32 2147483647, %v3200_v42 }
 0x52f   : > { %5358 = vpow2.f32 %v4796_v39  ;;  %v3117_v2 = vpop.f32.mrf.mxu0  ;;  %v3176_v7 = vor.u32 1.1754944e-38, %v3175_v13  ;;  %vm3207_vm12 = vweird.f32 %v3200_v42  ;;  %vm3174_vm13 = vcmp.eq.f32.partialorder %v3173_v61, 8.507059e+37 }
 0x530   : > { %v3150_v49 = vadd.f32 %v4523_v53, %v3116_v45  ;;  %v3214_v11 = vor.u32 1.1754944e-38, %v3213_v0  ;;  %vm3212_vm15 = vcmp.eq.f32.partialorder %v3211_v1, 8.507059e+37 }
 0x532   : > { %v5353_v46 = vpop.eup %5352 }
 0x533   : > { %v5355_v47 = vpop.eup %5354  ;;  %v7502_v48 = vadd.f32 1.0, %v5353_v46 }
 0x534   : > { %v5357_v51 = vpop.eup %5356  ;;  %v3165_v54 = vmul.f32 %v5355_v47, %v3162_v38  ;;  %vm3170_vm8 = vweird.f32 %v5355_v47 }
 0x535   : > { %v5359_v55 = vpop.eup %5358  ;;  %v3203_v56 = vmul.f32 %v5357_v51, %v3200_v42  ;;  %5360 = vrcp.f32 %v7502_v48  ;;  %v3103_v62 = vpop.f32.mrf.mxu3  ;;  %vm3208_vm9 = vweird.f32 %v5357_v51  ;;  %vm3171_vm11 = vmor %vm3169_vm10, %vm3170_vm8  ;;  %v3190_v21 = vand.u32 2147483648, %v7502_v48 }
 0x536   : > { %v3166_v58 = vsub.f32 1.0, %v3165_v54  ;;  %v7505_v59 = vadd.f32 1.0, %v5359_v55  ;;  %5362 = vtanh.f32 %v3150_v49  ;;  %v3118_v5 = vadd.f32 %v3117_v2, %v3103_v62  ;;  %vm3209_vm14 = vmor %vm3207_vm12, %vm3208_vm9 }
 0x537   : > { %v3204_v60 = vsub.f32 1.0, %v3203_v56  ;;  %v3188_v25 = vand.u32 2147483647, %v7502_v48  ;;  %vm3184_vm1 = vweird.f32 %v7502_v48 }
 0x538   : > { %v3167_v63 = vmul.f32 %v5355_v47, %v3166_v58  ;;  %5364 = vrcp.f32 %v7505_v59  ;;  %v3154_v20 = vadd.f32 %v4527_v9, %v3118_v5  ;;  %v3228_v29 = vand.u32 2147483648, %v7505_v59 }
 0x539   : > { %v3205_v36 = vmul.f32 %v5357_v51, %v3204_v60  ;;  %v3226_v31 = vand.u32 2147483647, %v7505_v59  ;;  %vm3189_vm4 = vcmp.eq.f32.partialorder %v3188_v25, 8.507059e+37  ;;  %vm3222_vm5 = vweird.f32 %v7505_v59 }
 0x53a   : > { %v3168_v4 = vadd.f32 %v5355_v47, %v3167_v63  ;;  %5366 = vtanh.f32 %v3154_v20  ;;  %v3229_v34 = vor.u32 1.1754944e-38, %v3228_v29 }
 0x53b   : > { %v5361_v6 = vpop.eup %5360  ;;  %v3206_v8 = vadd.f32 %v5357_v51, %v3205_v36  ;;  %vm3227_vm7 = vcmp.eq.f32.partialorder %v3226_v31, 8.507059e+37 }
 0x53c   : > { %v3180_v27 = vmul.f32 %v5361_v6, %v7502_v48  ;;  %v3172_v10 = vsel %vm3171_vm11, %v5355_v47, %v3168_v4  ;;  %v5363_v14 = vpop.eup %5362  ;;  %vm3185_vm0 = vweird.f32 %v5361_v6 }
 0x53d   : > { %v3177_v15 = vsel %vm3174_vm13, %v3176_v7, %v3172_v10  ;;  %v3210_v40 = vsel %vm3209_vm14, %v5357_v51, %v3206_v8  ;;  %vm3186_vm2 = vmor %vm3184_vm1, %vm3185_vm0 }
 0x53e   : > { %v5365_v16 = vpop.eup %5364  ;;  %v3181_v17 = vsub.f32 1.0, %v3180_v27  ;;  %v3215_v18 = vsel %vm3212_vm15, %v3214_v11, %v3210_v40  ;;  %v3236_v19 = vmul.f32 %v3177_v15, %v7040_v57  ;;  %v3191_v57 = vor.u32 1.1754944e-38, %v3190_v21 }
 0x53f   : > { %v3218_v22 = vmul.f32 %v5365_v16, %v7505_v59  ;;  %v3238_v23 = vmul.f32 %v5363_v14, %v3215_v18  ;;  %vm3223_vm3 = vweird.f32 %v5365_v16 }
 0x540   : > { %v3182_v24 = vmul.f32 %v5361_v6, %v3181_v17  ;;  %vm3224_vm6 = vmor %vm3222_vm5, %vm3223_vm3  ;;  %v5367_v38 = vpop.eup %5366 }
 0x541   : > { %v3219_v26 = vsub.f32 1.0, %v3218_v22  ;;  %v7515_v12 = vadd.f32 %v3238_v23, %v3236_v19 }
 0x542   : > { %v3183_v28 = vadd.f32 %v5361_v6, %v3182_v24 }
 0x543   : > { %3372 = vst [vmem:[#allocation3] sm:$0xff] %v7515_v12  ;;  %v3220_v30 = vmul.f32 %v5365_v16, %v3219_v26  ;;  %v3242_v43 = vpack.c.bf16 %v7515_v12, %v7515_v12 }
 0x544   : > { %4833 = vst [vmem:[%s5596_s19 + $0x30] sm:$0xff] %v7515_v12  ;;  %v3187_v32 = vsel %vm3186_vm2, %v5361_v6, %v3183_v28 }
 0x545   : > { %v3192_v52 = vsel %vm3189_vm4, %v3191_v57, %v3187_v32  ;;  %v3221_v33 = vadd.f32 %v5365_v16, %v3220_v30  ;;  %v3262_v50 = vunpack.c.l.b16 %v3242_v43 }
 0x546   : > { %v3237_v37 = vmul.f32 %v3192_v52, %v7046_v3 }
 0x547   : > { %v3225_v35 = vsel %vm3224_vm6, %v5365_v16, %v3221_v33 }
 0x548   : > { %v3230_v39 = vsel %vm3227_vm7, %v3229_v34, %v3225_v35 }
 0x549   : > { %v3239_v41 = vmul.f32 %v5367_v38, %v3230_v39 }
 0x54b   : > { %v7525_v42 = vadd.f32 %v3239_v41, %v3237_v37 }
 0x54d   : > { %3373 = vst [vmem:[#allocation3 + $0x8] sm:$0xff] %v7525_v42  ;;  %v3243_v44 = vpack.c.bf16 %v7525_v42, %v7525_v42 }
 0x54e   : > { %4834 = vst [vmem:[%s5596_s19 + $0x38] sm:$0xff] %v7525_v42 }
 0x54f   : > { %v3263_v45 = vunpack.c.l.b16 %v3243_v44 }
 0x551   : > { %v3264_v3 = vpack.c.b16 %v3263_v45, %v3262_v50 }
 0x553   : > { %3322 = vmatmul.bf16.vlgmr.msra.gmra.mxu3 %v3264_v3 }
 0x554   : > { %5407 = shalt.err (!%p5404_p6)
}
 0x555   : > { %s5492_s19 = smov 128   ;;  %s5493_s12 = smov 8   ;;  %v3143_v53 = vpop.f32.mrf.mxu2  ;;  %v3129_v46 = vpop.f32.mrf.mxu1  ;;  %v4524_v48 = vld [vmem:[%s5592_s17 + $0xd8] sm:$0xff] }
 0x556   : > { %5191 = dma.vmem_to_hbm [thread:$0]  (%p5569_p4), %s3428_s14, 1024, %s3430_s15, %s3392_s16, %s5492_s19, %s5492_s19, %s5493_s12   ;;  %v3144_v47 = vadd.f32 %v3143_v53, %v3129_v46 }
 0x557   : > { %v4528_v13 = vld [vmem:[%s5592_s17 + $0xf8] sm:$0xff]  ;;  %s3406_s17 = scalar_lea.hbm %s7610_s5, %s5143_s8  ;;  %s3407_s13 = sshll.u32 %s5594_s18, 4  ;;  %s3408_s13 = int_to_ptr.vmem [resolvable:$true] %s3407_s13 }
 0x558   : > { %v3151_v49 = vadd.f32 %v4524_v48, %v3144_v47  ;;  %s3409_s0 = sshll.u32 %s3406_s17, 4  ;;  %s3387_s24 = scalar_lea.sflag [#allocation5], %s5585_s11  ;;  %s3410_s0 = int_to_ptr.hbm [resolvable:$true] %s3409_s0 }
 0x559   : > { %s5422_s8 = sshra.s32 %s3410_s0, 4  ;;  %s5428_s20 = scalar_lea.hbm %s7610_s5, 128  ;;  %s5423_s8 = int_to_ptr.hbm [resolvable:$true] %s5422_s8 }
 0x55a   : > { %s5424_s14 = scalar_lea.hbm %s5423_s8, 64  ;;  %p5429_p11 = scmp.lt.s32.totalorder %s5423_s8, %s7610_s5 }
 0x55b   : > { %p5425_p7 = scmp.ne.s32.totalorder %s5423_s8, %s5424_s14  ;;  %p5430_p12 = scmp.lt.s32.totalorder %s5428_s20, %s5424_s14 }
 0x55d   : > { %v3145_v51 = vpop.f32.mrf.mxu2  ;;  %v3131_v56 = vpop.f32.mrf.mxu1  ;;  %p5426_p9 = pnand %p5425_p7, %p5569_p4  ;;  %p5431_p13 = por %p5430_p12, %p5429_p11 }
 0x55e   : > { %v3146_v58 = vadd.f32 %v3145_v51, %v3131_v56 }
 0x55f   : > { %p5427_p10 = pneg %p5426_p9 }
 0x560   : > { %v3155_v60 = vadd.f32 %v4528_v13, %v3146_v58 }
 0x561   : > { %p5432_p0 = pnand %p5431_p13, %p5427_p10 }
 0x5d6   : > { %v3323_v54 = vpop.f32.mrf.mxu3 }
 0x5d7   : > { %v3328_v55 = vadd.f32 %v3323_v54, %v3151_v49 }
 0x5d9   : > { %v4829_v59 = vmul.f32 -1.442695, %v3328_v55 }
 0x5db   : > { %5368 = vpow2.f32 %v4829_v59 }
 0x5de   : > { %v3325_v61 = vpop.f32.mrf.mxu3 }
 0x5df   : > { %v3329_v62 = vadd.f32 %v3325_v61, %v3155_v60 }
 0x5e1   : > { %v5369_v63 = vpop.eup %5368  ;;  %v4830_v0 = vmul.f32 -1.442695, %v3329_v62 }
 0x5e2   : > { %v3336_v36 = vadd.f32 1.0, %v5369_v63 }
 0x5e3   : > { %5370 = vpow2.f32 %v4830_v0 }
 0x5e4   : > { %5372 = vrcp.f32 %v3336_v36  ;;  %v3349_v7 = vand.u32 2147483648, %v3336_v36  ;;  %v3347_v9 = vand.u32 2147483647, %v3336_v36  ;;  %vm3343_vm9 = vweird.f32 %v3336_v36 }
 0x5e6   : > { %v3350_v11 = vor.u32 1.1754944e-38, %v3349_v7  ;;  %vm3348_vm11 = vcmp.eq.f32.partialorder %v3347_v9, 8.507059e+37 }
 0x5e9   : > { %v5371_v1 = vpop.eup %5370 }
 0x5ea   : > { %v5373_v2 = vpop.eup %5372  ;;  %v3337_v4 = vadd.f32 1.0, %v5371_v1 }
 0x5eb   : > { %v3339_v5 = vmul.f32 %v5373_v2, %v3336_v36  ;;  %vm3344_vm8 = vweird.f32 %v5373_v2 }
 0x5ec   : > { %5374 = vrcp.f32 %v3337_v4  ;;  %vm3345_vm10 = vmor %vm3343_vm9, %vm3344_vm8  ;;  %v3364_v19 = vand.u32 2147483648, %v3337_v4  ;;  %v3362_v22 = vand.u32 2147483647, %v3337_v4  ;;  %vm3358_vm13 = vweird.f32 %v3337_v4 }
 0x5ed   : > { %v3340_v6 = vsub.f32 1.0, %v3339_v5  ;;  %5376 = vtanh.f32 %v7515_v12 }
 0x5ee   : > { %5378 = vtanh.f32 %v7525_v42  ;;  %v3365_v24 = vor.u32 1.1754944e-38, %v3364_v19  ;;  %vm3363_vm15 = vcmp.eq.f32.partialorder %v3362_v22, 8.507059e+37 }
 0x5ef   : > { %v3341_v8 = vmul.f32 %v5373_v2, %v3340_v6 }
 0x5f1   : > { %v3342_v27 = vadd.f32 %v5373_v2, %v3341_v8 }
 0x5f2   : > { %v5375_v10 = vpop.eup %5374 }
 0x5f3   : > { %v3346_v14 = vsel %vm3345_vm10, %v5373_v2, %v3342_v27  ;;  %v3354_v15 = vmul.f32 %v5375_v10, %v3337_v4  ;;  %v5377_v40 = vpop.eup %5376  ;;  %vm3359_vm12 = vweird.f32 %v5375_v10 }
 0x5f4   : > { %v3351_v16 = vsel %vm3348_vm11, %v3350_v11, %v3346_v14  ;;  %vm3360_vm14 = vmor %vm3358_vm13, %vm3359_vm12  ;;  %v5379_v26 = vpop.eup %5378 }
 0x5f5   : > { %v3370_v17 = vmul.f32 %v5377_v40, %v3351_v16  ;;  %v3355_v18 = vsub.f32 1.0, %v3354_v15 }
 0x5f7   : > { %v5179_v20 = vpack.c.bf16 %v7515_v12, %v3370_v17  ;;  %4831 = vst [vmem:[%s5594_s18 + $0x30] sm:$0xff] %v3370_v17  ;;  %v3356_v21 = vmul.f32 %v5375_v10, %v3355_v18 }
 0x5f9   : > { %5180 = vst [vmem:[#allocation2] sm:$0xff] %v5179_v20   ;;  %v3357_v23 = vadd.f32 %v5375_v10, %v3356_v21 }
 0x5fb   : > { %v3361_v25 = vsel %vm3360_vm14, %v5375_v10, %v3357_v23 }
 0x5fc   : > { %v3366_v12 = vsel %vm3363_vm15, %v3365_v24, %v3361_v25 }
 0x5fd   : > { %v3371_v28 = vmul.f32 %v5379_v26, %v3366_v12 }
 0x5ff   : > { %v5184_v29 = vpack.c.bf16 %v7525_v42, %v3371_v28  ;;  %4832 = vst [vmem:[%s5594_s18 + $0x38] sm:$0xff] %v3371_v28 }
 0x600   : > { %5435 = shalt.err (!%p5432_p0)
}
 0x601   : > { %5190 = dma.vmem_to_hbm [thread:$0]  (%p5569_p4), %s3408_s13, 1024, %s3410_s0, %s3387_s24, %s5492_s19, %s5492_s19, %s5493_s12   ;;  %5189 = vst [vmem:[#allocation2 + $0x8] sm:$0xff] %v5184_v29  }
 0x602 PF: > { %p5201_p1 = scmp.ge.s32.totalorder %s5490_s26, 2  ;;  %s3444_s11 = sand.u32 1, %s5470_s21  }
 0x603   : > { %s3445_s18 = scalar_lea.sflag [#allocation5], %s3444_s11 }
 0x604   : > { %p5195_p2 = pnand %p5201_p1, %p5576_p8 }
 0x606   : > { %p5196_p3 = pneg %p5195_p2 }
 0x608   : > { %5461 = dma.done.wait (%p5196_p3), %s3445_s18, 1024  }
 0x609   : > { %5463 = vsyncadd (%p5196_p3), %s3445_s18, 4294966272  ;;  %s3455_s28 = scalar_lea.sflag [#allocation7], %s3444_s11 }
 0x60a   : > { %5465 = dma.done.wait (%p5196_p3), %s3455_s28, 1024  }
 0x60b   : > { %5467 = vsyncadd (%p5196_p3), %s3455_s28, 4294966272  ;;  %s23_s26 = sadd.s32 1, %s5490_s26   ;;  %s7640_s21 = smov %s5474_s22 }
 0x60c   : > { %p20_p5 = scmp.ge.s32.totalorder %s23_s26, 4   ;;  %s7641_s22 = smov %s5478_s23 }
 0x60d   : > { %s7642_s23 = smov %s5582_s10  ;;  %s7643_s24 = smov %s5486_s25 }
 0x60e   : > { %s7644_s25 = smov %s7646_s29  ;;  %22 = sbr.rel (!%p20_p5) target bundleno = 11 (0xb), region = 111 }
 0x613   :  { %3461 = vsyncpa [#allocation5], 1 }
 0x614   :  { %3463 = vsyncpa [#allocation5 + $0x1], 1 }
 0x615   :  { %3464 = vsyncpa [#allocation7], 1 }
 0x616   :  { %3466 = vsyncpa [#allocation7 + $0x1], 1 }

</bundles_post_ra>
